<compile_context>
chip_gen: v6e
topology: v6e:2x2x1
jax: 0.10.0
libtpu: 0.0.40
codegen_flags: <defaults>
</compile_context>

<pallas_src>
import functools

import jax
import jax.numpy as jnp
from jax.experimental import pallas as pl
from jax.experimental.pallas import tpu as pltpu


# ---------------------------------------------------------------------------
# small helpers
# ---------------------------------------------------------------------------
def _round_up(x, m):
    return (x + m - 1) // m * m


def _pad_cols(a, multiple):
    n = a.shape[-1]
    n_pad = _round_up(n, multiple)
    if n_pad == n:
        return a
    pad = [(0, 0)] * (a.ndim - 1) + [(0, n_pad - n)]
    return jnp.pad(a, pad)


# ---------------------------------------------------------------------------
# Pallas kernel: fused  out = relu(x @ w + b)   (bf16 in, fp32 accumulate)
# ---------------------------------------------------------------------------
def _matmul_bias_relu_kernel(x_ref, w_ref, b_ref, o_ref):
    acc = jnp.dot(x_ref[...], w_ref[...], preferred_element_type=jnp.float32)
    acc = jnp.maximum(acc + b_ref[...], 0.0)
    o_ref[...] = acc.astype(o_ref.dtype)


def matmul_bias_relu(x, w, b, *, out_dtype=jnp.bfloat16, tm_max=256):
    """x:(M,K) bf16, w:(K,Np) bf16 with Np%128==0, b:(1,Np) f32 -> (M,Np).

    M-tiled grid (parallel axis); K and N stay whole so the weight block is
    resident across the grid. Per-block VMEM stays well under the default
    scoped limit on v5e/v6e/v7x (largest weight block = bf16 3.2 MB)."""
    M, K = x.shape
    Kw, Np = w.shape
    assert K == Kw and Np % 128 == 0, (K, Kw, Np)
    tm = min(tm_max, _round_up(M, 8))
    Mp = _round_up(M, tm)
    if Mp != M:
        x = jnp.pad(x, ((0, Mp - M), (0, 0)))
    out = pl.pallas_call(
        _matmul_bias_relu_kernel,
        out_shape=jax.ShapeDtypeStruct((Mp, Np), out_dtype),
        grid=(Mp // tm,),
        in_specs=[
            pl.BlockSpec((tm, K), lambda i: (i, 0)),
            pl.BlockSpec((K, Np), lambda i: (0, 0)),   # weight stays resident
            pl.BlockSpec((1, Np), lambda i: (0, 0)),
        ],
        out_specs=pl.BlockSpec((tm, Np), lambda i: (i, 0)),
        compiler_params=pltpu.CompilerParams(
            dimension_semantics=("parallel",)),
    )(x, w, b)
    return out[:M] if Mp != M else out


# ---------------------------------------------------------------------------
# Conv = patch extraction (single XLA op) + fused Pallas matmul/bias/relu
# ---------------------------------------------------------------------------
def conv2d_relu(x_nhwc, w_patch, b, *, kh, kw, stride, oc):
    """x_nhwc: bf16 (N,H,W,C). w_patch: (C*KH*KW, OC_pad) bf16, rows ordered
    (c, kh, kw) to match conv_general_dilated_patches. b: (1, OC_pad) f32."""
    n = x_nhwc.shape[0]
    patches = jax.lax.conv_general_dilated_patches(
        x_nhwc, (kh, kw), (stride, stride), "VALID",
        dimension_numbers=("NHWC", "HWIO", "NHWC"))
    _, oh, ow, k = patches.shape
    y = matmul_bias_relu(patches.reshape(n * oh * ow, k), w_patch, b)
    return y[:, :oc].reshape(n, oh, ow, oc)


# ---------------------------------------------------------------------------
# Fused FC tail: FC1 + ReLU + FC2 + masked softmax in ONE kernel
# ---------------------------------------------------------------------------
def _fc_tail_kernel(x_ref, w1_ref, b1_ref, w2_ref, b2_ref, o_ref, *, action_size):
    h = jnp.dot(x_ref[...], w1_ref[...], preferred_element_type=jnp.float32)
    h = jnp.maximum(h + b1_ref[...], 0.0)
    logits = jnp.dot(h.astype(jnp.bfloat16), w2_ref[...],
                     preferred_element_type=jnp.float32) + b2_ref[...]
    lane = jax.lax.broadcasted_iota(jnp.int32, logits.shape, 1)
    logits = jnp.where(lane < action_size, logits, jnp.float32(-1e30))
    m = jnp.max(logits, axis=-1, keepdims=True)
    e = jnp.exp(logits - m)
    o_ref[...] = (e / jnp.sum(e, axis=-1, keepdims=True)).astype(o_ref.dtype)


def fc_tail(x, w1, b1, w2, b2, *, action_size):
    """x:(M,3136) bf16 -> softmax probabilities (M, action_size) f32."""
    M, K = x.shape
    Mp = _round_up(M, 8)
    if Mp != M:
        x = jnp.pad(x, ((0, Mp - M), (0, 0)))
    N1 = w1.shape[1]
    N2 = w2.shape[1]          # padded to 128 lanes
    probs = pl.pallas_call(
        functools.partial(_fc_tail_kernel, action_size=action_size),
        out_shape=jax.ShapeDtypeStruct((Mp, N2), jnp.float32),
        grid=(1,),
        in_specs=[
            pl.BlockSpec((Mp, K), lambda i: (0, 0)),
            pl.BlockSpec((K, N1), lambda i: (0, 0)),
            pl.BlockSpec((1, N1), lambda i: (0, 0)),
            pl.BlockSpec((N1, N2), lambda i: (0, 0)),
            pl.BlockSpec((1, N2), lambda i: (0, 0)),
        ],
        out_specs=pl.BlockSpec((Mp, N2), lambda i: (0, 0)),
        compiler_params=pltpu.CompilerParams(
            dimension_semantics=("arbitrary",)),
    )(x, w1, b1, w2, b2)
    return probs[:M, :action_size]


# ---------------------------------------------------------------------------
# Parameters
# ---------------------------------------------------------------------------
def init_params(key, action_size):
    """Deterministic fp32 params (PyTorch-default-like uniform init)."""
    def u(k, shape, fan_in):
        bound = 1.0 / jnp.sqrt(fan_in)
        return jax.random.uniform(k, shape, jnp.float32, -bound, bound)

    ks = jax.random.split(key, 10)
    return {
        "c1_w": u(ks[0], (8, 8, 4, 32), 4 * 8 * 8),
        "c1_b": u(ks[1], (32,), 4 * 8 * 8),
        "c2_w": u(ks[2], (4, 4, 32, 64), 32 * 4 * 4),
        "c2_b": u(ks[3], (64,), 32 * 4 * 4),
        "c3_w": u(ks[4], (3, 3, 64, 64), 64 * 3 * 3),
        "c3_b": u(ks[5], (64,), 64 * 3 * 3),
        "f1_w": u(ks[6], (7 * 7 * 64, 512), 7 * 7 * 64),
        "f1_b": u(ks[7], (512,), 7 * 7 * 64),
        "f2_w": u(ks[8], (512, action_size), 512),
        "f2_b": u(ks[9], (action_size,), 512),
    }


def prepare_params(p):
    """One-time transform into kernel-ready layout: bf16 weights, conv weights
    in patch (c,kh,kw)-row order with OC padded to 128 lanes, FC1 rows permuted
    from CHW- to HWC-flatten order, FC2 padded to 128 output lanes."""
    def conv_w(w):
        kh, kw, ic, oc = w.shape
        w2 = jnp.transpose(w, (2, 0, 1, 3)).reshape(ic * kh * kw, oc)
        return _pad_cols(w2, 128).astype(jnp.bfloat16)

    def conv_b(b):
        return _pad_cols(b.reshape(1, -1), 128).astype(jnp.float32)

    f1_w = (p["f1_w"].reshape(64, 7, 7, 512)
            .transpose(1, 2, 0, 3).reshape(7 * 7 * 64, 512))
    return {
        "c1_w": conv_w(p["c1_w"]), "c1_b": conv_b(p["c1_b"]),
        "c2_w": conv_w(p["c2_w"]), "c2_b": conv_b(p["c2_b"]),
        "c3_w": conv_w(p["c3_w"]), "c3_b": conv_b(p["c3_b"]),
        "f1_w": f1_w.astype(jnp.bfloat16),
        "f1_b": p["f1_b"].reshape(1, -1).astype(jnp.float32),
        "f2_w": _pad_cols(p["f2_w"], 128).astype(jnp.bfloat16),
        "f2_b": _pad_cols(p["f2_b"].reshape(1, -1), 128).astype(jnp.float32),
    }


# ---------------------------------------------------------------------------
# Forward passes
# ---------------------------------------------------------------------------
@functools.partial(jax.jit, static_argnames=("action_size",))
def actor_forward(x_nchw, kp, action_size):
    """Returns the action probabilities (the `probs` of the Categorical)."""
    x = jnp.transpose(x_nchw.astype(jnp.bfloat16), (0, 2, 3, 1))     # NCHW->NHWC
    x = conv2d_relu(x, kp["c1_w"], kp["c1_b"], kh=8, kw=8, stride=4, oc=32)
    x = conv2d_relu(x, kp["c2_w"], kp["c2_b"], kh=4, kw=4, stride=2, oc=64)
    x = conv2d_relu(x, kp["c3_w"], kp["c3_b"], kh=3, kw=3, stride=1, oc=64)
    x = x.reshape(x.shape[0], 7 * 7 * 64)    # NHWC flatten (FC1 rows pre-permuted)
    probs = fc_tail(x, kp["f1_w"], kp["f1_b"], kp["f2_w"], kp["f2_b"],
                    action_size=action_size)
    # TODO(synk): torch.distributions.Categorical has no Pallas equivalent;
    # we return its `probs` parameter (the softmax output) instead.
    return probs


def reference_forward(x_nchw, p):
    """Pure-JAX fp32 reference (original PyTorch layout/semantics)."""
    x = jnp.transpose(x_nchw, (0, 2, 3, 1))

    def conv(x, w, b, s):
        y = jax.lax.conv_general_dilated(
            x, w, (s, s), "VALID", dimension_numbers=("NHWC", "HWIO", "NHWC"))
        return jax.nn.relu(y + b)

    x = conv(x, p["c1_w"], p["c1_b"], 4)
    x = conv(x, p["c2_w"], p["c2_b"], 2)
    x = conv(x, p["c3_w"], p["c3_b"], 1)
    x = jnp.transpose(x, (0, 3, 1, 2)).reshape(x.shape[0], 7 * 7 * 64)  # NCHW flatten
    x = jax.nn.relu(x @ p["f1_w"] + p["f1_b"])
    logits = x @ p["f2_w"] + p["f2_b"]
    return jax.nn.softmax(logits, axis=1)


# ---------------------------------------------------------------------------
if __name__ == "__main__":
    key = jax.random.PRNGKey(0)
    k_params, k_x = jax.random.split(key)

    ACTION_SIZE = 6
    params = init_params(k_params, ACTION_SIZE)
    kparams = prepare_params(params)

    # Spatial size must be 84x84: the Linear(7*7*64 -> 512) fixes it.
    x = jax.random.normal(k_x, (2, 4, 84, 84), jnp.float32)

    probs = actor_forward(x, kparams, ACTION_SIZE)
    probs = jax.block_until_ready(probs)

    assert probs.shape == (2, ACTION_SIZE), probs.shape
    assert jnp.allclose(jnp.sum(probs, axis=-1), 1.0, atol=1e-3)

    ref = reference_forward(x, params)
    # bf16 matmul operands vs fp32 reference -> loosened tolerance.
    assert jnp.allclose(probs, ref, atol=2e-2, rtol=2e-2), (
        float(jnp.max(jnp.abs(probs - ref))))

    print("KERNEL_OK")
</pallas_src>

<mosaic_0001>
module attributes {stable_mosaic.version = 11 : i64} {
  func.func @_matmul_bias_relu_kernel(%arg0: i32, %arg1: memref<256x256xbf16, #tpu.memory_space<vmem>>, %arg2: memref<256x128xbf16, #tpu.memory_space<vmem>>, %arg3: memref<1x128xf32, #tpu.memory_space<vmem>>, %arg4: memref<256x128xbf16, #tpu.memory_space<vmem>>) attributes {dimension_semantics = [#tpu.dimension_semantics<parallel>], iteration_bounds = array<i64: 4>, scalar_prefetch = 0 : i64, scratch_operands = 0 : i64, tpu.core_type = #tpu.core_type<tc>, window_params = [{transform_indices = @transform_0, window_bounds = array<i64: 256, 256>}, {pipeline_mode = #tpu.pipeline_mode<synchronous>, transform_indices = @transform_1, window_bounds = array<i64: 256, 128>}, {pipeline_mode = #tpu.pipeline_mode<synchronous>, transform_indices = @transform_2, window_bounds = array<i64: 1, 128>}, {transform_indices = @transform_3, window_bounds = array<i64: 256, 128>}]} {
    %c0 = arith.constant 0 : index
    %c0_0 = arith.constant 0 : index
    %0 = vector.load %arg1[%c0, %c0_0] : memref<256x256xbf16, #tpu.memory_space<vmem>>, vector<256x256xbf16>
    %c0_1 = arith.constant 0 : index
    %c0_2 = arith.constant 0 : index
    %1 = vector.load %arg2[%c0_1, %c0_2] : memref<256x128xbf16, #tpu.memory_space<vmem>>, vector<256x128xbf16>
    %cst = arith.constant dense<0.000000e+00> : vector<256x128xf32>
    %2 = tpu.matmul %0, %1, %cst {dimension_numbers = #tpu.dot_dimension_numbers<[1], [0], [0], [1], [0, 0, 1, 1], [], []>} : vector<256x256xbf16>, vector<256x128xbf16>, vector<256x128xf32> -> vector<256x128xf32>
    %c0_3 = arith.constant 0 : index
    %c0_4 = arith.constant 0 : index
    %3 = vector.load %arg3[%c0_3, %c0_4] : memref<1x128xf32, #tpu.memory_space<vmem>>, vector<1x128xf32>
    %4 = vector.broadcast %3 : vector<1x128xf32> to vector<256x128xf32>
    %5 = arith.addf %2, %4 : vector<256x128xf32>
    %cst_5 = arith.constant 0.000000e+00 : f32
    %6 = vector.broadcast %cst_5 : f32 to vector<256x128xf32>
    %7 = arith.maximumf %5, %6 : vector<256x128xf32>
    %8 = arith.truncf %7 : vector<256x128xf32> to vector<256x128xbf16>
    %c0_6 = arith.constant 0 : index
    %c0_7 = arith.constant 0 : index
    %9 = vector.load %arg4[%c0_6, %c0_7] : memref<256x128xbf16, #tpu.memory_space<vmem>>, vector<256x128xbf16>
    tpu.vector_store %arg4[%c0_6, %c0_7], %8 {strides = array<i32>} : memref<256x128xbf16, #tpu.memory_space<vmem>>, vector<256x128xbf16>,
    return
  }
  func.func @transform_0(%arg0: i32) -> (i32, i32) {
    %c0_i32 = arith.constant 0 : i32
    %c0_i32_0 = arith.constant 0 : i32
    return %arg0, %c0_i32 : i32, i32
  }
  func.func @transform_1(%arg0: i32) -> (i32, i32) {
    %c0_i32 = arith.constant 0 : i32
    %c0_i32_0 = arith.constant 0 : i32
    %c0_i32_1 = arith.constant 0 : i32
    return %c0_i32, %c0_i32_0 : i32, i32
  }
  func.func @transform_2(%arg0: i32) -> (i32, i32) {
    %c0_i32 = arith.constant 0 : i32
    %c0_i32_0 = arith.constant 0 : i32
    %c0_i32_1 = arith.constant 0 : i32
    return %c0_i32, %c0_i32_0 : i32, i32
  }
  func.func @transform_3(%arg0: i32) -> (i32, i32) {
    %c0_i32 = arith.constant 0 : i32
    %c0_i32_0 = arith.constant 0 : i32
    return %arg0, %c0_i32 : i32, i32
  }
}

module attributes {stable_mosaic.version = 11 : i64} {
  func.func @_matmul_bias_relu_kernel(%arg0: i32, %arg1: memref<168x512xbf16, #tpu.memory_space<vmem>>, %arg2: memref<512x128xbf16, #tpu.memory_space<vmem>>, %arg3: memref<1x128xf32, #tpu.memory_space<vmem>>, %arg4: memref<168x128xbf16, #tpu.memory_space<vmem>>) attributes {dimension_semantics = [#tpu.dimension_semantics<parallel>], iteration_bounds = array<i64: 1>, scalar_prefetch = 0 : i64, scratch_operands = 0 : i64, tpu.core_type = #tpu.core_type<tc>, window_params = [{transform_indices = @transform_0, window_bounds = array<i64: 168, 512>}, {pipeline_mode = #tpu.pipeline_mode<synchronous>, transform_indices = @transform_1, window_bounds = array<i64: 512, 128>}, {pipeline_mode = #tpu.pipeline_mode<synchronous>, transform_indices = @transform_2, window_bounds = array<i64: 1, 128>}, {transform_indices = @transform_3, window_bounds = array<i64: 168, 128>}]} {
    %c0 = arith.constant 0 : index
    %c0_0 = arith.constant 0 : index
    %0 = vector.load %arg1[%c0, %c0_0] : memref<168x512xbf16, #tpu.memory_space<vmem>>, vector<168x512xbf16>
    %c0_1 = arith.constant 0 : index
    %c0_2 = arith.constant 0 : index
    %1 = vector.load %arg2[%c0_1, %c0_2] : memref<512x128xbf16, #tpu.memory_space<vmem>>, vector<512x128xbf16>
    %cst = arith.constant dense<0.000000e+00> : vector<168x128xf32>
    %2 = tpu.matmul %0, %1, %cst {dimension_numbers = #tpu.dot_dimension_numbers<[1], [0], [0], [1], [0, 0, 1, 1], [], []>} : vector<168x512xbf16>, vector<512x128xbf16>, vector<168x128xf32> -> vector<168x128xf32>
    %c0_3 = arith.constant 0 : index
    %c0_4 = arith.constant 0 : index
    %3 = vector.load %arg3[%c0_3, %c0_4] : memref<1x128xf32, #tpu.memory_space<vmem>>, vector<1x128xf32>
    %4 = vector.broadcast %3 : vector<1x128xf32> to vector<168x128xf32>
    %5 = arith.addf %2, %4 : vector<168x128xf32>
    %cst_5 = arith.constant 0.000000e+00 : f32
    %6 = vector.broadcast %cst_5 : f32 to vector<168x128xf32>
    %7 = arith.maximumf %5, %6 : vector<168x128xf32>
    %8 = arith.truncf %7 : vector<168x128xf32> to vector<168x128xbf16>
    %c0_6 = arith.constant 0 : index
    %c0_7 = arith.constant 0 : index
    %9 = vector.load %arg4[%c0_6, %c0_7] : memref<168x128xbf16, #tpu.memory_space<vmem>>, vector<168x128xbf16>
    tpu.vector_store %arg4[%c0_6, %c0_7], %8 {strides = array<i32>} : memref<168x128xbf16, #tpu.memory_space<vmem>>, vector<168x128xbf16>,
    return
  }
  func.func @transform_0(%arg0: i32) -> (i32, i32) {
    %c0_i32 = arith.constant 0 : i32
    %c0_i32_0 = arith.constant 0 : i32
    return %arg0, %c0_i32 : i32, i32
  }
  func.func @transform_1(%arg0: i32) -> (i32, i32) {
    %c0_i32 = arith.constant 0 : i32
    %c0_i32_0 = arith.constant 0 : i32
    %c0_i32_1 = arith.constant 0 : i32
    return %c0_i32, %c0_i32_0 : i32, i32
  }
  func.func @transform_2(%arg0: i32) -> (i32, i32) {
    %c0_i32 = arith.constant 0 : i32
    %c0_i32_0 = arith.constant 0 : i32
    %c0_i32_1 = arith.constant 0 : i32
    return %c0_i32, %c0_i32_0 : i32, i32
  }
  func.func @transform_3(%arg0: i32) -> (i32, i32) {
    %c0_i32 = arith.constant 0 : i32
    %c0_i32_0 = arith.constant 0 : i32
    return %arg0, %c0_i32 : i32, i32
  }
}

module attributes {stable_mosaic.version = 11 : i64} {
  func.func @_matmul_bias_relu_kernel(%arg0: i32, %arg1: memref<104x576xbf16, #tpu.memory_space<vmem>>, %arg2: memref<576x128xbf16, #tpu.memory_space<vmem>>, %arg3: memref<1x128xf32, #tpu.memory_space<vmem>>, %arg4: memref<104x128xbf16, #tpu.memory_space<vmem>>) attributes {dimension_semantics = [#tpu.dimension_semantics<parallel>], iteration_bounds = array<i64: 1>, scalar_prefetch = 0 : i64, scratch_operands = 0 : i64, tpu.core_type = #tpu.core_type<tc>, window_params = [{transform_indices = @transform_0, window_bounds = array<i64: 104, 576>}, {pipeline_mode = #tpu.pipeline_mode<synchronous>, transform_indices = @transform_1, window_bounds = array<i64: 576, 128>}, {pipeline_mode = #tpu.pipeline_mode<synchronous>, transform_indices = @transform_2, window_bounds = array<i64: 1, 128>}, {transform_indices = @transform_3, window_bounds = array<i64: 104, 128>}]} {
    %c0 = arith.constant 0 : index
    %c0_0 = arith.constant 0 : index
    %0 = vector.load %arg1[%c0, %c0_0] : memref<104x576xbf16, #tpu.memory_space<vmem>>, vector<104x576xbf16>
    %c0_1 = arith.constant 0 : index
    %c0_2 = arith.constant 0 : index
    %1 = vector.load %arg2[%c0_1, %c0_2] : memref<576x128xbf16, #tpu.memory_space<vmem>>, vector<576x128xbf16>
    %cst = arith.constant dense<0.000000e+00> : vector<104x128xf32>
    %2 = tpu.matmul %0, %1, %cst {dimension_numbers = #tpu.dot_dimension_numbers<[1], [0], [0], [1], [0, 0, 1, 1], [], []>} : vector<104x576xbf16>, vector<576x128xbf16>, vector<104x128xf32> -> vector<104x128xf32>
    %c0_3 = arith.constant 0 : index
    %c0_4 = arith.constant 0 : index
    %3 = vector.load %arg3[%c0_3, %c0_4] : memref<1x128xf32, #tpu.memory_space<vmem>>, vector<1x128xf32>
    %4 = vector.broadcast %3 : vector<1x128xf32> to vector<104x128xf32>
    %5 = arith.addf %2, %4 : vector<104x128xf32>
    %cst_5 = arith.constant 0.000000e+00 : f32
    %6 = vector.broadcast %cst_5 : f32 to vector<104x128xf32>
    %7 = arith.maximumf %5, %6 : vector<104x128xf32>
    %8 = arith.truncf %7 : vector<104x128xf32> to vector<104x128xbf16>
    %c0_6 = arith.constant 0 : index
    %c0_7 = arith.constant 0 : index
    %9 = vector.load %arg4[%c0_6, %c0_7] : memref<104x128xbf16, #tpu.memory_space<vmem>>, vector<104x128xbf16>
    tpu.vector_store %arg4[%c0_6, %c0_7], %8 {strides = array<i32>} : memref<104x128xbf16, #tpu.memory_space<vmem>>, vector<104x128xbf16>,
    return
  }
  func.func @transform_0(%arg0: i32) -> (i32, i32) {
    %c0_i32 = arith.constant 0 : i32
    %c0_i32_0 = arith.constant 0 : i32
    return %arg0, %c0_i32 : i32, i32
  }
  func.func @transform_1(%arg0: i32) -> (i32, i32) {
    %c0_i32 = arith.constant 0 : i32
    %c0_i32_0 = arith.constant 0 : i32
    %c0_i32_1 = arith.constant 0 : i32
    return %c0_i32, %c0_i32_0 : i32, i32
  }
  func.func @transform_2(%arg0: i32) -> (i32, i32) {
    %c0_i32 = arith.constant 0 : i32
    %c0_i32_0 = arith.constant 0 : i32
    %c0_i32_1 = arith.constant 0 : i32
    return %c0_i32, %c0_i32_0 : i32, i32
  }
  func.func @transform_3(%arg0: i32) -> (i32, i32) {
    %c0_i32 = arith.constant 0 : i32
    %c0_i32_0 = arith.constant 0 : i32
    return %arg0, %c0_i32 : i32, i32
  }
}

module attributes {stable_mosaic.version = 11 : i64} {
  func.func @_fc_tail_kernel(%arg0: i32, %arg1: memref<8x3136xbf16, #tpu.memory_space<vmem>>, %arg2: memref<3136x512xbf16, #tpu.memory_space<vmem>>, %arg3: memref<1x512xf32, #tpu.memory_space<vmem>>, %arg4: memref<512x128xbf16, #tpu.memory_space<vmem>>, %arg5: memref<1x128xf32, #tpu.memory_space<vmem>>, %arg6: memref<8x128xf32, #tpu.memory_space<vmem>>) attributes {dimension_semantics = [#tpu.dimension_semantics<arbitrary>], iteration_bounds = array<i64: 1>, scalar_prefetch = 0 : i64, scratch_operands = 0 : i64, tpu.core_type = #tpu.core_type<tc>, window_params = [{pipeline_mode = #tpu.pipeline_mode<synchronous>, transform_indices = @transform_0, window_bounds = array<i64: 8, 3136>}, {pipeline_mode = #tpu.pipeline_mode<synchronous>, transform_indices = @transform_1, window_bounds = array<i64: 3136, 512>}, {pipeline_mode = #tpu.pipeline_mode<synchronous>, transform_indices = @transform_2, window_bounds = array<i64: 1, 512>}, {pipeline_mode = #tpu.pipeline_mode<synchronous>, transform_indices = @transform_3, window_bounds = array<i64: 512, 128>}, {pipeline_mode = #tpu.pipeline_mode<synchronous>, transform_indices = @transform_4, window_bounds = array<i64: 1, 128>}, {pipeline_mode = #tpu.pipeline_mode<synchronous>, transform_indices = @transform_5, window_bounds = array<i64: 8, 128>}]} {
    %c0 = arith.constant 0 : index
    %c0_0 = arith.constant 0 : index
    %0 = vector.load %arg1[%c0, %c0_0] : memref<8x3136xbf16, #tpu.memory_space<vmem>>, vector<8x3136xbf16>
    %c0_1 = arith.constant 0 : index
    %c0_2 = arith.constant 0 : index
    %1 = vector.load %arg2[%c0_1, %c0_2] : memref<3136x512xbf16, #tpu.memory_space<vmem>>, vector<3136x512xbf16>
    %cst = arith.constant dense<0.000000e+00> : vector<8x512xf32>
    %2 = tpu.matmul %0, %1, %cst {dimension_numbers = #tpu.dot_dimension_numbers<[1], [0], [0], [1], [0, 0, 1, 1], [], []>} : vector<8x3136xbf16>, vector<3136x512xbf16>, vector<8x512xf32> -> vector<8x512xf32>
    %c0_3 = arith.constant 0 : index
    %c0_4 = arith.constant 0 : index
    %3 = vector.load %arg3[%c0_3, %c0_4] : memref<1x512xf32, #tpu.memory_space<vmem>>, vector<1x512xf32>
    %4 = vector.broadcast %3 : vector<1x512xf32> to vector<8x512xf32>
    %5 = arith.addf %2, %4 : vector<8x512xf32>
    %cst_5 = arith.constant 0.000000e+00 : f32
    %6 = vector.broadcast %cst_5 : f32 to vector<8x512xf32>
    %7 = arith.maximumf %5, %6 : vector<8x512xf32>
    %8 = arith.truncf %7 : vector<8x512xf32> to vector<8x512xbf16>
    %c0_6 = arith.constant 0 : index
    %c0_7 = arith.constant 0 : index
    %9 = vector.load %arg4[%c0_6, %c0_7] : memref<512x128xbf16, #tpu.memory_space<vmem>>, vector<512x128xbf16>
    %cst_8 = arith.constant dense<0.000000e+00> : vector<8x128xf32>
    %10 = tpu.matmul %8, %9, %cst_8 {dimension_numbers = #tpu.dot_dimension_numbers<[1], [0], [0], [1], [0, 0, 1, 1], [], []>} : vector<8x512xbf16>, vector<512x128xbf16>, vector<8x128xf32> -> vector<8x128xf32>
    %c0_9 = arith.constant 0 : index
    %c0_10 = arith.constant 0 : index
    %11 = vector.load %arg5[%c0_9, %c0_10] : memref<1x128xf32, #tpu.memory_space<vmem>>, vector<1x128xf32>
    %12 = vector.broadcast %11 : vector<1x128xf32> to vector<8x128xf32>
    %13 = arith.addf %10, %12 : vector<8x128xf32>
    %14 = tpu.iota {dimensions = array<i32: 1>} : vector<8x128xi32>
    %c6_i32 = arith.constant 6 : i32
    %15 = vector.broadcast %c6_i32 : i32 to vector<8x128xi32>
    %16 = arith.cmpi slt, %14, %15 : vector<8x128xi32>
    %cst_11 = arith.constant -1.000000e+30 : f32
    %17 = vector.broadcast %cst_11 : f32 to vector<8x128xf32>
    %18 = arith.select %16, %13, %17 : vector<8x128xi1>, vector<8x128xf32>
    %cst_12 = arith.constant dense<0xFF800000> : vector<8xf32>
    %19 = vector.multi_reduction <maximumf>, %18, %cst_12 [1] : vector<8x128xf32> to vector<8xf32>
    %20 = vector.shape_cast %19 : vector<8xf32> to vector<8x1xf32>
    %21 = vector.broadcast %20 : vector<8x1xf32> to vector<8x128xf32>
    %22 = arith.subf %18, %21 : vector<8x128xf32>
    %23 = math.exp %22 : vector<8x128xf32>
    %cst_13 = arith.constant dense<0.000000e+00> : vector<8xf32>
    %24 = vector.multi_reduction <add>, %23, %cst_13 [1] : vector<8x128xf32> to vector<8xf32>
    %25 = vector.shape_cast %24 : vector<8xf32> to vector<8x1xf32>
    %26 = vector.broadcast %25 : vector<8x1xf32> to vector<8x128xf32>
    %27 = arith.divf %23, %26 : vector<8x128xf32>
    %c0_14 = arith.constant 0 : index
    %c0_15 = arith.constant 0 : index
    %28 = vector.load %arg6[%c0_14, %c0_15] : memref<8x128xf32, #tpu.memory_space<vmem>>, vector<8x128xf32>
    tpu.vector_store %arg6[%c0_14, %c0_15], %27 {strides = array<i32>} : memref<8x128xf32, #tpu.memory_space<vmem>>, vector<8x128xf32>,
    return
  }
  func.func @transform_0(%arg0: i32) -> (i32, i32) {
    %c0_i32 = arith.constant 0 : i32
    %c0_i32_0 = arith.constant 0 : i32
    %c0_i32_1 = arith.constant 0 : i32
    return %c0_i32, %c0_i32_0 : i32, i32
  }
  func.func @transform_1(%arg0: i32) -> (i32, i32) {
    %c0_i32 = arith.constant 0 : i32
    %c0_i32_0 = arith.constant 0 : i32
    %c0_i32_1 = arith.constant 0 : i32
    return %c0_i32, %c0_i32_0 : i32, i32
  }
  func.func @transform_2(%arg0: i32) -> (i32, i32) {
    %c0_i32 = arith.constant 0 : i32
    %c0_i32_0 = arith.constant 0 : i32
    %c0_i32_1 = arith.constant 0 : i32
    return %c0_i32, %c0_i32_0 : i32, i32
  }
  func.func @transform_3(%arg0: i32) -> (i32, i32) {
    %c0_i32 = arith.constant 0 : i32
    %c0_i32_0 = arith.constant 0 : i32
    %c0_i32_1 = arith.constant 0 : i32
    return %c0_i32, %c0_i32_0 : i32, i32
  }
  func.func @transform_4(%arg0: i32) -> (i32, i32) {
    %c0_i32 = arith.constant 0 : i32
    %c0_i32_0 = arith.constant 0 : i32
    %c0_i32_1 = arith.constant 0 : i32
    return %c0_i32, %c0_i32_0 : i32, i32
  }
  func.func @transform_5(%arg0: i32) -> (i32, i32) {
    %c0_i32 = arith.constant 0 : i32
    %c0_i32_0 = arith.constant 0 : i32
    %c0_i32_1 = arith.constant 0 : i32
    return %c0_i32, %c0_i32_0 : i32, i32
  }
}

</mosaic_0001>

<bundles_post_ra>
// kernel: actor_forward.4
= control target key start
LH: loop header
LB: loop body
LE: loop exit
PB: predicated region body
PF: predicated region fallthrough
CT: control target
= control target key end

     0   :  { %s1363_s12 = smov 0   ;;  %s1521_s0 = inlined_call_operand.vmem [shape: bf16[1024,256], index: 0, kind: input, shape index: {}]   ;;  %s1522_s1 = inlined_call_operand.vmem [shape: bf16[256,128], index: 1, kind: input, shape index: {}]   ;;  %s1523_s2 = inlined_call_operand.vmem [shape: f32[1,128], index: 2, kind: input, shape index: {}]   ;;  %s1524_s3 = inlined_call_operand.vmem [shape: bf16[1024,128], index: 3, kind: output, shape index: {}]  }
   0x1 LB: > { %s914_s13 = sadd.s32 4294967295, %s1341_s12   ;;  %p918_p0 = scmp.ge.s32.totalorder %s1341_s12, 1  ;;  %s1341_s12 = sphi %s1363_s12, %s13_s12  }
   0x2   : > { %p139_p1 = scmp.lt.s32.totalorder %s1341_s12, 5 }
   0x4   : > { %p140_p2 = pnand %p918_p0, %p139_p1 }
   0x5   : > { %s919_s16 = sshll.u32 (!%p140_p2), %s914_s13, 5 }
   0x6   : > { %143 = sbr.rel (%p140_p2) target bundleno = 308 (0x134), region = 32  ;;  %p165_p3 = scmp.lt.s32.totalorder (!%p140_p2), %s919_s16, 127 }
   0xb   : > { %v1271_v0 = vld [vmem:[%s1522_s1 + $0x78] sm:$0xff]   ;;  %v1273_v2 = vld [vmem:[%s1522_s1 + $0x70] sm:$0xff]   ;;  %v1275_v4 = vld [vmem:[%s1522_s1 + $0x68] sm:$0xff]   ;;  %s1526_s16 = smov (!%p165_p3, %s919_s16), 127 }
   0xc   : > { %v1272_v1 = vld [vmem:[%s1522_s1 + $0x38] sm:$0xff]   ;;  %1135 = vmatprep.subr.bf16.mxu0 %v1271_v0  ;;  %1247 = vmatprep.subr.bf16.mxu1 %v1271_v0  ;;  %v1274_v3 = vld [vmem:[%s1522_s1 + $0x30] sm:$0xff]   ;;  %v1276_v5 = vld [vmem:[%s1522_s1 + $0x28] sm:$0xff]   ;;  %s1007_s4 = sshll.u32 %s1526_s16, 3  ;;  %s923_s28 = sshll.u32 %s1526_s16, 2 }
   0xd   : > { %1136 = vmatpush3.bf16.msra.mxu0 %v1272_v1  ;;  %1255 = vmatpush3.bf16.msra.mxu1 %v1272_v1  ;;  %v1277_v6 = vld [vmem:[%s1522_s1 + $0x60] sm:$0xff]   ;;  %v1279_v8 = vld [vmem:[%s1522_s1 + $0x58] sm:$0xff]   ;;  %s1404_s9 = scalar_lea.vmem %s1521_s0, %s1007_s4  ;;  %v1281_v10 = vld [vmem:[%s1522_s1 + $0x50] sm:$0xff]   ;;  %s1472_s4 = scalar_lea.vmem %s1524_s3, %s923_s28 }
   0xe   : > { %1137 = vmatprep.subr.bf16.mxu0 %v1273_v2  ;;  %1248 = vmatprep.subr.bf16.mxu1 %v1273_v2  ;;  %v1278_v7 = vld [vmem:[%s1522_s1 + $0x20] sm:$0xff]   ;;  %v1280_v9 = vld [vmem:[%s1522_s1 + $0x18] sm:$0xff]   ;;  %v1282_v13 = vld [vmem:[%s1522_s1 + $0x10] sm:$0xff]  }
   0xf   : > { %v1289_v11 = vld [vmem:[%s1404_s9 + $0x4] ss:$8 sps:$4 sm:$0xff]   ;;  %v1287_v18 = vld [vmem:[%s1404_s9] ss:$8 sps:$4 sm:$0xff]   ;;  %v1293_v20 = vld [vmem:[%s1404_s9 + $0x14] ss:$8 sps:$4 sm:$0xff]  }
  0x10   : > { %v1292_v12 = vld [vmem:[%s1404_s9 + $0x84] ss:$8 sps:$4 sm:$0xff]   ;;  %537 = vmatprep.mubr.bf16.mxu0 %v1289_v11  ;;  %v1290_v19 = vld [vmem:[%s1404_s9 + $0x80] ss:$8 sps:$4 sm:$0xff]   ;;  %v1295_v21 = vld [vmem:[%s1404_s9 + $0x94] ss:$8 sps:$4 sm:$0xff]  }
  0x11   : > { %1138 = vmatpush3.bf16.msra.mxu0 %v1274_v3  ;;  %1256 = vmatpush3.bf16.msra.mxu1 %v1274_v3  ;;  %v1283_v14 = vld [vmem:[%s1522_s1 + $0x48] sm:$0xff]   ;;  %v1285_v16 = vld [vmem:[%s1522_s1 + $0x40] sm:$0xff]   ;;  %v1297_v22 = vld [vmem:[%s1404_s9 + $0x10] ss:$8 sps:$4 sm:$0xff]  }
  0x12   : > { %1139 = vmatprep.subr.bf16.mxu0 %v1275_v4  ;;  %1249 = vmatprep.subr.bf16.mxu1 %v1275_v4  ;;  %v1284_v15 = vld [vmem:[%s1522_s1 + $0x8] sm:$0xff]   ;;  %v1286_v17 = vld [vmem:[%s1522_s1] sm:$0xff]   ;;  %v1298_v23 = vld [vmem:[%s1404_s9 + $0x90] ss:$8 sps:$4 sm:$0xff]  }
  0x13   : > { %601 = vmatprep.mubr.bf16.mxu1 %v1292_v12  ;;  %v1299_v24 = vld [vmem:[%s1404_s9 + $0x24] ss:$8 sps:$4 sm:$0xff]   ;;  %v1303_v26 = vld [vmem:[%s1404_s9 + $0x20] ss:$8 sps:$4 sm:$0xff]   ;;  %v1305_v28 = vld [vmem:[%s1404_s9 + $0x34] ss:$8 sps:$4 sm:$0xff]  }
  0x14   : > { %v1301_v25 = vld [vmem:[%s1404_s9 + $0xa4] ss:$8 sps:$4 sm:$0xff]   ;;  %v1304_v27 = vld [vmem:[%s1404_s9 + $0xa0] ss:$8 sps:$4 sm:$0xff]   ;;  %v1307_v29 = vld [vmem:[%s1404_s9 + $0xb4] ss:$8 sps:$4 sm:$0xff]  }
  0x15   : > { %1140 = vmatpush3.bf16.msra.mxu0 %v1276_v5  ;;  %1257 = vmatpush3.bf16.msra.mxu1 %v1276_v5  ;;  %v1309_v30 = vld [vmem:[%s1404_s9 + $0x30] ss:$8 sps:$4 sm:$0xff]   ;;  %v1311_v32 = vld [vmem:[%s1404_s9 + $0x44] ss:$8 sps:$4 sm:$0xff]   ;;  %v1315_v34 = vld [vmem:[%s1404_s9 + $0x40] ss:$8 sps:$4 sm:$0xff]  }
  0x16   : > { %1141 = vmatprep.subr.bf16.mxu0 %v1277_v6  ;;  %1250 = vmatprep.subr.bf16.mxu1 %v1277_v6  ;;  %v1310_v31 = vld [vmem:[%s1404_s9 + $0xb0] ss:$8 sps:$4 sm:$0xff]   ;;  %v1313_v33 = vld [vmem:[%s1404_s9 + $0xc4] ss:$8 sps:$4 sm:$0xff]   ;;  %v1316_v35 = vld [vmem:[%s1404_s9 + $0xc0] ss:$8 sps:$4 sm:$0xff]  }
  0x17   : > { %v1317_v36 = vld [vmem:[%s1404_s9 + $0x54] ss:$8 sps:$4 sm:$0xff]   ;;  %v1321_v38 = vld [vmem:[%s1404_s9 + $0x50] ss:$8 sps:$4 sm:$0xff]   ;;  %v1323_v40 = vld [vmem:[%s1404_s9 + $0x64] ss:$8 sps:$4 sm:$0xff]  }
  0x18   : > { %v1319_v37 = vld [vmem:[%s1404_s9 + $0xd4] ss:$8 sps:$4 sm:$0xff]   ;;  %v1322_v39 = vld [vmem:[%s1404_s9 + $0xd0] ss:$8 sps:$4 sm:$0xff]   ;;  %v1325_v41 = vld [vmem:[%s1404_s9 + $0xe4] ss:$8 sps:$4 sm:$0xff]  }
  0x19   : > { %1142 = vmatpush3.bf16.msra.mxu0 %v1278_v7  ;;  %1258 = vmatpush3.bf16.msra.mxu1 %v1278_v7  ;;  %v1327_v42 = vld [vmem:[%s1404_s9 + $0x60] ss:$8 sps:$4 sm:$0xff]   ;;  %v1329_v44 = vld [vmem:[%s1404_s9 + $0x74] ss:$8 sps:$4 sm:$0xff]   ;;  %v1333_v46 = vld [vmem:[%s1404_s9 + $0x70] ss:$8 sps:$4 sm:$0xff]  }
  0x1a   : > { %1143 = vmatprep.subr.bf16.mxu0 %v1279_v8  ;;  %1251 = vmatprep.subr.bf16.mxu1 %v1279_v8  ;;  %v1328_v43 = vld [vmem:[%s1404_s9 + $0xe0] ss:$8 sps:$4 sm:$0xff]   ;;  %v1331_v45 = vld [vmem:[%s1404_s9 + $0xf4] ss:$8 sps:$4 sm:$0xff]   ;;  %v1334_v47 = vld [vmem:[%s1404_s9 + $0xf0] ss:$8 sps:$4 sm:$0xff]  }
  0x1b   : > { %v1462_v52 = vld [vmem:[%s1523_s2] ss:$0 sm:$0xff] }
  0x1d   : > { %1144 = vmatpush3.bf16.msra.mxu0 %v1280_v9  ;;  %1259 = vmatpush3.bf16.msra.mxu1 %v1280_v9 }
  0x1e   : > { %1145 = vmatprep.subr.bf16.mxu0 %v1281_v10  ;;  %1252 = vmatprep.subr.bf16.mxu1 %v1281_v10 }
  0x21   : > { %1146 = vmatpush3.bf16.msra.mxu0 %v1282_v13  ;;  %1260 = vmatpush3.bf16.msra.mxu1 %v1282_v13 }
  0x22   : > { %1147 = vmatprep.subr.bf16.mxu0 %v1283_v14  ;;  %1253 = vmatprep.subr.bf16.mxu1 %v1283_v14 }
  0x25   : > { %1148 = vmatpush3.bf16.msra.mxu0 %v1284_v15  ;;  %1261 = vmatpush3.bf16.msra.mxu1 %v1284_v15 }
  0x26   : > { %1149 = vmatprep.subr.bf16.mxu0 %v1285_v16  ;;  %1254 = vmatprep.subr.bf16.mxu1 %v1285_v16 }
  0x29   : > { %1150 = vmatpush3.bf16.msra.mxu0 %v1286_v17  ;;  %1262 = vmatpush3.bf16.msra.mxu1 %v1286_v17 }
  0x2c   : > { %538 = vmatmul.mubr.bf16.vlgmr.msra.gmra.mxu0 %v1287_v18  ;;  %602 = vmatmul.mubr.bf16.vlgmr.msra.gmra.mxu1 %v1290_v19 }
  0x2d   : > { %545 = vmatprep.mubr.bf16.mxu0 %v1293_v20  ;;  %609 = vmatprep.mubr.bf16.mxu1 %v1295_v21 }
  0x34   : > { %546 = vmatmul.mubr.bf16.gmra.mxu0 %v1297_v22  ;;  %610 = vmatmul.mubr.bf16.gmra.mxu1 %v1298_v23 }
  0x35   : > { %553 = vmatprep.mubr.bf16.mxu0 %v1299_v24  ;;  %617 = vmatprep.mubr.bf16.mxu1 %v1301_v25 }
  0x3c   : > { %554 = vmatmul.mubr.bf16.gmra.mxu0 %v1303_v26  ;;  %618 = vmatmul.mubr.bf16.gmra.mxu1 %v1304_v27 }
  0x3d   : > { %561 = vmatprep.mubr.bf16.mxu0 %v1305_v28  ;;  %625 = vmatprep.mubr.bf16.mxu1 %v1307_v29 }
  0x44   : > { %562 = vmatmul.mubr.bf16.gmra.mxu0 %v1309_v30  ;;  %626 = vmatmul.mubr.bf16.gmra.mxu1 %v1310_v31 }
  0x45   : > { %569 = vmatprep.mubr.bf16.mxu0 %v1311_v32  ;;  %633 = vmatprep.mubr.bf16.mxu1 %v1313_v33 }
  0x4c   : > { %570 = vmatmul.mubr.bf16.gmra.mxu0 %v1315_v34  ;;  %634 = vmatmul.mubr.bf16.gmra.mxu1 %v1316_v35 }
  0x4d   : > { %577 = vmatprep.mubr.bf16.mxu0 %v1317_v36  ;;  %641 = vmatprep.mubr.bf16.mxu1 %v1319_v37 }
  0x54   : > { %578 = vmatmul.mubr.bf16.gmra.mxu0 %v1321_v38  ;;  %642 = vmatmul.mubr.bf16.gmra.mxu1 %v1322_v39 }
  0x55   : > { %585 = vmatprep.mubr.bf16.mxu0 %v1323_v40  ;;  %649 = vmatprep.mubr.bf16.mxu1 %v1325_v41 }
  0x5c   : > { %586 = vmatmul.mubr.bf16.gmra.mxu0 %v1327_v42  ;;  %650 = vmatmul.mubr.bf16.gmra.mxu1 %v1328_v43 }
  0x5d   : > { %593 = vmatprep.mubr.bf16.mxu0 %v1329_v44  ;;  %657 = vmatprep.mubr.bf16.mxu1 %v1331_v45 }
  0x64   : > { %594 = vmatmul.mubr.bf16.gmra.mxu0 %v1333_v46  ;;  %658 = vmatmul.mubr.bf16.gmra.mxu1 %v1334_v47 }
  0xec   : > { %v1151_v48 = vpop.f32.mrf.mxu0  ;;  %v1199_v49 = vpop.f32.mrf.mxu1 }
  0xee   : > { %v1152_v50 = vpop.f32.mrf.mxu0  ;;  %v1200_v51 = vpop.f32.mrf.mxu1 }
  0xef   : > { %v1153_v53 = vadd.f32 %v1152_v50, %v1151_v48  ;;  %v1201_v54 = vadd.f32 %v1200_v51, %v1199_v49 }
  0xf0   : > { %v1154_v55 = vpop.f32.mrf.mxu0  ;;  %v1202_v56 = vpop.f32.mrf.mxu1 }
  0xf1   : > { %v540_v57 = vadd.f32 %v1153_v53, %v1462_v52  ;;  %v604_v58 = vadd.f32 %v1201_v54, %v1462_v52 }
  0xf2   : > { %v1155_v59 = vpop.f32.mrf.mxu0  ;;  %v1203_v60 = vpop.f32.mrf.mxu1 }
  0xf3   : > { %v1156_v61 = vadd.f32 %v1155_v59, %v1154_v55  ;;  %v1204_v62 = vadd.f32 %v1203_v60, %v1202_v56  ;;  %v666_v3 = vmax.f32 %v540_v57, 0.0  ;;  %v682_v4 = vmax.f32 %v604_v58, 0.0 }
  0xf4   : > { %v1157_v63 = vpop.f32.mrf.mxu0  ;;  %v1205_v0 = vpop.f32.mrf.mxu1 }
  0xf5   : > { %v543_v1 = vadd.f32 %v1156_v61, %v1462_v52  ;;  %v607_v2 = vadd.f32 %v1204_v62, %v1462_v52 }
  0xf6   : > { %v1158_v5 = vpop.f32.mrf.mxu0  ;;  %v1206_v6 = vpop.f32.mrf.mxu1 }
  0xf7   : > { %v667_v7 = vmax.f32 %v543_v1, 0.0  ;;  %v683_v8 = vmax.f32 %v607_v2, 0.0  ;;  %v1159_v9 = vadd.f32 %v1158_v5, %v1157_v63  ;;  %v1207_v10 = vadd.f32 %v1206_v6, %v1205_v0 }
  0xf8   : > { %v1160_v11 = vpop.f32.mrf.mxu0  ;;  %v1208_v12 = vpop.f32.mrf.mxu1 }
  0xf9   : > { %v1043_v13 = vpack.c.bf16 %v667_v7, %v666_v3  ;;  %v1083_v14 = vpack.c.bf16 %v683_v8, %v682_v4  ;;  %v548_v15 = vadd.f32 %v1159_v9, %v1462_v52  ;;  %v612_v16 = vadd.f32 %v1207_v10, %v1462_v52 }
  0xfa   : > { %v1161_v17 = vpop.f32.mrf.mxu0  ;;  %v1209_v18 = vpop.f32.mrf.mxu1 }
  0xfb   : > { %1044 = vst [vmem:[%s1472_s4] sm:$0xff] %v1043_v13   ;;  %1127 = vst [vmem:[%s1472_s4 + $0x40] sm:$0xff] %v1083_v14   ;;  %v1162_v19 = vadd.f32 %v1161_v17, %v1160_v11  ;;  %v1210_v20 = vadd.f32 %v1209_v18, %v1208_v12  ;;  %v668_v25 = vmax.f32 %v548_v15, 0.0  ;;  %v684_v26 = vmax.f32 %v612_v16, 0.0 }
  0xfc   : > { %v1163_v21 = vpop.f32.mrf.mxu0  ;;  %v1211_v22 = vpop.f32.mrf.mxu1 }
  0xfd   : > { %v551_v23 = vadd.f32 %v1162_v19, %v1462_v52  ;;  %v615_v24 = vadd.f32 %v1210_v20, %v1462_v52 }
  0xfe   : > { %v1164_v27 = vpop.f32.mrf.mxu0  ;;  %v1212_v28 = vpop.f32.mrf.mxu1 }
  0xff   : > { %v669_v29 = vmax.f32 %v551_v23, 0.0  ;;  %v685_v30 = vmax.f32 %v615_v24, 0.0  ;;  %v1165_v31 = vadd.f32 %v1164_v27, %v1163_v21  ;;  %v1213_v32 = vadd.f32 %v1212_v28, %v1211_v22 }
 0x100   : > { %v1166_v33 = vpop.f32.mrf.mxu0  ;;  %v1214_v34 = vpop.f32.mrf.mxu1 }
 0x101   : > { %v1048_v35 = vpack.c.bf16 %v669_v29, %v668_v25  ;;  %v1088_v36 = vpack.c.bf16 %v685_v30, %v684_v26  ;;  %v556_v37 = vadd.f32 %v1165_v31, %v1462_v52  ;;  %v620_v38 = vadd.f32 %v1213_v32, %v1462_v52 }
 0x102   : > { %v1167_v39 = vpop.f32.mrf.mxu0  ;;  %v1215_v40 = vpop.f32.mrf.mxu1 }
 0x103   : > { %1120 = vst [vmem:[%s1472_s4 + $0x8] sm:$0xff] %v1048_v35   ;;  %1128 = vst [vmem:[%s1472_s4 + $0x48] sm:$0xff] %v1088_v36   ;;  %v1168_v41 = vadd.f32 %v1167_v39, %v1166_v33  ;;  %v1216_v42 = vadd.f32 %v1215_v40, %v1214_v34  ;;  %v670_v47 = vmax.f32 %v556_v37, 0.0  ;;  %v686_v48 = vmax.f32 %v620_v38, 0.0 }
 0x104   : > { %v1169_v43 = vpop.f32.mrf.mxu0  ;;  %v1217_v44 = vpop.f32.mrf.mxu1 }
 0x105   : > { %v559_v45 = vadd.f32 %v1168_v41, %v1462_v52  ;;  %v623_v46 = vadd.f32 %v1216_v42, %v1462_v52 }
 0x106   : > { %v1170_v49 = vpop.f32.mrf.mxu0  ;;  %v1218_v50 = vpop.f32.mrf.mxu1 }
 0x107   : > { %v671_v51 = vmax.f32 %v559_v45, 0.0  ;;  %v687_v53 = vmax.f32 %v623_v46, 0.0  ;;  %v1171_v54 = vadd.f32 %v1170_v49, %v1169_v43  ;;  %v1219_v55 = vadd.f32 %v1218_v50, %v1217_v44 }
 0x108   : > { %v1172_v56 = vpop.f32.mrf.mxu0  ;;  %v1220_v57 = vpop.f32.mrf.mxu1 }
 0x109   : > { %v1053_v58 = vpack.c.bf16 %v671_v51, %v670_v47  ;;  %v1093_v59 = vpack.c.bf16 %v687_v53, %v686_v48  ;;  %v564_v60 = vadd.f32 %v1171_v54, %v1462_v52  ;;  %v628_v61 = vadd.f32 %v1219_v55, %v1462_v52 }
 0x10a   : > { %v1173_v62 = vpop.f32.mrf.mxu0  ;;  %v1221_v63 = vpop.f32.mrf.mxu1 }
 0x10b   : > { %1121 = vst [vmem:[%s1472_s4 + $0x10] sm:$0xff] %v1053_v58   ;;  %1129 = vst [vmem:[%s1472_s4 + $0x50] sm:$0xff] %v1093_v59   ;;  %v1174_v0 = vadd.f32 %v1173_v62, %v1172_v56  ;;  %v1222_v1 = vadd.f32 %v1221_v63, %v1220_v57  ;;  %v672_v6 = vmax.f32 %v564_v60, 0.0  ;;  %v688_v7 = vmax.f32 %v628_v61, 0.0 }
 0x10c   : > { %v1175_v2 = vpop.f32.mrf.mxu0  ;;  %v1223_v3 = vpop.f32.mrf.mxu1 }
 0x10d   : > { %v567_v4 = vadd.f32 %v1174_v0, %v1462_v52  ;;  %v631_v5 = vadd.f32 %v1222_v1, %v1462_v52 }
 0x10e   : > { %v1176_v8 = vpop.f32.mrf.mxu0  ;;  %v1224_v9 = vpop.f32.mrf.mxu1 }
 0x10f   : > { %v673_v10 = vmax.f32 %v567_v4, 0.0  ;;  %v689_v11 = vmax.f32 %v631_v5, 0.0  ;;  %v1177_v12 = vadd.f32 %v1176_v8, %v1175_v2  ;;  %v1225_v13 = vadd.f32 %v1224_v9, %v1223_v3 }
 0x110   : > { %v1178_v14 = vpop.f32.mrf.mxu0  ;;  %v1226_v15 = vpop.f32.mrf.mxu1 }
 0x111   : > { %v1058_v16 = vpack.c.bf16 %v673_v10, %v672_v6  ;;  %v1098_v17 = vpack.c.bf16 %v689_v11, %v688_v7  ;;  %v572_v18 = vadd.f32 %v1177_v12, %v1462_v52  ;;  %v636_v19 = vadd.f32 %v1225_v13, %v1462_v52 }
 0x112   : > { %v1179_v20 = vpop.f32.mrf.mxu0  ;;  %v1227_v21 = vpop.f32.mrf.mxu1 }
 0x113   : > { %1122 = vst [vmem:[%s1472_s4 + $0x18] sm:$0xff] %v1058_v16   ;;  %1130 = vst [vmem:[%s1472_s4 + $0x58] sm:$0xff] %v1098_v17   ;;  %v1180_v22 = vadd.f32 %v1179_v20, %v1178_v14  ;;  %v1228_v23 = vadd.f32 %v1227_v21, %v1226_v15  ;;  %v674_v28 = vmax.f32 %v572_v18, 0.0  ;;  %v690_v29 = vmax.f32 %v636_v19, 0.0 }
 0x114   : > { %v1181_v24 = vpop.f32.mrf.mxu0  ;;  %v1229_v25 = vpop.f32.mrf.mxu1 }
 0x115   : > { %v575_v26 = vadd.f32 %v1180_v22, %v1462_v52  ;;  %v639_v27 = vadd.f32 %v1228_v23, %v1462_v52 }
 0x116   : > { %v1182_v30 = vpop.f32.mrf.mxu0  ;;  %v1230_v31 = vpop.f32.mrf.mxu1 }
 0x117   : > { %v675_v32 = vmax.f32 %v575_v26, 0.0  ;;  %v691_v33 = vmax.f32 %v639_v27, 0.0  ;;  %v1183_v34 = vadd.f32 %v1182_v30, %v1181_v24  ;;  %v1231_v35 = vadd.f32 %v1230_v31, %v1229_v25 }
 0x118   : > { %v1184_v36 = vpop.f32.mrf.mxu0  ;;  %v1232_v37 = vpop.f32.mrf.mxu1 }
 0x119   : > { %v1063_v38 = vpack.c.bf16 %v675_v32, %v674_v28  ;;  %v1103_v39 = vpack.c.bf16 %v691_v33, %v690_v29  ;;  %v580_v40 = vadd.f32 %v1183_v34, %v1462_v52  ;;  %v644_v41 = vadd.f32 %v1231_v35, %v1462_v52 }
 0x11a   : > { %v1185_v42 = vpop.f32.mrf.mxu0  ;;  %v1233_v43 = vpop.f32.mrf.mxu1 }
 0x11b   : > { %1123 = vst [vmem:[%s1472_s4 + $0x20] sm:$0xff] %v1063_v38   ;;  %1131 = vst [vmem:[%s1472_s4 + $0x60] sm:$0xff] %v1103_v39   ;;  %v1186_v44 = vadd.f32 %v1185_v42, %v1184_v36  ;;  %v1234_v45 = vadd.f32 %v1233_v43, %v1232_v37  ;;  %v676_v50 = vmax.f32 %v580_v40, 0.0  ;;  %v692_v51 = vmax.f32 %v644_v41, 0.0 }
 0x11c   : > { %v1187_v46 = vpop.f32.mrf.mxu0  ;;  %v1235_v47 = vpop.f32.mrf.mxu1 }
 0x11d   : > { %v583_v48 = vadd.f32 %v1186_v44, %v1462_v52  ;;  %v647_v49 = vadd.f32 %v1234_v45, %v1462_v52 }
 0x11e   : > { %v1188_v53 = vpop.f32.mrf.mxu0  ;;  %v1236_v54 = vpop.f32.mrf.mxu1 }
 0x11f   : > { %v677_v55 = vmax.f32 %v583_v48, 0.0  ;;  %v693_v56 = vmax.f32 %v647_v49, 0.0  ;;  %v1189_v57 = vadd.f32 %v1188_v53, %v1187_v46  ;;  %v1237_v58 = vadd.f32 %v1236_v54, %v1235_v47 }
 0x120   : > { %v1190_v59 = vpop.f32.mrf.mxu0  ;;  %v1238_v60 = vpop.f32.mrf.mxu1 }
 0x121   : > { %v1068_v61 = vpack.c.bf16 %v677_v55, %v676_v50  ;;  %v1108_v62 = vpack.c.bf16 %v693_v56, %v692_v51  ;;  %v588_v63 = vadd.f32 %v1189_v57, %v1462_v52  ;;  %v652_v0 = vadd.f32 %v1237_v58, %v1462_v52 }
 0x122   : > { %v1191_v1 = vpop.f32.mrf.mxu0  ;;  %v1239_v2 = vpop.f32.mrf.mxu1 }
 0x123   : > { %1124 = vst [vmem:[%s1472_s4 + $0x28] sm:$0xff] %v1068_v61   ;;  %1132 = vst [vmem:[%s1472_s4 + $0x68] sm:$0xff] %v1108_v62   ;;  %v1192_v3 = vadd.f32 %v1191_v1, %v1190_v59  ;;  %v1240_v4 = vadd.f32 %v1239_v2, %v1238_v60  ;;  %v678_v9 = vmax.f32 %v588_v63, 0.0  ;;  %v694_v10 = vmax.f32 %v652_v0, 0.0 }
 0x124   : > { %v1193_v5 = vpop.f32.mrf.mxu0  ;;  %v1241_v6 = vpop.f32.mrf.mxu1 }
 0x125   : > { %v591_v7 = vadd.f32 %v1192_v3, %v1462_v52  ;;  %v655_v8 = vadd.f32 %v1240_v4, %v1462_v52 }
 0x126   : > { %v1194_v11 = vpop.f32.mrf.mxu0  ;;  %v1242_v12 = vpop.f32.mrf.mxu1 }
 0x127   : > { %v679_v13 = vmax.f32 %v591_v7, 0.0  ;;  %v695_v14 = vmax.f32 %v655_v8, 0.0  ;;  %v1195_v15 = vadd.f32 %v1194_v11, %v1193_v5  ;;  %v1243_v16 = vadd.f32 %v1242_v12, %v1241_v6 }
 0x128   : > { %v1196_v17 = vpop.f32.mrf.mxu0  ;;  %v1244_v18 = vpop.f32.mrf.mxu1 }
 0x129   : > { %v1073_v19 = vpack.c.bf16 %v679_v13, %v678_v9  ;;  %v1113_v20 = vpack.c.bf16 %v695_v14, %v694_v10  ;;  %v596_v23 = vadd.f32 %v1195_v15, %v1462_v52  ;;  %v660_v24 = vadd.f32 %v1243_v16, %v1462_v52 }
 0x12a   : > { %v1197_v21 = vpop.f32.mrf.mxu0  ;;  %v1245_v22 = vpop.f32.mrf.mxu1 }
 0x12b   : > { %1125 = vst [vmem:[%s1472_s4 + $0x30] sm:$0xff] %v1073_v19   ;;  %1133 = vst [vmem:[%s1472_s4 + $0x70] sm:$0xff] %v1113_v20   ;;  %v1198_v25 = vadd.f32 %v1197_v21, %v1196_v17  ;;  %v1246_v26 = vadd.f32 %v1245_v22, %v1244_v18  ;;  %v680_v29 = vmax.f32 %v596_v23, 0.0  ;;  %v696_v30 = vmax.f32 %v660_v24, 0.0 }
 0x12d   : > { %v599_v27 = vadd.f32 %v1198_v25, %v1462_v52  ;;  %v663_v28 = vadd.f32 %v1246_v26, %v1462_v52 }
 0x12f   : > { %v681_v31 = vmax.f32 %v599_v27, 0.0  ;;  %v697_v32 = vmax.f32 %v663_v28, 0.0 }
 0x131   : > { %v1078_v33 = vpack.c.bf16 %v681_v31, %v680_v29  ;;  %v1118_v34 = vpack.c.bf16 %v697_v32, %v696_v30 }
 0x133   : > { %1126 = vst [vmem:[%s1472_s4 + $0x38] sm:$0xff] %v1078_v33   ;;  %1134 = vst [vmem:[%s1472_s4 + $0x78] sm:$0xff] %v1118_v34  }
 0x134 PF: > { %s13_s12 = sadd.s32 1, %s1341_s12  }
 0x135   : > { %p10_p4 = scmp.ge.s32.totalorder %s13_s12, 6  }
 0x137   :  { %12 = sbr.rel (!%p10_p4) target bundleno = 1 (0x1), region = 62 }

// kernel: actor_forward.5
= control target key start
LH: loop header
LB: loop body
LE: loop exit
PB: predicated region body
PF: predicated region fallthrough
CT: control target
= control target key end

     0   :  { %s1644_s1 = inlined_call_operand.vmem [shape: bf16[512,128], index: 1, kind: input, shape index: {}]   ;;  %s1645_s0 = inlined_call_operand.vmem [shape: bf16[168,512], index: 0, kind: input, shape index: {}]   ;;  %s1646_s2 = inlined_call_operand.vmem [shape: f32[1,128], index: 2, kind: input, shape index: {}]   ;;  %s1647_s3 = inlined_call_operand.vmem [shape: bf16[168,128], index: 3, kind: output, shape index: {}]  }
   0x1   :  { %v1247_v0 = vld [vmem:[%s1644_s1 + $0x78] sm:$0xff]   ;;  %v1251_v4 = vld [vmem:[%s1644_s1 + $0x70] sm:$0xff]   ;;  %v1255_v8 = vld [vmem:[%s1644_s1 + $0x68] sm:$0xff]  }
   0x2   :  { %v1248_v1 = vld [vmem:[%s1644_s1 + $0xf8] sm:$0xff]   ;;  %1083 = vmatprep.subr.bf16.mxu0 %v1247_v0  ;;  %v1252_v5 = vld [vmem:[%s1644_s1 + $0xf0] sm:$0xff]   ;;  %v1256_v9 = vld [vmem:[%s1644_s1 + $0xe8] sm:$0xff]  }
   0x3   :  { %v1249_v2 = vld [vmem:[%s1644_s1 + $0x38] sm:$0xff]   ;;  %1165 = vmatprep.subr.bf16.mxu1 %v1248_v1  ;;  %v1253_v6 = vld [vmem:[%s1644_s1 + $0x30] sm:$0xff]   ;;  %v1257_v10 = vld [vmem:[%s1644_s1 + $0x28] sm:$0xff]  }
   0x4   :  { %v1250_v3 = vld [vmem:[%s1644_s1 + $0xb8] sm:$0xff]   ;;  %1084 = vmatpush3.bf16.msra.mxu0 %v1249_v2  ;;  %v1254_v7 = vld [vmem:[%s1644_s1 + $0xb0] sm:$0xff]   ;;  %v1258_v11 = vld [vmem:[%s1644_s1 + $0xa8] sm:$0xff]  }
   0x5   :  { %1166 = vmatpush3.bf16.msra.mxu1 %v1250_v3  ;;  %1085 = vmatprep.subr.bf16.mxu0 %v1251_v4  ;;  %v1259_v12 = vld [vmem:[%s1644_s1 + $0x60] sm:$0xff]   ;;  %v1263_v16 = vld [vmem:[%s1644_s1 + $0x58] sm:$0xff]   ;;  %v1267_v20 = vld [vmem:[%s1644_s1 + $0x50] sm:$0xff]  }
   0x6   :  { %1167 = vmatprep.subr.bf16.mxu1 %v1252_v5  ;;  %v1260_v13 = vld [vmem:[%s1644_s1 + $0xe0] sm:$0xff]   ;;  %v1264_v17 = vld [vmem:[%s1644_s1 + $0xd8] sm:$0xff]   ;;  %v1268_v21 = vld [vmem:[%s1644_s1 + $0xd0] sm:$0xff]  }
   0x7   :  { %v1261_v14 = vld [vmem:[%s1644_s1 + $0x20] sm:$0xff]   ;;  %v1265_v18 = vld [vmem:[%s1644_s1 + $0x18] sm:$0xff]   ;;  %v1269_v22 = vld [vmem:[%s1644_s1 + $0x10] sm:$0xff]  }
   0x8   :  { %1086 = vmatpush3.bf16.msra.mxu0 %v1253_v6  ;;  %v1262_v15 = vld [vmem:[%s1644_s1 + $0xa0] sm:$0xff]   ;;  %v1266_v19 = vld [vmem:[%s1644_s1 + $0x98] sm:$0xff]   ;;  %v1270_v23 = vld [vmem:[%s1644_s1 + $0x90] sm:$0xff]  }
   0x9   :  { %1168 = vmatpush3.bf16.msra.mxu1 %v1254_v7  ;;  %1087 = vmatprep.subr.bf16.mxu0 %v1255_v8  ;;  %v1271_v24 = vld [vmem:[%s1644_s1 + $0x48] sm:$0xff]   ;;  %v1275_v28 = vld [vmem:[%s1644_s1 + $0x40] sm:$0xff]  }
   0xa   :  { %1169 = vmatprep.subr.bf16.mxu1 %v1256_v9  ;;  %v1272_v25 = vld [vmem:[%s1644_s1 + $0xc8] sm:$0xff]   ;;  %v1276_v29 = vld [vmem:[%s1644_s1 + $0xc0] sm:$0xff]  }
   0xb   :  { %v1273_v26 = vld [vmem:[%s1644_s1 + $0x8] sm:$0xff]   ;;  %v1277_v30 = vld [vmem:[%s1644_s1] sm:$0xff]  }
   0xc   :  { %1088 = vmatpush3.bf16.msra.mxu0 %v1257_v10  ;;  %v1274_v27 = vld [vmem:[%s1644_s1 + $0x88] sm:$0xff]   ;;  %v1278_v31 = vld [vmem:[%s1644_s1 + $0x80] sm:$0xff]  }
   0xd   :  { %1170 = vmatpush3.bf16.msra.mxu1 %v1258_v11  ;;  %1089 = vmatprep.subr.bf16.mxu0 %v1259_v12  ;;  %v1279_v32 = vld [vmem:[%s1645_s0] ss:$16 sps:$4 sm:$0xff]   ;;  %v1281_v33 = vld [vmem:[%s1645_s0 + $0x4] ss:$16 sps:$4 sm:$0xff]   ;;  %v1282_v34 = vld [vmem:[%s1645_s0 + $0x8] ss:$16 sps:$4 sm:$0xff]  }
   0xe   :  { %1171 = vmatprep.subr.bf16.mxu1 %v1260_v13  ;;  %v1284_v35 = vld [vmem:[%s1645_s0 + $0xc] ss:$16 sps:$4 sm:$0xff]   ;;  %566 = vmatprep.mubr.bf16.mxu0 %v1281_v33  ;;  %v1285_v36 = vld [vmem:[%s1645_s0 + $0x24] ss:$16 sps:$4 sm:$0xff]   ;;  %v1289_v38 = vld [vmem:[%s1645_s0 + $0x20] ss:$16 sps:$4 sm:$0xff]  }
   0xf   :  { %686 = vmatprep.mubr.bf16.mxu1 %v1284_v35  ;;  %v1287_v37 = vld [vmem:[%s1645_s0 + $0x2c] ss:$16 sps:$4 sm:$0xff]   ;;  %v1290_v39 = vld [vmem:[%s1645_s0 + $0x28] ss:$16 sps:$4 sm:$0xff]   ;;  %v1291_v40 = vld [vmem:[%s1645_s0 + $0x44] ss:$16 sps:$4 sm:$0xff]  }
  0x10   :  { %1090 = vmatpush3.bf16.msra.mxu0 %v1261_v14  ;;  %v1293_v41 = vld [vmem:[%s1645_s0 + $0x4c] ss:$16 sps:$4 sm:$0xff]   ;;  %v1295_v42 = vld [vmem:[%s1645_s0 + $0x40] ss:$16 sps:$4 sm:$0xff]   ;;  %v1296_v43 = vld [vmem:[%s1645_s0 + $0x48] ss:$16 sps:$4 sm:$0xff]  }
  0x11   :  { %1172 = vmatpush3.bf16.msra.mxu1 %v1262_v15  ;;  %1091 = vmatprep.subr.bf16.mxu0 %v1263_v16  ;;  %v1297_v44 = vld [vmem:[%s1645_s0 + $0x64] ss:$16 sps:$4 sm:$0xff]   ;;  %v1299_v45 = vld [vmem:[%s1645_s0 + $0x6c] ss:$16 sps:$4 sm:$0xff]   ;;  %v1301_v46 = vld [vmem:[%s1645_s0 + $0x60] ss:$16 sps:$4 sm:$0xff]  }
  0x12   :  { %1173 = vmatprep.subr.bf16.mxu1 %v1264_v17  ;;  %v1302_v47 = vld [vmem:[%s1645_s0 + $0x68] ss:$16 sps:$4 sm:$0xff]   ;;  %v1303_v48 = vld [vmem:[%s1645_s0 + $0x84] ss:$16 sps:$4 sm:$0xff]   ;;  %v1305_v49 = vld [vmem:[%s1645_s0 + $0x8c] ss:$16 sps:$4 sm:$0xff]  }
  0x13   :  { %v1307_v50 = vld [vmem:[%s1645_s0 + $0x80] ss:$16 sps:$4 sm:$0xff]   ;;  %v1308_v51 = vld [vmem:[%s1645_s0 + $0x88] ss:$16 sps:$4 sm:$0xff]   ;;  %v1309_v52 = vld [vmem:[%s1645_s0 + $0xa4] ss:$16 sps:$4 sm:$0xff]  }
  0x14   :  { %1092 = vmatpush3.bf16.msra.mxu0 %v1265_v18  ;;  %v1311_v53 = vld [vmem:[%s1645_s0 + $0xac] ss:$16 sps:$4 sm:$0xff]   ;;  %v1313_v54 = vld [vmem:[%s1645_s0 + $0xa0] ss:$16 sps:$4 sm:$0xff]   ;;  %v1314_v55 = vld [vmem:[%s1645_s0 + $0xa8] ss:$16 sps:$4 sm:$0xff]  }
  0x15   :  { %1174 = vmatpush3.bf16.msra.mxu1 %v1266_v19  ;;  %1093 = vmatprep.subr.bf16.mxu0 %v1267_v20  ;;  %v1315_v56 = vld [vmem:[%s1645_s0 + $0xc4] ss:$16 sps:$4 sm:$0xff]   ;;  %v1317_v57 = vld [vmem:[%s1645_s0 + $0xcc] ss:$16 sps:$4 sm:$0xff]   ;;  %v1319_v58 = vld [vmem:[%s1645_s0 + $0xc0] ss:$16 sps:$4 sm:$0xff]  }
  0x16   :  { %1175 = vmatprep.subr.bf16.mxu1 %v1268_v21  ;;  %v1320_v59 = vld [vmem:[%s1645_s0 + $0xc8] ss:$16 sps:$4 sm:$0xff]   ;;  %v1321_v60 = vld [vmem:[%s1645_s0 + $0xe4] ss:$16 sps:$4 sm:$0xff]   ;;  %v1323_v61 = vld [vmem:[%s1645_s0 + $0xec] ss:$16 sps:$4 sm:$0xff]  }
  0x17   :  { %v1325_v62 = vld [vmem:[%s1645_s0 + $0xe0] ss:$16 sps:$4 sm:$0xff]   ;;  %v1326_v63 = vld [vmem:[%s1645_s0 + $0xe8] ss:$16 sps:$4 sm:$0xff]   ;;  %v1327_v0 = vld [vmem:[%s1645_s0 + $0x104] ss:$16 sps:$4 sm:$0xff]  }
  0x18   :  { %1094 = vmatpush3.bf16.msra.mxu0 %v1269_v22  ;;  %v1329_v1 = vld [vmem:[%s1645_s0 + $0x10c] ss:$16 sps:$4 sm:$0xff]   ;;  %v1331_v2 = vld [vmem:[%s1645_s0 + $0x100] ss:$16 sps:$4 sm:$0xff]   ;;  %v1332_v3 = vld [vmem:[%s1645_s0 + $0x108] ss:$16 sps:$4 sm:$0xff]  }
  0x19   :  { %1176 = vmatpush3.bf16.msra.mxu1 %v1270_v23  ;;  %1095 = vmatprep.subr.bf16.mxu0 %v1271_v24  ;;  %v1333_v4 = vld [vmem:[%s1645_s0 + $0x124] ss:$16 sps:$4 sm:$0xff]   ;;  %v1335_v5 = vld [vmem:[%s1645_s0 + $0x12c] ss:$16 sps:$4 sm:$0xff]   ;;  %v1337_v8 = vld [vmem:[%s1645_s0 + $0x120] ss:$16 sps:$4 sm:$0xff]  }
  0x1a   :  { %1177 = vmatprep.subr.bf16.mxu1 %v1272_v25  ;;  %v55_v6 = vld [vmem:[%s1645_s0 + $0x140] sm:$0xff]  ;;  %v56_v7 = vld [vmem:[%s1645_s0 + $0x148] sm:$0xff] }
  0x1b   :  { %v1338_v9 = vld [vmem:[%s1645_s0 + $0x128] ss:$16 sps:$4 sm:$0xff]   ;;  %v947_v10 = vcombine.high %v55_v6, %v55_v6  ;;  %v949_v11 = vcombine.high %v56_v7, %v56_v7  ;;  %v946_v12 = vcombine.low %v55_v6, %v55_v6  ;;  %v948_v13 = vcombine.low %v56_v7, %v56_v7  ;;  %v1588_v16 = vld [vmem:[%s1646_s2] ss:$0 sm:$0xff] }
  0x1c   :  { %1096 = vmatpush3.bf16.msra.mxu0 %v1273_v26 }
  0x1d   :  { %1178 = vmatpush3.bf16.msra.mxu1 %v1274_v27  ;;  %1097 = vmatprep.subr.bf16.mxu0 %v1275_v28 }
  0x1e   :  { %1179 = vmatprep.subr.bf16.mxu1 %v1276_v29 }
  0x20   :  { %1098 = vmatpush3.bf16.msra.mxu0 %v1277_v30 }
  0x21   :  { %1180 = vmatpush3.bf16.msra.mxu1 %v1278_v31 }
  0x23   :  { %567 = vmatmul.mubr.bf16.vlgmr.msra.gmra.mxu0 %v1279_v32 }
  0x24   :  { %687 = vmatmul.mubr.bf16.vlgmr.msra.gmra.mxu1 %v1282_v34  ;;  %574 = vmatprep.mubr.bf16.mxu0 %v1285_v36 }
  0x25   :  { %694 = vmatprep.mubr.bf16.mxu1 %v1287_v37 }
  0x2b   :  { %575 = vmatmul.mubr.bf16.gmra.mxu0 %v1289_v38 }
  0x2c   :  { %695 = vmatmul.mubr.bf16.gmra.mxu1 %v1290_v39  ;;  %582 = vmatprep.mubr.bf16.mxu0 %v1291_v40 }
  0x2d   :  { %702 = vmatprep.mubr.bf16.mxu1 %v1293_v41 }
  0x33   :  { %583 = vmatmul.mubr.bf16.gmra.mxu0 %v1295_v42 }
  0x34   :  { %703 = vmatmul.mubr.bf16.gmra.mxu1 %v1296_v43  ;;  %590 = vmatprep.mubr.bf16.mxu0 %v1297_v44 }
  0x35   :  { %710 = vmatprep.mubr.bf16.mxu1 %v1299_v45 }
  0x3b   :  { %591 = vmatmul.mubr.bf16.gmra.mxu0 %v1301_v46 }
  0x3c   :  { %711 = vmatmul.mubr.bf16.gmra.mxu1 %v1302_v47  ;;  %598 = vmatprep.mubr.bf16.mxu0 %v1303_v48 }
  0x3d   :  { %718 = vmatprep.mubr.bf16.mxu1 %v1305_v49 }
  0x43   :  { %599 = vmatmul.mubr.bf16.gmra.mxu0 %v1307_v50 }
  0x44   :  { %719 = vmatmul.mubr.bf16.gmra.mxu1 %v1308_v51  ;;  %606 = vmatprep.mubr.bf16.mxu0 %v1309_v52 }
  0x45   :  { %726 = vmatprep.mubr.bf16.mxu1 %v1311_v53 }
  0x4b   :  { %607 = vmatmul.mubr.bf16.gmra.mxu0 %v1313_v54 }
  0x4c   :  { %727 = vmatmul.mubr.bf16.gmra.mxu1 %v1314_v55  ;;  %614 = vmatprep.mubr.bf16.mxu0 %v1315_v56 }
  0x4d   :  { %734 = vmatprep.mubr.bf16.mxu1 %v1317_v57 }
  0x53   :  { %615 = vmatmul.mubr.bf16.gmra.mxu0 %v1319_v58 }
  0x54   :  { %735 = vmatmul.mubr.bf16.gmra.mxu1 %v1320_v59  ;;  %622 = vmatprep.mubr.bf16.mxu0 %v1321_v60 }
  0x55   :  { %742 = vmatprep.mubr.bf16.mxu1 %v1323_v61 }
  0x5b   :  { %623 = vmatmul.mubr.bf16.gmra.mxu0 %v1325_v62 }
  0x5c   :  { %743 = vmatmul.mubr.bf16.gmra.mxu1 %v1326_v63  ;;  %630 = vmatprep.mubr.bf16.mxu0 %v1327_v0 }
  0x5d   :  { %750 = vmatprep.mubr.bf16.mxu1 %v1329_v1 }
  0x63   :  { %631 = vmatmul.mubr.bf16.gmra.mxu0 %v1331_v2 }
  0x64   :  { %751 = vmatmul.mubr.bf16.gmra.mxu1 %v1332_v3  ;;  %638 = vmatprep.mubr.bf16.mxu0 %v1333_v4 }
  0x65   :  { %758 = vmatprep.mubr.bf16.mxu1 %v1335_v5 }
  0x6b   :  { %639 = vmatmul.mubr.bf16.gmra.mxu0 %v1337_v8 }
  0x6c   :  { %759 = vmatmul.mubr.bf16.gmra.mxu1 %v1338_v9  ;;  %646 = vmatprep.mubr.bf16.mxu0 %v947_v10 }
  0x6d   :  { %766 = vmatprep.mubr.bf16.mxu1 %v949_v11 }
  0x73   :  { %647 = vmatmul.mubr.bf16.gmra.mxu0 %v946_v12 }
  0x74   :  { %767 = vmatmul.mubr.bf16.gmra.mxu1 %v948_v13 }
  0xe3   :  { %v1099_v14 = vpop.f32.mrf.mxu0 }
  0xe4   :  { %v1181_v15 = vpop.f32.mrf.mxu1 }
  0xe5   :  { %v1100_v17 = vpop.f32.mrf.mxu0 }
  0xe6   :  { %v1101_v18 = vadd.f32 %v1100_v17, %v1099_v14  ;;  %v1182_v19 = vpop.f32.mrf.mxu1 }
  0xe7   :  { %v1102_v20 = vpop.f32.mrf.mxu0  ;;  %v1183_v24 = vadd.f32 %v1182_v19, %v1181_v15 }
  0xe8   :  { %v569_v21 = vadd.f32 %v1101_v18, %v1588_v16  ;;  %v1184_v22 = vpop.f32.mrf.mxu1 }
  0xe9   :  { %v1103_v23 = vpop.f32.mrf.mxu0 }
  0xea   :  { %v1104_v25 = vadd.f32 %v1103_v23, %v1102_v20  ;;  %v1185_v26 = vpop.f32.mrf.mxu1  ;;  %v689_v28 = vadd.f32 %v1183_v24, %v569_v21 }
  0xeb   :  { %v1105_v27 = vpop.f32.mrf.mxu0  ;;  %v1186_v30 = vadd.f32 %v1185_v26, %v1184_v22 }
  0xec   :  { %v572_v29 = vadd.f32 %v1104_v25, %v1588_v16  ;;  %v1187_v31 = vpop.f32.mrf.mxu1  ;;  %v774_v37 = vmax.f32 %v689_v28, 0.0 }
  0xed   :  { %v1106_v32 = vpop.f32.mrf.mxu0 }
  0xee   :  { %v692_v33 = vadd.f32 %v1186_v30, %v572_v29  ;;  %v1107_v34 = vadd.f32 %v1106_v32, %v1105_v27  ;;  %v1188_v35 = vpop.f32.mrf.mxu1 }
  0xef   :  { %v1108_v36 = vpop.f32.mrf.mxu0  ;;  %v1189_v43 = vadd.f32 %v1188_v35, %v1187_v31 }
  0xf0   :  { %v775_v38 = vmax.f32 %v692_v33, 0.0  ;;  %v577_v39 = vadd.f32 %v1107_v34, %v1588_v16  ;;  %v1190_v40 = vpop.f32.mrf.mxu1 }
  0xf1   :  { %v1109_v41 = vpop.f32.mrf.mxu0 }
  0xf2   :  { %v1027_v42 = vpack.c.bf16 %v775_v38, %v774_v37  ;;  %v1110_v44 = vadd.f32 %v1109_v41, %v1108_v36  ;;  %v1191_v45 = vpop.f32.mrf.mxu1  ;;  %v697_v47 = vadd.f32 %v1189_v43, %v577_v39 }
  0xf3   :  { %v1111_v46 = vpop.f32.mrf.mxu0  ;;  %v1192_v49 = vadd.f32 %v1191_v45, %v1190_v40 }
  0xf4   :  { %1028 = vst [vmem:[%s1647_s3] sm:$0xff] %v1027_v42   ;;  %v580_v48 = vadd.f32 %v1110_v44, %v1588_v16  ;;  %v1193_v50 = vpop.f32.mrf.mxu1  ;;  %v776_v56 = vmax.f32 %v697_v47, 0.0 }
  0xf5   :  { %v1112_v51 = vpop.f32.mrf.mxu0 }
  0xf6   :  { %v700_v52 = vadd.f32 %v1192_v49, %v580_v48  ;;  %v1113_v53 = vadd.f32 %v1112_v51, %v1111_v46  ;;  %v1194_v54 = vpop.f32.mrf.mxu1 }
  0xf7   :  { %v1114_v55 = vpop.f32.mrf.mxu0  ;;  %v1195_v62 = vadd.f32 %v1194_v54, %v1193_v50 }
  0xf8   :  { %v777_v57 = vmax.f32 %v700_v52, 0.0  ;;  %v585_v58 = vadd.f32 %v1113_v53, %v1588_v16  ;;  %v1196_v59 = vpop.f32.mrf.mxu1 }
  0xf9   :  { %v1115_v60 = vpop.f32.mrf.mxu0 }
  0xfa   :  { %v1032_v61 = vpack.c.bf16 %v777_v57, %v776_v56  ;;  %v1116_v63 = vadd.f32 %v1115_v60, %v1114_v55  ;;  %v1197_v0 = vpop.f32.mrf.mxu1  ;;  %v705_v2 = vadd.f32 %v1195_v62, %v585_v58 }
  0xfb   :  { %v1117_v1 = vpop.f32.mrf.mxu0  ;;  %v1198_v4 = vadd.f32 %v1197_v0, %v1196_v59 }
  0xfc   :  { %1074 = vst [vmem:[%s1647_s3 + $0x8] sm:$0xff] %v1032_v61   ;;  %v588_v3 = vadd.f32 %v1116_v63, %v1588_v16  ;;  %v1199_v5 = vpop.f32.mrf.mxu1  ;;  %v778_v11 = vmax.f32 %v705_v2, 0.0 }
  0xfd   :  { %v1118_v6 = vpop.f32.mrf.mxu0 }
  0xfe   :  { %v708_v7 = vadd.f32 %v1198_v4, %v588_v3  ;;  %v1119_v8 = vadd.f32 %v1118_v6, %v1117_v1  ;;  %v1200_v9 = vpop.f32.mrf.mxu1 }
  0xff   :  { %v1120_v10 = vpop.f32.mrf.mxu0  ;;  %v1201_v18 = vadd.f32 %v1200_v9, %v1199_v5 }
 0x100   :  { %v779_v12 = vmax.f32 %v708_v7, 0.0  ;;  %v593_v13 = vadd.f32 %v1119_v8, %v1588_v16  ;;  %v1202_v14 = vpop.f32.mrf.mxu1 }
 0x101   :  { %v1121_v15 = vpop.f32.mrf.mxu0 }
 0x102   :  { %v1037_v17 = vpack.c.bf16 %v779_v12, %v778_v11  ;;  %v1122_v19 = vadd.f32 %v1121_v15, %v1120_v10  ;;  %v1203_v20 = vpop.f32.mrf.mxu1  ;;  %v713_v22 = vadd.f32 %v1201_v18, %v593_v13 }
 0x103   :  { %v1123_v21 = vpop.f32.mrf.mxu0  ;;  %v1204_v24 = vadd.f32 %v1203_v20, %v1202_v14 }
 0x104   :  { %1075 = vst [vmem:[%s1647_s3 + $0x10] sm:$0xff] %v1037_v17   ;;  %v596_v23 = vadd.f32 %v1122_v19, %v1588_v16  ;;  %v1205_v25 = vpop.f32.mrf.mxu1  ;;  %v780_v31 = vmax.f32 %v713_v22, 0.0 }
 0x105   :  { %v1124_v26 = vpop.f32.mrf.mxu0 }
 0x106   :  { %v716_v27 = vadd.f32 %v1204_v24, %v596_v23  ;;  %v1125_v28 = vadd.f32 %v1124_v26, %v1123_v21  ;;  %v1206_v29 = vpop.f32.mrf.mxu1 }
 0x107   :  { %v1126_v30 = vpop.f32.mrf.mxu0  ;;  %v1207_v37 = vadd.f32 %v1206_v29, %v1205_v25 }
 0x108   :  { %v781_v32 = vmax.f32 %v716_v27, 0.0  ;;  %v601_v33 = vadd.f32 %v1125_v28, %v1588_v16  ;;  %v1208_v34 = vpop.f32.mrf.mxu1 }
 0x109   :  { %v1127_v35 = vpop.f32.mrf.mxu0 }
 0x10a   :  { %v1042_v36 = vpack.c.bf16 %v781_v32, %v780_v31  ;;  %v1128_v38 = vadd.f32 %v1127_v35, %v1126_v30  ;;  %v1209_v39 = vpop.f32.mrf.mxu1  ;;  %v721_v41 = vadd.f32 %v1207_v37, %v601_v33 }
 0x10b   :  { %v1129_v40 = vpop.f32.mrf.mxu0  ;;  %v1210_v43 = vadd.f32 %v1209_v39, %v1208_v34 }
 0x10c   :  { %1076 = vst [vmem:[%s1647_s3 + $0x18] sm:$0xff] %v1042_v36   ;;  %v604_v42 = vadd.f32 %v1128_v38, %v1588_v16  ;;  %v1211_v44 = vpop.f32.mrf.mxu1  ;;  %v782_v50 = vmax.f32 %v721_v41, 0.0 }
 0x10d   :  { %v1130_v45 = vpop.f32.mrf.mxu0 }
 0x10e   :  { %v724_v46 = vadd.f32 %v1210_v43, %v604_v42  ;;  %v1131_v47 = vadd.f32 %v1130_v45, %v1129_v40  ;;  %v1212_v48 = vpop.f32.mrf.mxu1 }
 0x10f   :  { %v1132_v49 = vpop.f32.mrf.mxu0  ;;  %v1213_v56 = vadd.f32 %v1212_v48, %v1211_v44 }
 0x110   :  { %v783_v51 = vmax.f32 %v724_v46, 0.0  ;;  %v609_v52 = vadd.f32 %v1131_v47, %v1588_v16  ;;  %v1214_v53 = vpop.f32.mrf.mxu1 }
 0x111   :  { %v1133_v54 = vpop.f32.mrf.mxu0 }
 0x112   :  { %v1047_v55 = vpack.c.bf16 %v783_v51, %v782_v50  ;;  %v1134_v57 = vadd.f32 %v1133_v54, %v1132_v49  ;;  %v1215_v58 = vpop.f32.mrf.mxu1  ;;  %v729_v60 = vadd.f32 %v1213_v56, %v609_v52 }
 0x113   :  { %v1135_v59 = vpop.f32.mrf.mxu0  ;;  %v1216_v62 = vadd.f32 %v1215_v58, %v1214_v53 }
 0x114   :  { %1077 = vst [vmem:[%s1647_s3 + $0x20] sm:$0xff] %v1047_v55   ;;  %v612_v61 = vadd.f32 %v1134_v57, %v1588_v16  ;;  %v1217_v63 = vpop.f32.mrf.mxu1  ;;  %v784_v5 = vmax.f32 %v729_v60, 0.0 }
 0x115   :  { %v1136_v0 = vpop.f32.mrf.mxu0 }
 0x116   :  { %v732_v1 = vadd.f32 %v1216_v62, %v612_v61  ;;  %v1137_v2 = vadd.f32 %v1136_v0, %v1135_v59  ;;  %v1218_v3 = vpop.f32.mrf.mxu1 }
 0x117   :  { %v1138_v4 = vpop.f32.mrf.mxu0  ;;  %v1219_v11 = vadd.f32 %v1218_v3, %v1217_v63 }
 0x118   :  { %v785_v6 = vmax.f32 %v732_v1, 0.0  ;;  %v617_v7 = vadd.f32 %v1137_v2, %v1588_v16  ;;  %v1220_v8 = vpop.f32.mrf.mxu1 }
 0x119   :  { %v1139_v9 = vpop.f32.mrf.mxu0 }
 0x11a   :  { %v1052_v10 = vpack.c.bf16 %v785_v6, %v784_v5  ;;  %v1140_v12 = vadd.f32 %v1139_v9, %v1138_v4  ;;  %v1221_v13 = vpop.f32.mrf.mxu1  ;;  %v737_v15 = vadd.f32 %v1219_v11, %v617_v7 }
 0x11b   :  { %v1141_v14 = vpop.f32.mrf.mxu0  ;;  %v1222_v18 = vadd.f32 %v1221_v13, %v1220_v8 }
 0x11c   :  { %1078 = vst [vmem:[%s1647_s3 + $0x28] sm:$0xff] %v1052_v10   ;;  %v620_v17 = vadd.f32 %v1140_v12, %v1588_v16  ;;  %v1223_v19 = vpop.f32.mrf.mxu1  ;;  %v786_v25 = vmax.f32 %v737_v15, 0.0 }
 0x11d   :  { %v1142_v20 = vpop.f32.mrf.mxu0 }
 0x11e   :  { %v740_v21 = vadd.f32 %v1222_v18, %v620_v17  ;;  %v1143_v22 = vadd.f32 %v1142_v20, %v1141_v14  ;;  %v1224_v23 = vpop.f32.mrf.mxu1 }
 0x11f   :  { %v1144_v24 = vpop.f32.mrf.mxu0  ;;  %v1225_v31 = vadd.f32 %v1224_v23, %v1223_v19 }
 0x120   :  { %v787_v26 = vmax.f32 %v740_v21, 0.0  ;;  %v625_v27 = vadd.f32 %v1143_v22, %v1588_v16  ;;  %v1226_v28 = vpop.f32.mrf.mxu1 }
 0x121   :  { %v1145_v29 = vpop.f32.mrf.mxu0 }
 0x122   :  { %v1057_v30 = vpack.c.bf16 %v787_v26, %v786_v25  ;;  %v1146_v32 = vadd.f32 %v1145_v29, %v1144_v24  ;;  %v1227_v33 = vpop.f32.mrf.mxu1  ;;  %v745_v35 = vadd.f32 %v1225_v31, %v625_v27 }
 0x123   :  { %v1147_v34 = vpop.f32.mrf.mxu0  ;;  %v1228_v37 = vadd.f32 %v1227_v33, %v1226_v28 }
 0x124   :  { %1079 = vst [vmem:[%s1647_s3 + $0x30] sm:$0xff] %v1057_v30   ;;  %v628_v36 = vadd.f32 %v1146_v32, %v1588_v16  ;;  %v1229_v38 = vpop.f32.mrf.mxu1  ;;  %v788_v44 = vmax.f32 %v745_v35, 0.0 }
 0x125   :  { %v1148_v39 = vpop.f32.mrf.mxu0 }
 0x126   :  { %v748_v40 = vadd.f32 %v1228_v37, %v628_v36  ;;  %v1149_v41 = vadd.f32 %v1148_v39, %v1147_v34  ;;  %v1230_v42 = vpop.f32.mrf.mxu1 }
 0x127   :  { %v1150_v43 = vpop.f32.mrf.mxu0  ;;  %v1231_v50 = vadd.f32 %v1230_v42, %v1229_v38 }
 0x128   :  { %v789_v45 = vmax.f32 %v748_v40, 0.0  ;;  %v633_v46 = vadd.f32 %v1149_v41, %v1588_v16  ;;  %v1232_v47 = vpop.f32.mrf.mxu1 }
 0x129   :  { %v1151_v48 = vpop.f32.mrf.mxu0 }
 0x12a   :  { %v1062_v49 = vpack.c.bf16 %v789_v45, %v788_v44  ;;  %v1152_v51 = vadd.f32 %v1151_v48, %v1150_v43  ;;  %v1233_v52 = vpop.f32.mrf.mxu1  ;;  %v753_v54 = vadd.f32 %v1231_v50, %v633_v46 }
 0x12b   :  { %v1153_v53 = vpop.f32.mrf.mxu0  ;;  %v1234_v56 = vadd.f32 %v1233_v52, %v1232_v47 }
 0x12c   :  { %1080 = vst [vmem:[%s1647_s3 + $0x38] sm:$0xff] %v1062_v49   ;;  %v636_v55 = vadd.f32 %v1152_v51, %v1588_v16  ;;  %v1235_v57 = vpop.f32.mrf.mxu1  ;;  %v790_v63 = vmax.f32 %v753_v54, 0.0 }
 0x12d   :  { %v1154_v58 = vpop.f32.mrf.mxu0 }
 0x12e   :  { %v756_v59 = vadd.f32 %v1234_v56, %v636_v55  ;;  %v1155_v60 = vadd.f32 %v1154_v58, %v1153_v53  ;;  %v1236_v61 = vpop.f32.mrf.mxu1 }
 0x12f   :  { %v1156_v62 = vpop.f32.mrf.mxu0  ;;  %v1237_v5 = vadd.f32 %v1236_v61, %v1235_v57 }
 0x130   :  { %v791_v0 = vmax.f32 %v756_v59, 0.0  ;;  %v641_v1 = vadd.f32 %v1155_v60, %v1588_v16  ;;  %v1238_v2 = vpop.f32.mrf.mxu1 }
 0x131   :  { %v1157_v3 = vpop.f32.mrf.mxu0 }
 0x132   :  { %v1067_v4 = vpack.c.bf16 %v791_v0, %v790_v63  ;;  %v1158_v6 = vadd.f32 %v1157_v3, %v1156_v62  ;;  %v1239_v7 = vpop.f32.mrf.mxu1  ;;  %v761_v9 = vadd.f32 %v1237_v5, %v641_v1 }
 0x133   :  { %v1159_v8 = vpop.f32.mrf.mxu0  ;;  %v1240_v11 = vadd.f32 %v1239_v7, %v1238_v2 }
 0x134   :  { %1081 = vst [vmem:[%s1647_s3 + $0x40] sm:$0xff] %v1067_v4   ;;  %v644_v10 = vadd.f32 %v1158_v6, %v1588_v16  ;;  %v1241_v12 = vpop.f32.mrf.mxu1  ;;  %v792_v19 = vmax.f32 %v761_v9, 0.0 }
 0x135   :  { %v1160_v13 = vpop.f32.mrf.mxu0 }
 0x136   :  { %v764_v14 = vadd.f32 %v1240_v11, %v644_v10  ;;  %v1161_v15 = vadd.f32 %v1160_v13, %v1159_v8  ;;  %v1242_v17 = vpop.f32.mrf.mxu1 }
 0x137   :  { %v1162_v18 = vpop.f32.mrf.mxu0  ;;  %v1243_v22 = vadd.f32 %v1242_v17, %v1241_v12 }
 0x138   :  { %v793_v20 = vmax.f32 %v764_v14, 0.0  ;;  %v649_v21 = vadd.f32 %v1161_v15, %v1588_v16  ;;  %v1244_v23 = vpop.f32.mrf.mxu1 }
 0x139   :  { %v1163_v24 = vpop.f32.mrf.mxu0 }
 0x13a   :  { %v1072_v25 = vpack.c.bf16 %v793_v20, %v792_v19  ;;  %v769_v26 = vadd.f32 %v1243_v22, %v649_v21  ;;  %v1245_v27 = vpop.f32.mrf.mxu1 }
 0x13c   :  { %1082 = vst [vmem:[%s1647_s3 + $0x48] sm:$0xff] %v1072_v25   ;;  %v794_v28 = vmax.f32 %v769_v26, 0.0 }
 0x13e   :  { %v1023_v29 = vpack.c.bf16 %v794_v28, %v794_v28 }
 0x140   :  { %900 = vst [vmem:[%s1647_s3 + $0x50] sm:$0xf] %v1023_v29 }

// kernel: actor_forward.6
= control target key start
LH: loop header
LB: loop body
LE: loop exit
PB: predicated region body
PF: predicated region fallthrough
CT: control target
= control target key end

     0   :  { %v1281_v34 = vmov 0.0   ;;  %vm1282_vm0 = vmmov 0   ;;  %vm516_vm1 = vcmask 523264   ;;  %s1650_s1 = inlined_call_operand.vmem [shape: bf16[576,128], index: 1, kind: input, shape index: {}]   ;;  %s1651_s0 = inlined_call_operand.vmem [shape: bf16[104,576], index: 0, kind: input, shape index: {}]   ;;  %s1652_s2 = inlined_call_operand.vmem [shape: f32[1,128], index: 2, kind: input, shape index: {}]   ;;  %s1653_s3 = inlined_call_operand.vmem [shape: bf16[104,128], index: 3, kind: output, shape index: {}]  }
   0x1   :  { %v1198_v0 = vld [vmem:[%s1650_s1 + $0x78] sm:$0xff]   ;;  %v1202_v4 = vld [vmem:[%s1650_s1 + $0x70] sm:$0xff]   ;;  %v1206_v8 = vld [vmem:[%s1650_s1 + $0x68] sm:$0xff]  }
   0x2   :  { %v1199_v1 = vld [vmem:[%s1650_s1 + $0xf8] sm:$0xff]   ;;  %1025 = vmatprep.subr.bf16.mxu0 %v1198_v0  ;;  %v1203_v5 = vld [vmem:[%s1650_s1 + $0xf0] sm:$0xff]   ;;  %v1207_v9 = vld [vmem:[%s1650_s1 + $0xe8] sm:$0xff]  }
   0x3   :  { %v1200_v2 = vld [vmem:[%s1650_s1 + $0x38] sm:$0xff]   ;;  %1083 = vmatprep.subr.bf16.mxu1 %v1199_v1  ;;  %v1204_v6 = vld [vmem:[%s1650_s1 + $0x30] sm:$0xff]   ;;  %v1208_v10 = vld [vmem:[%s1650_s1 + $0x28] sm:$0xff]  }
   0x4   :  { %v1201_v3 = vld [vmem:[%s1650_s1 + $0xb8] sm:$0xff]   ;;  %1026 = vmatpush3.bf16.msra.mxu0 %v1200_v2  ;;  %v1205_v7 = vld [vmem:[%s1650_s1 + $0xb0] sm:$0xff]   ;;  %v1209_v11 = vld [vmem:[%s1650_s1 + $0xa8] sm:$0xff]  }
   0x5   :  { %1084 = vmatpush3.bf16.msra.mxu1 %v1201_v3  ;;  %1027 = vmatprep.subr.bf16.mxu0 %v1202_v4  ;;  %v1210_v12 = vld [vmem:[%s1650_s1 + $0x60] sm:$0xff]   ;;  %v1214_v16 = vld [vmem:[%s1650_s1 + $0x58] sm:$0xff]   ;;  %v1218_v20 = vld [vmem:[%s1650_s1 + $0x50] sm:$0xff]  }
   0x6   :  { %1085 = vmatprep.subr.bf16.mxu1 %v1203_v5  ;;  %v1211_v13 = vld [vmem:[%s1650_s1 + $0xe0] sm:$0xff]   ;;  %v1215_v17 = vld [vmem:[%s1650_s1 + $0xd8] sm:$0xff]   ;;  %v1219_v21 = vld [vmem:[%s1650_s1 + $0xd0] sm:$0xff]  }
   0x7   :  { %v1212_v14 = vld [vmem:[%s1650_s1 + $0x20] sm:$0xff]   ;;  %v1216_v18 = vld [vmem:[%s1650_s1 + $0x18] sm:$0xff]   ;;  %v1220_v22 = vld [vmem:[%s1650_s1 + $0x10] sm:$0xff]  }
   0x8   :  { %1028 = vmatpush3.bf16.msra.mxu0 %v1204_v6  ;;  %v1213_v15 = vld [vmem:[%s1650_s1 + $0xa0] sm:$0xff]   ;;  %v1217_v19 = vld [vmem:[%s1650_s1 + $0x98] sm:$0xff]   ;;  %v1221_v23 = vld [vmem:[%s1650_s1 + $0x90] sm:$0xff]  }
   0x9   :  { %1086 = vmatpush3.bf16.msra.mxu1 %v1205_v7  ;;  %1029 = vmatprep.subr.bf16.mxu0 %v1206_v8  ;;  %v1222_v24 = vld [vmem:[%s1650_s1 + $0x48] sm:$0xff]   ;;  %v1226_v28 = vld [vmem:[%s1650_s1 + $0x40] sm:$0xff]   ;;  %v1236_v37 = vld [vmem:[%s1650_s1 + $0x118] sm:$0xff]  }
   0xa   :  { %1087 = vmatprep.subr.bf16.mxu1 %v1207_v9  ;;  %v1223_v25 = vld [vmem:[%s1650_s1 + $0xc8] sm:$0xff]   ;;  %v1227_v29 = vld [vmem:[%s1650_s1 + $0xc0] sm:$0xff]   ;;  %v1247_v43 = vld [vmem:[%s1650_s1 + $0x110] sm:$0xff]  }
   0xb   :  { %v1224_v26 = vld [vmem:[%s1650_s1 + $0x8] sm:$0xff]   ;;  %v1228_v30 = vld [vmem:[%s1650_s1] sm:$0xff]   ;;  %v1245_v44 = vld [vmem:[%s1651_s0 + $0x5c] ss:$20 sps:$4 sm:$0xff]  }
   0xc   :  { %1030 = vmatpush3.bf16.msra.mxu0 %v1208_v10  ;;  %v1225_v27 = vld [vmem:[%s1650_s1 + $0x88] sm:$0xff]   ;;  %v1229_v31 = vld [vmem:[%s1650_s1 + $0x80] sm:$0xff]   ;;  %v1250_v48 = vld [vmem:[%s1651_s0 + $0x7c] ss:$20 sps:$4 sm:$0xff]  }
   0xd   :  { %1088 = vmatpush3.bf16.msra.mxu1 %v1209_v11  ;;  %1031 = vmatprep.subr.bf16.mxu0 %v1210_v12  ;;  %v1230_v32 = vld [vmem:[%s1651_s0] ss:$20 sps:$4 sm:$0xff]   ;;  %v1232_v33 = vld [vmem:[%s1651_s0 + $0x4] ss:$20 sps:$4 sm:$0xff]   ;;  %v1233_v35 = vld [vmem:[%s1651_s0 + $0x8] ss:$20 sps:$4 sm:$0xff]  }
   0xe   :  { %1089 = vmatprep.subr.bf16.mxu1 %v1211_v13  ;;  %v1235_v36 = vld [vmem:[%s1651_s0 + $0xc] ss:$20 sps:$4 sm:$0xff]   ;;  %570 = vmatprep.mubr.bf16.mxu0 %v1232_v33  ;;  %v1239_v39 = vld [vmem:[%s1651_s0 + $0x34] ss:$20 sps:$4 sm:$0xff]   ;;  %v1242_v41 = vld [vmem:[%s1651_s0 + $0x30] ss:$20 sps:$4 sm:$0xff]  }
   0xf   :  { %658 = vmatprep.mubr.bf16.mxu1 %v1235_v36  ;;  %v1237_v38 = vld [vmem:[%s1651_s0 + $0x2c] ss:$20 sps:$4 sm:$0xff]   ;;  %v1241_v40 = vld [vmem:[%s1651_s0 + $0x28] ss:$20 sps:$4 sm:$0xff]   ;;  %v1248_v46 = vld [vmem:[%s1651_s0 + $0x50] ss:$20 sps:$4 sm:$0xff]  }
  0x10   :  { %1032 = vmatpush3.bf16.msra.mxu0 %v1212_v14  ;;  %v1243_v42 = vld [vmem:[%s1651_s0 + $0x54] ss:$20 sps:$4 sm:$0xff]   ;;  %v1249_v47 = vld [vmem:[%s1651_s0 + $0x58] ss:$20 sps:$4 sm:$0xff]   ;;  %v1269_v50 = vld [vmem:[%s1650_s1 + $0x100] sm:$0xff]  }
  0x11   :  { %1090 = vmatpush3.bf16.msra.mxu1 %v1213_v15  ;;  %1033 = vmatprep.subr.bf16.mxu0 %v1214_v16  ;;  %v1256_v45 = vld [vmem:[%s1650_s1 + $0x108] sm:$0xff]   ;;  %v1252_v49 = vld [vmem:[%s1651_s0 + $0x84] ss:$20 sps:$4 sm:$0xff]   ;;  %v1255_v52 = vld [vmem:[%s1651_s0 + $0x80] ss:$20 sps:$4 sm:$0xff]  }
  0x12   :  { %1091 = vmatprep.subr.bf16.mxu1 %v1215_v17  ;;  %v1254_v51 = vld [vmem:[%s1651_s0 + $0x78] ss:$20 sps:$4 sm:$0xff]   ;;  %v1261_v55 = vld [vmem:[%s1651_s0 + $0xa0] ss:$20 sps:$4 sm:$0xff]   ;;  %v1262_v56 = vld [vmem:[%s1651_s0 + $0xa8] ss:$20 sps:$4 sm:$0xff]  }
  0x13   :  { %v1257_v53 = vld [vmem:[%s1651_s0 + $0xa4] ss:$20 sps:$4 sm:$0xff]   ;;  %v1259_v54 = vld [vmem:[%s1651_s0 + $0xac] ss:$20 sps:$4 sm:$0xff]   ;;  %v1265_v58 = vld [vmem:[%s1651_s0 + $0xd4] ss:$20 sps:$4 sm:$0xff]  }
  0x14   :  { %1034 = vmatpush3.bf16.msra.mxu0 %v1216_v18  ;;  %v1263_v57 = vld [vmem:[%s1651_s0 + $0xcc] ss:$20 sps:$4 sm:$0xff]   ;;  %v51_v59 = vld [vmem:[%s1651_s0 + $0xf0] sm:$0xff]  ;;  %v52_v60 = vld [vmem:[%s1651_s0 + $0xf8] sm:$0xff] }
  0x15   :  { %1092 = vmatpush3.bf16.msra.mxu1 %v1217_v19  ;;  %1035 = vmatprep.subr.bf16.mxu0 %v1218_v20  ;;  %v1267_v61 = vld [vmem:[%s1651_s0 + $0xc8] ss:$20 sps:$4 sm:$0xff]   ;;  %v1268_v62 = vld [vmem:[%s1651_s0 + $0xd0] ss:$20 sps:$4 sm:$0xff]   ;;  %v917_v63 = vcombine.high %v51_v59, %v51_v59  ;;  %v919_v0 = vcombine.high %v52_v60, %v52_v60  ;;  %v916_v1 = vcombine.low %v51_v59, %v51_v59  ;;  %v1276_v5 = vld [vmem:[%s1651_s0 + $0x38] ss:$20 sps:$4 sm:$0xff]  }
  0x16   :  { %1093 = vmatprep.subr.bf16.mxu1 %v1219_v21  ;;  %v918_v2 = vcombine.low %v52_v60, %v52_v60  ;;  %v1274_v3 = vld [vmem:[%s1651_s0 + $0x10] ss:$20 sps:$4 sm:$0xff]   ;;  %v1277_v6 = vld [vmem:[%s1651_s0 + $0xd8] ss:$20 sps:$4 sm:$0xff]   ;;  %v1278_v7 = vld [vmem:[%s1651_s0 + $0x60] ss:$20 sps:$4 sm:$0xff]  }
  0x17   :  { %v1275_v4 = vld [vmem:[%s1651_s0 + $0xb0] ss:$20 sps:$4 sm:$0xff]   ;;  %v1279_v8 = vld [vmem:[%s1651_s0 + $0x100] ss:$0 sps:$4 sm:$0xff]   ;;  %v1280_v9 = vld [vmem:[%s1651_s0 + $0x88] ss:$20 sps:$4 sm:$0xff]  }
  0x18   :  { %1036 = vmatpush3.bf16.msra.mxu0 %v1220_v22 }
  0x19   :  { %1094 = vmatpush3.bf16.msra.mxu1 %v1221_v23  ;;  %1037 = vmatprep.subr.bf16.mxu0 %v1222_v24 }
  0x1a   :  { %1095 = vmatprep.subr.bf16.mxu1 %v1223_v25 }
  0x1c   :  { %1038 = vmatpush3.bf16.msra.mxu0 %v1224_v26 }
  0x1d   :  { %1096 = vmatpush3.bf16.msra.mxu1 %v1225_v27  ;;  %1039 = vmatprep.subr.bf16.mxu0 %v1226_v28 }
  0x1e   :  { %1097 = vmatprep.subr.bf16.mxu1 %v1227_v29 }
  0x20   :  { %1040 = vmatpush3.bf16.msra.mxu0 %v1228_v30 }
  0x21   :  { %1098 = vmatpush3.bf16.msra.mxu1 %v1229_v31  ;;  %1152 = vmatprep.subr.bf16.mxu0 %v1281_v34 }
  0x22   :  { %1188 = vmatprep.subr.bf16.mxu1 %v1281_v34 }
  0x23   :  { %571 = vmatmul.mubr.bf16.vlgmr.msra.gmra.mxu0 %v1230_v32 }
  0x24   :  { %659 = vmatmul.mubr.bf16.vlgmr.msra.gmra.mxu1 %v1233_v35  ;;  %1153 = vmatpush3.bf16.msra.mxu0 %v1236_v37 }
  0x25   :  { %578 = vmatprep.mubr.bf16.mxu0 %v1237_v38  ;;  %1192 = vmatpush3.bf16.msra.mxu1 %v1236_v37 }
  0x26   :  { %666 = vmatprep.mubr.bf16.mxu1 %v1239_v39  ;;  %1154 = vmatprep.subr.bf16.mxu0 %v1281_v34 }
  0x27   :  { %1189 = vmatprep.subr.bf16.mxu1 %v1281_v34 }
  0x28   :  { %1155 = vmatpush3.bf16.msra.mxu0 %v1247_v43 }
  0x29   :  { %1193 = vmatpush3.bf16.msra.mxu1 %v1247_v43  ;;  %1156 = vmatprep.subr.bf16.mxu0 %v1281_v34 }
  0x2a   :  { %1190 = vmatprep.subr.bf16.mxu1 %v1281_v34 }
  0x2b   :  { %579 = vmatmul.mubr.bf16.gmra.mxu0 %v1241_v40 }
  0x2c   :  { %667 = vmatmul.mubr.bf16.gmra.mxu1 %v1242_v41  ;;  %586 = vmatprep.mubr.bf16.mxu0 %v1243_v42 }
  0x2d   :  { %674 = vmatprep.mubr.bf16.mxu1 %v1245_v44  ;;  %1157 = vmatpush3.bf16.msra.mxu0 %v1256_v45 }
  0x2e   :  { %1194 = vmatpush3.bf16.msra.mxu1 %v1256_v45  ;;  %1158 = vmatprep.subr.bf16.mxu0 %v1281_v34 }
  0x2f   :  { %1191 = vmatprep.subr.bf16.mxu1 %v1281_v34 }
  0x31   :  { %1159 = vmatpush3.bf16.msra.mxu0 %v1269_v50 }
  0x32   :  { %1195 = vmatpush3.bf16.msra.mxu1 %v1269_v50 }
  0x33   :  { %587 = vmatmul.mubr.bf16.gmra.mxu0 %v1248_v46 }
  0x34   :  { %675 = vmatmul.mubr.bf16.gmra.mxu1 %v1249_v47  ;;  %594 = vmatprep.mubr.bf16.mxu0 %v1250_v48 }
  0x35   :  { %682 = vmatprep.mubr.bf16.mxu1 %v1252_v49 }
  0x3b   :  { %595 = vmatmul.mubr.bf16.gmra.mxu0 %v1254_v51 }
  0x3c   :  { %683 = vmatmul.mubr.bf16.gmra.mxu1 %v1255_v52  ;;  %602 = vmatprep.mubr.bf16.mxu0 %v1257_v53 }
  0x3d   :  { %690 = vmatprep.mubr.bf16.mxu1 %v1259_v54 }
  0x43   :  { %603 = vmatmul.mubr.bf16.gmra.mxu0 %v1261_v55 }
  0x44   :  { %691 = vmatmul.mubr.bf16.gmra.mxu1 %v1262_v56  ;;  %610 = vmatprep.mubr.bf16.mxu0 %v1263_v57 }
  0x45   :  { %698 = vmatprep.mubr.bf16.mxu1 %v1265_v58 }
  0x4b   :  { %611 = vmatmul.mubr.bf16.gmra.mxu0 %v1267_v61  ;;  %v1590_v61 = vld [vmem:[%s1652_s2] ss:$0 sm:$0xff] }
  0x4c   :  { %699 = vmatmul.mubr.bf16.gmra.mxu1 %v1268_v62  ;;  %618 = vmatprep.mubr.bf16.mxu0 %v917_v63 }
  0x4d   :  { %706 = vmatprep.mubr.bf16.mxu1 %v919_v0 }
  0x53   :  { %619 = vmatmul.mubr.bf16.gmra.mxu0 %v916_v1 }
  0x54   :  { %707 = vmatmul.mubr.bf16.gmra.mxu1 %v918_v2  ;;  %1160 = vmatprep.mubr.msk.bf16.mxu0 %vm1282_vm0, %v1281_v34 }
  0x55   :  { %1176 = vmatprep.mubr.msk.bf16.mxu1 %vm1282_vm0, %v1281_v34 }
  0x5b   :  { %1161 = vmatmul.mubr.msk.bf16.vlgmr.msra.gmra.mxu0 %vm516_vm1, %v1274_v3 }
  0x5c   :  { %1177 = vmatmul.mubr.msk.bf16.vlgmr.msra.gmra.mxu1 %vm516_vm1, %v1275_v4  ;;  %1164 = vmatprep.mubr.msk.bf16.mxu0 %vm1282_vm0, %v1281_v34 }
  0x5d   :  { %1180 = vmatprep.mubr.msk.bf16.mxu1 %vm1282_vm0, %v1281_v34 }
  0x63   :  { %1165 = vmatmul.mubr.msk.bf16.gmra.mxu0 %vm516_vm1, %v1276_v5 }
  0x64   :  { %1181 = vmatmul.mubr.msk.bf16.gmra.mxu1 %vm516_vm1, %v1277_v6  ;;  %1168 = vmatprep.mubr.msk.bf16.mxu0 %vm1282_vm0, %v1281_v34 }
  0x65   :  { %1184 = vmatprep.mubr.msk.bf16.mxu1 %vm1282_vm0, %v1281_v34 }
  0x6b   :  { %1169 = vmatmul.mubr.msk.bf16.gmra.mxu0 %vm516_vm1, %v1278_v7 }
  0x6c   :  { %1185 = vmatmul.mubr.msk.bf16.gmra.mxu1 %vm516_vm1, %v1279_v8  ;;  %1172 = vmatprep.mubr.msk.bf16.mxu0 %vm1282_vm0, %v1281_v34 }
  0x73   :  { %1173 = vmatmul.mubr.msk.bf16.gmra.mxu0 %vm516_vm1, %v1280_v9 }
  0xe3   :  { %v1041_v10 = vpop.f32.mrf.mxu0 }
  0xe4   :  { %v1099_v11 = vpop.f32.mrf.mxu1 }
  0xe5   :  { %v1042_v12 = vpop.f32.mrf.mxu0 }
  0xe6   :  { %v1100_v13 = vpop.f32.mrf.mxu1  ;;  %v1043_v59 = vadd.f32 %v1042_v12, %v1041_v10 }
  0xe7   :  { %v1044_v14 = vpop.f32.mrf.mxu0  ;;  %v1101_v5 = vadd.f32 %v1100_v13, %v1099_v11 }
  0xe8   :  { %v1102_v15 = vpop.f32.mrf.mxu1  ;;  %v573_v4 = vadd.f32 %v1043_v59, %v1590_v61 }
  0xe9   :  { %v1045_v16 = vpop.f32.mrf.mxu0 }
  0xea   :  { %v1103_v17 = vpop.f32.mrf.mxu1  ;;  %v1046_v0 = vadd.f32 %v1045_v16, %v1044_v14  ;;  %v661_v16 = vadd.f32 %v1101_v5, %v573_v4 }
  0xeb   :  { %v1539_v18 = vpop.f32.mrf.mxu0  ;;  %v1104_v12 = vadd.f32 %v1103_v17, %v1102_v15 }
  0xec   :  { %v1541_v19 = vpop.f32.mrf.mxu1  ;;  %v576_v10 = vadd.f32 %v1046_v0, %v1590_v61 }
  0xed   :  { %v1048_v20 = vpop.f32.mrf.mxu0 }
  0xee   :  { %v1543_v21 = vpop.f32.mrf.mxu1  ;;  %v1049_v14 = vadd.f32 %v1048_v20, %v1539_v18 }
  0xef   :  { %v1545_v22 = vpop.f32.mrf.mxu0  ;;  %v1107_v18 = vadd.f32 %v1543_v21, %v1541_v19 }
  0xf0   :  { %v1547_v23 = vpop.f32.mrf.mxu1 }
  0xf1   :  { %v1549_v24 = vpop.f32.mrf.mxu0 }
  0xf2   :  { %v1551_v25 = vpop.f32.mrf.mxu1  ;;  %v1052_v13 = vadd.f32 %v1549_v24, %v1545_v22 }
  0xf3   :  { %v1553_v26 = vpop.f32.mrf.mxu0 }
  0xf4   :  { %v1555_v27 = vpop.f32.mrf.mxu1 }
  0xf5   :  { %v1557_v28 = vpop.f32.mrf.mxu0 }
  0xf6   :  { %v1559_v29 = vpop.f32.mrf.mxu1 }
  0xf7   :  { %v1561_v30 = vpop.f32.mrf.mxu0 }
  0xf8   :  { %v1563_v31 = vpop.f32.mrf.mxu1 }
  0xf9   :  { %v1565_v32 = vpop.f32.mrf.mxu0 }
  0xfa   :  { %v1567_v33 = vpop.f32.mrf.mxu1 }
  0xfb   :  { %v1569_v34 = vpop.f32.mrf.mxu0 }
  0xfc   :  { %v1571_v35 = vpop.f32.mrf.mxu1 }
  0xfd   :  { %v1573_v36 = vpop.f32.mrf.mxu0 }
  0xfe   :  { %v1575_v37 = vpop.f32.mrf.mxu1 }
  0xff   :  { %v1577_v38 = vpop.f32.mrf.mxu0 }
 0x100   :  { %v1579_v39 = vpop.f32.mrf.mxu1 }
 0x101   :  { %1654 = vst [vmem:[#allocation2_spill] sm:$0xff] %v1579_v39  ;;  %v1581_v40 = vpop.f32.mrf.mxu0 }
 0x102   :  { %v1583_v41 = vpop.f32.mrf.mxu1 }
 0x103   :  { %1655 = vst [vmem:[#allocation3_spill] sm:$0xff] %v1583_v41  ;;  %v1065_v42 = vpop.f32.mrf.mxu0 }
 0x104   :  { %v1123_v43 = vpop.f32.mrf.mxu1 }
 0x105   :  { %v1066_v44 = vpop.f32.mrf.mxu0 }
 0x106   :  { %v1124_v45 = vpop.f32.mrf.mxu1  ;;  %v1067_v62 = vadd.f32 %v1066_v44, %v1065_v42 }
 0x107   :  { %v1068_v46 = vpop.f32.mrf.mxu0  ;;  %v1125_v8 = vadd.f32 %v1124_v45, %v1123_v43 }
 0x108   :  { %v1126_v47 = vpop.f32.mrf.mxu1  ;;  %v605_v7 = vadd.f32 %v1067_v62, %v1590_v61  ;;  %v664_v62 = vadd.f32 %v1104_v12, %v576_v10 }
 0x109   :  { %v1069_v48 = vpop.f32.mrf.mxu0 }
 0x10a   :  { %v1127_v49 = vpop.f32.mrf.mxu1  ;;  %v1070_v2 = vadd.f32 %v1069_v48, %v1068_v46  ;;  %v693_v59 = vadd.f32 %v1125_v8, %v605_v7 }
 0x10b   :  { %v1071_v50 = vpop.f32.mrf.mxu0  ;;  %v1128_v42 = vadd.f32 %v1127_v49, %v1126_v47  ;;  %v581_v47 = vadd.f32 %v1049_v14, %v1590_v61 }
 0x10c   :  { %v1129_v51 = vpop.f32.mrf.mxu1  ;;  %v608_v39 = vadd.f32 %v1070_v2, %v1590_v61 }
 0x10d   :  { %v1072_v52 = vpop.f32.mrf.mxu0  ;;  %v669_v8 = vadd.f32 %v1107_v18, %v581_v47 }
 0x10e   :  { %v1130_v53 = vpop.f32.mrf.mxu1  ;;  %v1073_v48 = vadd.f32 %v1072_v52, %v1071_v50  ;;  %v1110_v50 = vadd.f32 %v1551_v25, %v1547_v23  ;;  %v1055_v23 = vadd.f32 %v1557_v28, %v1553_v26 }
 0x10f   :  { %v1074_v54 = vpop.f32.mrf.mxu0  ;;  %v1131_v22 = vadd.f32 %v1130_v53, %v1129_v51 }
 0x110   :  { %v1132_v55 = vpop.f32.mrf.mxu1  ;;  %v613_v52 = vadd.f32 %v1073_v48, %v1590_v61 }
 0x111   :  { %v1075_v56 = vpop.f32.mrf.mxu0 }
 0x112   :  { %v1133_v57 = vpop.f32.mrf.mxu1  ;;  %v1076_v0 = vadd.f32 %v1075_v56, %v1074_v54  ;;  %v584_v54 = vadd.f32 %v1052_v13, %v1590_v61 }
 0x113   :  { %v1077_v58 = vpop.f32.mrf.mxu0  ;;  %v1134_v56 = vadd.f32 %v1133_v57, %v1132_v55  ;;  %v1058_v55 = vadd.f32 %v1565_v32, %v1561_v30  ;;  %v589_v30 = vadd.f32 %v1055_v23, %v1590_v61  ;;  %v1113_v32 = vadd.f32 %v1559_v29, %v1555_v27 }
 0x114   :  { %v1585_v60 = vpop.f32.mrf.mxu1  ;;  %v616_v5 = vadd.f32 %v1076_v0, %v1590_v61 }
 0x115   :  { %v1078_v63 = vpop.f32.mrf.mxu0  ;;  %v677_v29 = vadd.f32 %v1113_v32, %v589_v30 }
 0x116   :  { %v1136_v1 = vpop.f32.mrf.mxu1 }
 0x117   :  { %v1080_v3 = vpop.f32.mrf.mxu0  ;;  %v1137_v26 = vadd.f32 %v1136_v1, %v1585_v60  ;;  %v1116_v60 = vadd.f32 %v1567_v33, %v1563_v31 }
 0x118   :  { %v1138_v6 = vpop.f32.mrf.mxu1 }
 0x119   :  { %v1081_v9 = vpop.f32.mrf.mxu0  ;;  %v1079_v6 = vadd.f32 %v1078_v63, %v1077_v58  ;;  %v672_v63 = vadd.f32 %v1110_v50, %v584_v54  ;;  %v1656_v54 = vld [vmem:[#allocation2_spill] sm:$0xff] }
 0x11a   :  { %v1139_v41 = vpop.f32.mrf.mxu1  ;;  %v701_v9 = vadd.f32 %v1131_v22, %v613_v52  ;;  %v1119_v52 = vadd.f32 %v1575_v37, %v1571_v35 }
 0x11b   :  { %v748_v44 = vpop.f32.mrf.mxu0  ;;  %v696_v41 = vadd.f32 %v1128_v42, %v608_v39  ;;  %v621_v12 = vadd.f32 %v1079_v6, %v1590_v61 }
 0x11c   :  { %v780_v46 = vpop.f32.mrf.mxu1  ;;  %v749_v43 = vadd.f32 %v748_v44, %v661_v16  ;;  %v704_v44 = vadd.f32 %v1134_v56, %v616_v5  ;;  %v1657_v56 = vld [vmem:[#allocation3_spill] sm:$0xff] }
 0x11d   :  { %v1162_v11 = vpop.f32.mrf.mxu0  ;;  %v781_v15 = vadd.f32 %v780_v46, %v693_v59  ;;  %v592_v59 = vadd.f32 %v1058_v55, %v1590_v61  ;;  %v709_v0 = vadd.f32 %v1137_v26, %v621_v12 }
 0x11e   :  { %v1178_v45 = vpop.f32.mrf.mxu1  ;;  %v802_v3 = vmax.f32 %v749_v43, 0.0 }
 0x11f   :  { %v751_v17 = vpop.f32.mrf.mxu0  ;;  %v810_v19 = vmax.f32 %v781_v15, 0.0  ;;  %v1061_v15 = vadd.f32 %v1573_v36, %v1569_v34  ;;  %v680_v33 = vadd.f32 %v1116_v60, %v592_v59 }
 0x120   :  { %v752_v20 = vadd.f32 %v751_v17, %v664_v62  ;;  %v783_v49 = vpop.f32.mrf.mxu1 }
 0x121   :  { %v784_v24 = vadd.f32 %v783_v49, %v696_v41  ;;  %v1163_v2 = vpop.f32.mrf.mxu0  ;;  %v597_v50 = vadd.f32 %v1061_v15, %v1590_v61 }
 0x122   :  { %v803_v39 = vmax.f32 %v752_v20, 0.0  ;;  %v1179_v4 = vpop.f32.mrf.mxu1  ;;  %v1064_v20 = vadd.f32 %v1581_v40, %v1577_v38 }
 0x123   :  { %v811_v21 = vmax.f32 %v784_v24, 0.0  ;;  %v756_v7 = vpop.f32.mrf.mxu0 }
 0x124   :  { %v993_v25 = vpack.c.bf16 %v803_v39, %v802_v3  ;;  %v788_v51 = vpop.f32.mrf.mxu1  ;;  %v757_v57 = vadd.f32 %v756_v7, %v669_v8  ;;  %v600_v2 = vadd.f32 %v1064_v20, %v1590_v61  ;;  %v1122_v3 = vadd.f32 %v1657_v56, %v1656_v54 }
 0x125   :  { %v1013_v53 = vpack.c.bf16 %v811_v21, %v810_v19  ;;  %v1166_v10 = vpop.f32.mrf.mxu0  ;;  %v789_v28 = vadd.f32 %v788_v51, %v701_v9  ;;  %v685_v21 = vadd.f32 %v1119_v52, %v597_v50 }
 0x126   :  { %994 = vst [vmem:[%s1653_s3] sm:$0xff] %v993_v25   ;;  %v1182_v58 = vpop.f32.mrf.mxu1  ;;  %v804_v1 = vmax.f32 %v757_v57, 0.0  ;;  %v688_v61 = vadd.f32 %v1122_v3, %v600_v2 }
 0x127   :  { %1023 = vst [vmem:[%s1653_s3 + $0x20] sm:$0xff] %v1013_v53   ;;  %v759_v42 = vpop.f32.mrf.mxu0  ;;  %v812_v43 = vmax.f32 %v789_v28, 0.0 }
 0x128   :  { %v760_v14 = vadd.f32 %v759_v42, %v672_v63  ;;  %v791_v16 = vpop.f32.mrf.mxu1 }
 0x129   :  { %v792_v46 = vadd.f32 %v791_v16, %v704_v44  ;;  %v1167_v48 = vpop.f32.mrf.mxu0 }
 0x12a   :  { %v805_v11 = vmax.f32 %v760_v14, 0.0  ;;  %v1183_v13 = vpop.f32.mrf.mxu1 }
 0x12b   :  { %v813_v45 = vmax.f32 %v792_v46, 0.0  ;;  %v764_v62 = vpop.f32.mrf.mxu0 }
 0x12c   :  { %v998_v27 = vpack.c.bf16 %v805_v11, %v804_v1  ;;  %v796_v17 = vpop.f32.mrf.mxu1  ;;  %v765_v31 = vadd.f32 %v764_v62, %v677_v29 }
 0x12d   :  { %v1018_v41 = vpack.c.bf16 %v813_v45, %v812_v43  ;;  %v797_v47 = vadd.f32 %v796_v17, %v709_v0  ;;  %v1170_v18 = vpop.f32.mrf.mxu0 }
 0x12e   :  { %1020 = vst [vmem:[%s1653_s3 + $0x8] sm:$0xff] %v998_v27   ;;  %v1186_v49 = vpop.f32.mrf.mxu1  ;;  %v806_v39 = vmax.f32 %v765_v31, 0.0 }
 0x12f   :  { %1024 = vst [vmem:[%s1653_s3 + $0x28] sm:$0xff] %v1018_v41   ;;  %v814_v34 = vmax.f32 %v797_v47, 0.0  ;;  %v767_v36 = vpop.f32.mrf.mxu0 }
 0x130   :  { %v768_v22 = vadd.f32 %v767_v36, %v680_v33  ;;  %v799_v38 = vpop.f32.mrf.mxu1 }
 0x131   :  { %v989_v40 = vpack.c.bf16 %v814_v34, %v814_v34  ;;  %v1171_v24 = vpop.f32.mrf.mxu0 }
 0x132   :  { %v807_v4 = vmax.f32 %v768_v22, 0.0  ;;  %v1187_v5 = vpop.f32.mrf.mxu1 }
 0x133   :  { %880 = vst [vmem:[%s1653_s3 + $0x30] sm:$0xf] %v989_v40  ;;  %v772_v6 = vpop.f32.mrf.mxu0 }
 0x134   :  { %v1003_v19 = vpack.c.bf16 %v807_v4, %v806_v39  ;;  %v773_v37 = vadd.f32 %v772_v6, %v685_v21 }
 0x135   :  { %v1174_v35 = vpop.f32.mrf.mxu0 }
 0x136   :  { %1021 = vst [vmem:[%s1653_s3 + $0x10] sm:$0xff] %v1003_v19   ;;  %v808_v8 = vmax.f32 %v773_v37, 0.0 }
 0x137   :  { %v775_v7 = vpop.f32.mrf.mxu0 }
 0x138   :  { %v776_v23 = vadd.f32 %v775_v7, %v688_v61 }
 0x139   :  { %v1175_v25 = vpop.f32.mrf.mxu0 }
 0x13a   :  { %v809_v51 = vmax.f32 %v776_v23, 0.0 }
 0x13c   :  { %v1008_v53 = vpack.c.bf16 %v809_v51, %v808_v8 }
 0x13e   :  { %1022 = vst [vmem:[%s1653_s3 + $0x18] sm:$0xff] %v1008_v53  }

// kernel: actor_forward.7
= control target key start
LH: loop header
LB: loop body
LE: loop exit
PB: predicated region body
PF: predicated region fallthrough
CT: control target
= control target key end

     0   :  { %vm4847_vm0 = vcmask 523264   ;;  %s11163_s1 = inlined_call_operand.vmem [shape: bf16[3136,512], index: 1, kind: input, shape index: {}]   ;;  %s11164_s0 = inlined_call_operand.vmem [shape: bf16[8,3136], index: 0, kind: input, shape index: {}]   ;;  %s11165_s2 = inlined_call_operand.vmem [shape: f32[1,512], index: 2, kind: input, shape index: {}]   ;;  %s11166_s3 = inlined_call_operand.vmem [shape: bf16[512,128], index: 3, kind: input, shape index: {}]   ;;  %s11167_s4 = inlined_call_operand.vmem [shape: f32[1,128], index: 4, kind: input, shape index: {}]   ;;  %s11168_s5 = inlined_call_operand.vmem [shape: f32[8,128], index: 5, kind: output, shape index: {}]  }
   0x1   :  { %v7175_v0 = vld [vmem:[%s11163_s1 + $0xe4] ss:$16 sps:$4 sm:$0xff]   ;;  %v7179_v2 = vld [vmem:[%s11163_s1 + $0xe0] ss:$16 sps:$4 sm:$0xff]   ;;  %v22_v48 = vld [vmem:[%s11164_s0 + $0x8] sm:$0xff] }
   0x2   :  { %v7177_v1 = vld [vmem:[%s11163_s1 + $0x2e4] ss:$16 sps:$4 sm:$0xff]   ;;  %4851 = vmatprep.subr.bf16.mxu0 %v7175_v0  ;;  %v7180_v3 = vld [vmem:[%s11163_s1 + $0x2e0] ss:$16 sps:$4 sm:$0xff]   ;;  %v8597_v51 = vcombine.high %v22_v48, %v22_v48 }
   0x3   :  { %4892 = vmatprep.subr.bf16.mxu1 %v7177_v1  ;;  %v7181_v4 = vld [vmem:[%s11163_s1 + $0xc4] ss:$16 sps:$4 sm:$0xff]   ;;  %4852 = vmatpush1.bf16.msra.mxu0 %v7179_v2  ;;  %v7185_v6 = vld [vmem:[%s11163_s1 + $0xc0] ss:$16 sps:$4 sm:$0xff]  }
   0x4   :  { %4893 = vmatpush1.bf16.msra.mxu1 %v7180_v3  ;;  %v7183_v5 = vld [vmem:[%s11163_s1 + $0x2c4] ss:$16 sps:$4 sm:$0xff]   ;;  %4853 = vmatprep.subr.bf16.mxu0 %v7181_v4  ;;  %v7186_v7 = vld [vmem:[%s11163_s1 + $0x2c0] ss:$16 sps:$4 sm:$0xff]  }
   0x5   :  { %4894 = vmatprep.subr.bf16.mxu1 %v7183_v5  ;;  %v7187_v8 = vld [vmem:[%s11163_s1 + $0xa4] ss:$16 sps:$4 sm:$0xff]   ;;  %v7191_v10 = vld [vmem:[%s11163_s1 + $0xa0] ss:$16 sps:$4 sm:$0xff]   ;;  %4924 = vmatprep.mubr.bf16.mxu1 %v8597_v51 }
   0x6   :  { %v7189_v9 = vld [vmem:[%s11163_s1 + $0x2a4] ss:$16 sps:$4 sm:$0xff]   ;;  %v7192_v11 = vld [vmem:[%s11163_s1 + $0x2a0] ss:$16 sps:$4 sm:$0xff]  }
   0x7   :  { %4854 = vmatpush1.bf16.msra.mxu0 %v7185_v6  ;;  %v7193_v12 = vld [vmem:[%s11163_s1 + $0x84] ss:$16 sps:$4 sm:$0xff]   ;;  %v7197_v14 = vld [vmem:[%s11163_s1 + $0x80] ss:$16 sps:$4 sm:$0xff]  }
   0x8   :  { %4895 = vmatpush1.bf16.msra.mxu1 %v7186_v7  ;;  %4855 = vmatprep.subr.bf16.mxu0 %v7187_v8  ;;  %v7195_v13 = vld [vmem:[%s11163_s1 + $0x284] ss:$16 sps:$4 sm:$0xff]   ;;  %v7198_v15 = vld [vmem:[%s11163_s1 + $0x280] ss:$16 sps:$4 sm:$0xff]   ;;  %v8657_v7 = vcombine.low %v22_v48, %v22_v48 }
   0x9   :  { %4896 = vmatprep.subr.bf16.mxu1 %v7189_v9  ;;  %v7199_v16 = vld [vmem:[%s11163_s1 + $0x64] ss:$16 sps:$4 sm:$0xff]   ;;  %v7203_v18 = vld [vmem:[%s11163_s1 + $0x60] ss:$16 sps:$4 sm:$0xff]  }
   0xa   :  { %v7201_v17 = vld [vmem:[%s11163_s1 + $0x264] ss:$16 sps:$4 sm:$0xff]   ;;  %v7204_v19 = vld [vmem:[%s11163_s1 + $0x260] ss:$16 sps:$4 sm:$0xff]  }
   0xb   :  { %4856 = vmatpush1.bf16.msra.mxu0 %v7191_v10  ;;  %v7205_v20 = vld [vmem:[%s11163_s1 + $0x44] ss:$16 sps:$4 sm:$0xff]   ;;  %v7209_v22 = vld [vmem:[%s11163_s1 + $0x40] ss:$16 sps:$4 sm:$0xff]  }
   0xc   :  { %4897 = vmatpush1.bf16.msra.mxu1 %v7192_v11  ;;  %4857 = vmatprep.subr.bf16.mxu0 %v7193_v12  ;;  %v7207_v21 = vld [vmem:[%s11163_s1 + $0x244] ss:$16 sps:$4 sm:$0xff]   ;;  %v7210_v23 = vld [vmem:[%s11163_s1 + $0x240] ss:$16 sps:$4 sm:$0xff]  }
   0xd   :  { %4898 = vmatprep.subr.bf16.mxu1 %v7195_v13  ;;  %v7211_v24 = vld [vmem:[%s11163_s1 + $0x24] ss:$16 sps:$4 sm:$0xff]   ;;  %v7215_v26 = vld [vmem:[%s11163_s1 + $0x20] ss:$16 sps:$4 sm:$0xff]  }
   0xe   :  { %v7213_v25 = vld [vmem:[%s11163_s1 + $0x224] ss:$16 sps:$4 sm:$0xff]   ;;  %v7216_v27 = vld [vmem:[%s11163_s1 + $0x220] ss:$16 sps:$4 sm:$0xff]  }
   0xf   :  { %4858 = vmatpush1.bf16.msra.mxu0 %v7197_v14  ;;  %v7217_v28 = vld [vmem:[%s11163_s1 + $0x4] ss:$16 sps:$4 sm:$0xff]   ;;  %v7221_v30 = vld [vmem:[%s11163_s1] ss:$16 sps:$4 sm:$0xff]  }
  0x10   :  { %4899 = vmatpush1.bf16.msra.mxu1 %v7198_v15  ;;  %4859 = vmatprep.subr.bf16.mxu0 %v7199_v16  ;;  %v7219_v29 = vld [vmem:[%s11163_s1 + $0x204] ss:$16 sps:$4 sm:$0xff]   ;;  %v7222_v31 = vld [vmem:[%s11163_s1 + $0x200] ss:$16 sps:$4 sm:$0xff]  }
  0x11   :  { %4900 = vmatprep.subr.bf16.mxu1 %v7201_v17  ;;  %v7223_v32 = vld [vmem:[%s11163_s1 + $0x1e4] ss:$16 sps:$4 sm:$0xff]   ;;  %v7227_v34 = vld [vmem:[%s11163_s1 + $0x1e0] ss:$16 sps:$4 sm:$0xff]  }
  0x12   :  { %v7225_v33 = vld [vmem:[%s11163_s1 + $0x3e4] ss:$16 sps:$4 sm:$0xff]   ;;  %v7228_v35 = vld [vmem:[%s11163_s1 + $0x3e0] ss:$16 sps:$4 sm:$0xff]  }
  0x13   :  { %4860 = vmatpush1.bf16.msra.mxu0 %v7203_v18  ;;  %v7229_v36 = vld [vmem:[%s11163_s1 + $0x1c4] ss:$16 sps:$4 sm:$0xff]   ;;  %v7233_v38 = vld [vmem:[%s11163_s1 + $0x1c0] ss:$16 sps:$4 sm:$0xff]  }
  0x14   :  { %4901 = vmatpush1.bf16.msra.mxu1 %v7204_v19  ;;  %4861 = vmatprep.subr.bf16.mxu0 %v7205_v20  ;;  %v7231_v37 = vld [vmem:[%s11163_s1 + $0x3c4] ss:$16 sps:$4 sm:$0xff]   ;;  %v7234_v39 = vld [vmem:[%s11163_s1 + $0x3c0] ss:$16 sps:$4 sm:$0xff]  }
  0x15   :  { %4902 = vmatprep.subr.bf16.mxu1 %v7207_v21  ;;  %v7235_v40 = vld [vmem:[%s11163_s1 + $0x1a4] ss:$16 sps:$4 sm:$0xff]   ;;  %v7239_v42 = vld [vmem:[%s11163_s1 + $0x1a0] ss:$16 sps:$4 sm:$0xff]  }
  0x16   :  { %v7237_v41 = vld [vmem:[%s11163_s1 + $0x3a4] ss:$16 sps:$4 sm:$0xff]   ;;  %v7240_v43 = vld [vmem:[%s11163_s1 + $0x3a0] ss:$16 sps:$4 sm:$0xff]  }
  0x17   :  { %4862 = vmatpush1.bf16.msra.mxu0 %v7209_v22  ;;  %v7241_v44 = vld [vmem:[%s11163_s1 + $0x184] ss:$16 sps:$4 sm:$0xff]   ;;  %v7245_v49 = vld [vmem:[%s11163_s1 + $0x180] ss:$16 sps:$4 sm:$0xff]  }
  0x18   :  { %4903 = vmatpush1.bf16.msra.mxu1 %v7210_v23  ;;  %4863 = vmatprep.subr.bf16.mxu0 %v7211_v24  ;;  %v7243_v45 = vld [vmem:[%s11163_s1 + $0x384] ss:$16 sps:$4 sm:$0xff]   ;;  %v7246_v50 = vld [vmem:[%s11163_s1 + $0x380] ss:$16 sps:$4 sm:$0xff]  }
  0x19   :  { %4904 = vmatprep.subr.bf16.mxu1 %v7213_v25  ;;  %v21_v46 = vld [vmem:[%s11164_s0] sm:$0xff] }
  0x1a   :  { %v8586_v47 = vcombine.high %v21_v46, %v21_v46  ;;  %v7247_v52 = vld [vmem:[%s11163_s1 + $0x164] ss:$16 sps:$4 sm:$0xff]   ;;  %v7251_v54 = vld [vmem:[%s11163_s1 + $0x160] ss:$16 sps:$4 sm:$0xff]   ;;  %v8655_v6 = vcombine.low %v21_v46, %v21_v46 }
  0x1b   :  { %4864 = vmatpush1.bf16.msra.mxu0 %v7215_v26  ;;  %v7249_v53 = vld [vmem:[%s11163_s1 + $0x364] ss:$16 sps:$4 sm:$0xff]   ;;  %v7252_v55 = vld [vmem:[%s11163_s1 + $0x360] ss:$16 sps:$4 sm:$0xff]  }
  0x1c   :  { %4905 = vmatpush1.bf16.msra.mxu1 %v7216_v27  ;;  %4865 = vmatprep.subr.bf16.mxu0 %v7217_v28  ;;  %v7253_v56 = vld [vmem:[%s11163_s1 + $0x144] ss:$16 sps:$4 sm:$0xff]   ;;  %v7257_v58 = vld [vmem:[%s11163_s1 + $0x140] ss:$16 sps:$4 sm:$0xff]  }
  0x1d   :  { %4906 = vmatprep.subr.bf16.mxu1 %v7219_v29  ;;  %4883 = vmatprep.mubr.bf16.mxu0 %v8586_v47  ;;  %v7255_v57 = vld [vmem:[%s11163_s1 + $0x344] ss:$16 sps:$4 sm:$0xff]   ;;  %v7258_v59 = vld [vmem:[%s11163_s1 + $0x340] ss:$16 sps:$4 sm:$0xff]  }
  0x1e   :  { %v7259_v60 = vld [vmem:[%s11163_s1 + $0x124] ss:$16 sps:$4 sm:$0xff]   ;;  %v7263_v62 = vld [vmem:[%s11163_s1 + $0x120] ss:$16 sps:$4 sm:$0xff]  }
  0x1f   :  { %4866 = vmatpush1.bf16.msra.mxu0 %v7221_v30  ;;  %v7261_v61 = vld [vmem:[%s11163_s1 + $0x324] ss:$16 sps:$4 sm:$0xff]   ;;  %v7264_v63 = vld [vmem:[%s11163_s1 + $0x320] ss:$16 sps:$4 sm:$0xff]  }
  0x20   :  { %4907 = vmatpush1.bf16.msra.mxu1 %v7222_v31  ;;  %4867 = vmatprep.subr.bf16.mxu0 %v7223_v32  ;;  %v7265_v0 = vld [vmem:[%s11163_s1 + $0x104] ss:$16 sps:$4 sm:$0xff]   ;;  %v7269_v2 = vld [vmem:[%s11163_s1 + $0x100] ss:$16 sps:$4 sm:$0xff]  }
  0x21   :  { %4908 = vmatprep.subr.bf16.mxu1 %v7225_v33  ;;  %v7267_v1 = vld [vmem:[%s11163_s1 + $0x304] ss:$16 sps:$4 sm:$0xff]   ;;  %v7270_v3 = vld [vmem:[%s11163_s1 + $0x300] ss:$16 sps:$4 sm:$0xff]   ;;  %v8741_v33 = vld [vmem:[%s11164_s0 + $0x18] sm:$0xff] }
  0x22   :  { %v7277_v4 = vld [vmem:[%s11163_s1 + $0x4e4] ss:$16 sps:$4 sm:$0xff]   ;;  %v7275_v8 = vld [vmem:[%s11163_s1 + $0x4e0] ss:$16 sps:$4 sm:$0xff]  }
  0x23   :  { %4868 = vmatpush2.bf16.msra.mxu0 %v7227_v34  ;;  %v7280_v5 = vld [vmem:[%s11163_s1 + $0x6e4] ss:$16 sps:$4 sm:$0xff]   ;;  %v7278_v9 = vld [vmem:[%s11163_s1 + $0x6e0] ss:$16 sps:$4 sm:$0xff]  }
  0x24   :  { %4909 = vmatpush2.bf16.msra.mxu1 %v7228_v35  ;;  %4869 = vmatprep.subr.bf16.mxu0 %v7229_v36  ;;  %v7283_v10 = vld [vmem:[%s11163_s1 + $0x4c4] ss:$16 sps:$4 sm:$0xff]   ;;  %v7281_v12 = vld [vmem:[%s11163_s1 + $0x4c0] ss:$16 sps:$4 sm:$0xff]  }
  0x25   :  { %4910 = vmatprep.subr.bf16.mxu1 %v7231_v37  ;;  %v7286_v11 = vld [vmem:[%s11163_s1 + $0x6c4] ss:$16 sps:$4 sm:$0xff]   ;;  %v7284_v13 = vld [vmem:[%s11163_s1 + $0x6c0] ss:$16 sps:$4 sm:$0xff]   ;;  %v8755_v37 = vcombine.high %v8741_v33, %v8741_v33 }
  0x26   :  { %v7289_v14 = vld [vmem:[%s11163_s1 + $0x4a4] ss:$16 sps:$4 sm:$0xff]   ;;  %v7287_v16 = vld [vmem:[%s11163_s1 + $0x4a0] ss:$16 sps:$4 sm:$0xff]  }
  0x27   :  { %4870 = vmatpush2.bf16.msra.mxu0 %v7233_v38  ;;  %v7292_v15 = vld [vmem:[%s11163_s1 + $0x6a4] ss:$16 sps:$4 sm:$0xff]   ;;  %v7290_v17 = vld [vmem:[%s11163_s1 + $0x6a0] ss:$16 sps:$4 sm:$0xff]  }
  0x28   :  { %4911 = vmatpush2.bf16.msra.mxu1 %v7234_v39  ;;  %4871 = vmatprep.subr.bf16.mxu0 %v7235_v40  ;;  %v7295_v18 = vld [vmem:[%s11163_s1 + $0x484] ss:$16 sps:$4 sm:$0xff]   ;;  %v7293_v20 = vld [vmem:[%s11163_s1 + $0x480] ss:$16 sps:$4 sm:$0xff]  }
  0x29   :  { %4912 = vmatprep.subr.bf16.mxu1 %v7237_v41  ;;  %v7298_v19 = vld [vmem:[%s11163_s1 + $0x684] ss:$16 sps:$4 sm:$0xff]   ;;  %v7296_v21 = vld [vmem:[%s11163_s1 + $0x680] ss:$16 sps:$4 sm:$0xff]  }
  0x2a   :  { %v7301_v22 = vld [vmem:[%s11163_s1 + $0x464] ss:$16 sps:$4 sm:$0xff]   ;;  %v7299_v24 = vld [vmem:[%s11163_s1 + $0x460] ss:$16 sps:$4 sm:$0xff]  }
  0x2b   :  { %4872 = vmatpush2.bf16.msra.mxu0 %v7239_v42  ;;  %v7304_v23 = vld [vmem:[%s11163_s1 + $0x664] ss:$16 sps:$4 sm:$0xff]   ;;  %v7302_v25 = vld [vmem:[%s11163_s1 + $0x660] ss:$16 sps:$4 sm:$0xff]  }
  0x2c   :  { %4913 = vmatpush2.bf16.msra.mxu1 %v7240_v43  ;;  %4873 = vmatprep.subr.bf16.mxu0 %v7241_v44  ;;  %v7307_v26 = vld [vmem:[%s11163_s1 + $0x444] ss:$16 sps:$4 sm:$0xff]   ;;  %v7305_v28 = vld [vmem:[%s11163_s1 + $0x440] ss:$16 sps:$4 sm:$0xff]  }
  0x2d   :  { %4914 = vmatprep.subr.bf16.mxu1 %v7243_v45  ;;  %v7310_v27 = vld [vmem:[%s11163_s1 + $0x644] ss:$16 sps:$4 sm:$0xff]   ;;  %v7308_v29 = vld [vmem:[%s11163_s1 + $0x640] ss:$16 sps:$4 sm:$0xff]  }
  0x2e   :  { %v7313_v30 = vld [vmem:[%s11163_s1 + $0x424] ss:$16 sps:$4 sm:$0xff]   ;;  %v7311_v34 = vld [vmem:[%s11163_s1 + $0x420] ss:$16 sps:$4 sm:$0xff]  }
  0x2f   :  { %4874 = vmatpush2.bf16.msra.mxu0 %v7245_v49  ;;  %v7316_v31 = vld [vmem:[%s11163_s1 + $0x624] ss:$16 sps:$4 sm:$0xff]   ;;  %v7314_v35 = vld [vmem:[%s11163_s1 + $0x620] ss:$16 sps:$4 sm:$0xff]  }
  0x30   :  { %4915 = vmatpush2.bf16.msra.mxu1 %v7246_v50  ;;  %4875 = vmatprep.subr.bf16.mxu0 %v7247_v52  ;;  %v8736_v32 = vld [vmem:[%s11164_s0 + $0x10] sm:$0xff] }
  0x31   :  { %4916 = vmatprep.subr.bf16.mxu1 %v7249_v53  ;;  %v8751_v36 = vcombine.high %v8736_v32, %v8736_v32  ;;  %v7319_v38 = vld [vmem:[%s11163_s1 + $0x404] ss:$16 sps:$4 sm:$0xff]   ;;  %v7317_v40 = vld [vmem:[%s11163_s1 + $0x400] ss:$16 sps:$4 sm:$0xff]  }
  0x32   :  { %v7322_v39 = vld [vmem:[%s11163_s1 + $0x604] ss:$16 sps:$4 sm:$0xff]   ;;  %v7320_v41 = vld [vmem:[%s11163_s1 + $0x600] ss:$16 sps:$4 sm:$0xff]  }
  0x33   :  { %4876 = vmatpush2.bf16.msra.mxu0 %v7251_v54  ;;  %v7325_v42 = vld [vmem:[%s11163_s1 + $0x5e4] ss:$16 sps:$4 sm:$0xff]   ;;  %v7323_v44 = vld [vmem:[%s11163_s1 + $0x5e0] ss:$16 sps:$4 sm:$0xff]  }
  0x34   :  { %4917 = vmatpush2.bf16.msra.mxu1 %v7252_v55  ;;  %4877 = vmatprep.subr.bf16.mxu0 %v7253_v56  ;;  %v7328_v43 = vld [vmem:[%s11163_s1 + $0x7e4] ss:$16 sps:$4 sm:$0xff]   ;;  %v7326_v45 = vld [vmem:[%s11163_s1 + $0x7e0] ss:$16 sps:$4 sm:$0xff]  }
  0x35   :  { %4918 = vmatprep.subr.bf16.mxu1 %v7255_v57  ;;  %v7331_v46 = vld [vmem:[%s11163_s1 + $0x5c4] ss:$16 sps:$4 sm:$0xff]   ;;  %v7329_v49 = vld [vmem:[%s11163_s1 + $0x5c0] ss:$16 sps:$4 sm:$0xff]  }
  0x36   :  { %v7334_v48 = vld [vmem:[%s11163_s1 + $0x7c4] ss:$16 sps:$4 sm:$0xff]   ;;  %v7332_v50 = vld [vmem:[%s11163_s1 + $0x7c0] ss:$16 sps:$4 sm:$0xff]  }
  0x37   :  { %4878 = vmatpush2.bf16.msra.mxu0 %v7257_v58  ;;  %v7337_v52 = vld [vmem:[%s11163_s1 + $0x5a4] ss:$16 sps:$4 sm:$0xff]   ;;  %v7335_v54 = vld [vmem:[%s11163_s1 + $0x5a0] ss:$16 sps:$4 sm:$0xff]  }
  0x38   :  { %4919 = vmatpush2.bf16.msra.mxu1 %v7258_v59  ;;  %4879 = vmatprep.subr.bf16.mxu0 %v7259_v60  ;;  %v7340_v53 = vld [vmem:[%s11163_s1 + $0x7a4] ss:$16 sps:$4 sm:$0xff]   ;;  %v7338_v55 = vld [vmem:[%s11163_s1 + $0x7a0] ss:$16 sps:$4 sm:$0xff]  }
  0x39   :  { %4920 = vmatprep.subr.bf16.mxu1 %v7261_v61  ;;  %v7343_v56 = vld [vmem:[%s11163_s1 + $0x584] ss:$16 sps:$4 sm:$0xff]   ;;  %v7341_v58 = vld [vmem:[%s11163_s1 + $0x580] ss:$16 sps:$4 sm:$0xff]  }
  0x3a   :  { %v7346_v57 = vld [vmem:[%s11163_s1 + $0x784] ss:$16 sps:$4 sm:$0xff]   ;;  %v7344_v59 = vld [vmem:[%s11163_s1 + $0x780] ss:$16 sps:$4 sm:$0xff]  }
  0x3b   :  { %4880 = vmatpush2.bf16.msra.mxu0 %v7263_v62  ;;  %v7349_v60 = vld [vmem:[%s11163_s1 + $0x564] ss:$16 sps:$4 sm:$0xff]   ;;  %v7347_v62 = vld [vmem:[%s11163_s1 + $0x560] ss:$16 sps:$4 sm:$0xff]  }
  0x3c   :  { %4921 = vmatpush2.bf16.msra.mxu1 %v7264_v63  ;;  %4881 = vmatprep.subr.bf16.mxu0 %v7265_v0  ;;  %v7352_v61 = vld [vmem:[%s11163_s1 + $0x764] ss:$16 sps:$4 sm:$0xff]   ;;  %v7350_v63 = vld [vmem:[%s11163_s1 + $0x760] ss:$16 sps:$4 sm:$0xff]  }
  0x3d   :  { %4922 = vmatprep.subr.bf16.mxu1 %v7267_v1  ;;  %v7355_v0 = vld [vmem:[%s11163_s1 + $0x544] ss:$16 sps:$4 sm:$0xff]  }
  0x3e   :  { %v7358_v1 = vld [vmem:[%s11163_s1 + $0x744] ss:$16 sps:$4 sm:$0xff]  }
  0x3f   :  { %4882 = vmatpush2.bf16.msra.mxu0 %v7269_v2  ;;  %v7353_v2 = vld [vmem:[%s11163_s1 + $0x540] ss:$16 sps:$4 sm:$0xff]  }
  0x40   :  { %4923 = vmatpush2.bf16.msra.mxu1 %v7270_v3  ;;  %4933 = vmatprep.subr.bf16.mxu0 %v7277_v4  ;;  %v7356_v3 = vld [vmem:[%s11163_s1 + $0x740] ss:$16 sps:$4 sm:$0xff]   ;;  %v7361_v4 = vld [vmem:[%s11163_s1 + $0x524] ss:$16 sps:$4 sm:$0xff]  }
  0x41   :  { %4974 = vmatprep.subr.bf16.mxu1 %v7280_v5  ;;  %v7364_v5 = vld [vmem:[%s11163_s1 + $0x724] ss:$16 sps:$4 sm:$0xff]  }
  0x42   :  { %4884 = vmatmul.mubr.bf16.vlgmr.msra.gmra.mxu0 %v8655_v6 }
  0x43   :  { %4925 = vmatmul.mubr.bf16.vlgmr.msra.gmra.mxu1 %v8657_v7  ;;  %4934 = vmatpush1.bf16.msra.mxu0 %v7275_v8  ;;  %v7359_v8 = vld [vmem:[%s11163_s1 + $0x520] ss:$16 sps:$4 sm:$0xff]  }
  0x44   :  { %4975 = vmatpush1.bf16.msra.mxu1 %v7278_v9  ;;  %4935 = vmatprep.subr.bf16.mxu0 %v7283_v10  ;;  %v7362_v9 = vld [vmem:[%s11163_s1 + $0x720] ss:$16 sps:$4 sm:$0xff]   ;;  %v7367_v10 = vld [vmem:[%s11163_s1 + $0x504] ss:$16 sps:$4 sm:$0xff]  }
  0x45   :  { %4976 = vmatprep.subr.bf16.mxu1 %v7286_v11  ;;  %4965 = vmatprep.mubr.bf16.mxu0 %v8751_v36  ;;  %v7370_v11 = vld [vmem:[%s11163_s1 + $0x704] ss:$16 sps:$4 sm:$0xff]  }
  0x46   :  { %5006 = vmatprep.mubr.bf16.mxu1 %v8755_v37 }
  0x47   :  { %4936 = vmatpush1.bf16.msra.mxu0 %v7281_v12  ;;  %v7365_v12 = vld [vmem:[%s11163_s1 + $0x500] ss:$16 sps:$4 sm:$0xff]  }
  0x48   :  { %4977 = vmatpush1.bf16.msra.mxu1 %v7284_v13  ;;  %4937 = vmatprep.subr.bf16.mxu0 %v7289_v14  ;;  %v7368_v13 = vld [vmem:[%s11163_s1 + $0x700] ss:$16 sps:$4 sm:$0xff]   ;;  %v7377_v14 = vld [vmem:[%s11163_s1 + $0x8e4] ss:$16 sps:$4 sm:$0xff]  }
  0x49   :  { %4978 = vmatprep.subr.bf16.mxu1 %v7292_v15  ;;  %v7380_v15 = vld [vmem:[%s11163_s1 + $0xae4] ss:$16 sps:$4 sm:$0xff]  }
  0x4b   :  { %4938 = vmatpush1.bf16.msra.mxu0 %v7287_v16  ;;  %v8875_v16 = vcombine.low %v8736_v32, %v8736_v32  ;;  %v7395_v32 = vld [vmem:[%s11163_s1 + $0x884] ss:$16 sps:$4 sm:$0xff]  }
  0x4c   :  { %4979 = vmatpush1.bf16.msra.mxu1 %v7290_v17  ;;  %4939 = vmatprep.subr.bf16.mxu0 %v7295_v18  ;;  %v8879_v17 = vcombine.low %v8741_v33, %v8741_v33  ;;  %v7375_v18 = vld [vmem:[%s11163_s1 + $0x8e0] ss:$16 sps:$4 sm:$0xff]   ;;  %v7398_v33 = vld [vmem:[%s11163_s1 + $0xa84] ss:$16 sps:$4 sm:$0xff]  }
  0x4d   :  { %4980 = vmatprep.subr.bf16.mxu1 %v7298_v19  ;;  %v7378_v19 = vld [vmem:[%s11163_s1 + $0xae0] ss:$16 sps:$4 sm:$0xff]  }
  0x4f   :  { %4940 = vmatpush1.bf16.msra.mxu0 %v7293_v20  ;;  %v7383_v20 = vld [vmem:[%s11163_s1 + $0x8c4] ss:$16 sps:$4 sm:$0xff]  }
  0x50   :  { %4981 = vmatpush1.bf16.msra.mxu1 %v7296_v21  ;;  %4941 = vmatprep.subr.bf16.mxu0 %v7301_v22  ;;  %v7386_v21 = vld [vmem:[%s11163_s1 + $0xac4] ss:$16 sps:$4 sm:$0xff]  }
  0x51   :  { %4982 = vmatprep.subr.bf16.mxu1 %v7304_v23  ;;  %v8896_v22 = vld [vmem:[%s11164_s0 + $0x20] sm:$0xff]  ;;  %v8901_v23 = vld [vmem:[%s11164_s0 + $0x28] sm:$0xff] }
  0x53   :  { %4942 = vmatpush1.bf16.msra.mxu0 %v7299_v24  ;;  %v8905_v24 = vcombine.high %v8896_v22, %v8896_v22 }
  0x54   :  { %4983 = vmatpush1.bf16.msra.mxu1 %v7302_v25  ;;  %4943 = vmatprep.subr.bf16.mxu0 %v7307_v26  ;;  %v8909_v25 = vcombine.high %v8901_v23, %v8901_v23  ;;  %v7381_v26 = vld [vmem:[%s11163_s1 + $0x8c0] ss:$16 sps:$4 sm:$0xff]  }
  0x55   :  { %4984 = vmatprep.subr.bf16.mxu1 %v7310_v27  ;;  %v7384_v27 = vld [vmem:[%s11163_s1 + $0xac0] ss:$16 sps:$4 sm:$0xff]  }
  0x57   :  { %4944 = vmatpush1.bf16.msra.mxu0 %v7305_v28  ;;  %v7389_v28 = vld [vmem:[%s11163_s1 + $0x8a4] ss:$16 sps:$4 sm:$0xff]  }
  0x58   :  { %4985 = vmatpush1.bf16.msra.mxu1 %v7308_v29  ;;  %4945 = vmatprep.subr.bf16.mxu0 %v7313_v30  ;;  %v7392_v29 = vld [vmem:[%s11163_s1 + $0xaa4] ss:$16 sps:$4 sm:$0xff]   ;;  %v7387_v30 = vld [vmem:[%s11163_s1 + $0x8a0] ss:$16 sps:$4 sm:$0xff]  }
  0x59   :  { %4986 = vmatprep.subr.bf16.mxu1 %v7316_v31  ;;  %v7390_v31 = vld [vmem:[%s11163_s1 + $0xaa0] ss:$16 sps:$4 sm:$0xff]  }
  0x5b   :  { %4946 = vmatpush1.bf16.msra.mxu0 %v7311_v34  ;;  %v7393_v34 = vld [vmem:[%s11163_s1 + $0x880] ss:$16 sps:$4 sm:$0xff]  }
  0x5c   :  { %4987 = vmatpush1.bf16.msra.mxu1 %v7314_v35  ;;  %4947 = vmatprep.subr.bf16.mxu0 %v7319_v38  ;;  %v7396_v35 = vld [vmem:[%s11163_s1 + $0xa80] ss:$16 sps:$4 sm:$0xff]   ;;  %v7401_v38 = vld [vmem:[%s11163_s1 + $0x864] ss:$16 sps:$4 sm:$0xff]  }
  0x5d   :  { %4988 = vmatprep.subr.bf16.mxu1 %v7322_v39  ;;  %v7404_v39 = vld [vmem:[%s11163_s1 + $0xa64] ss:$16 sps:$4 sm:$0xff]  }
  0x5f   :  { %4948 = vmatpush1.bf16.msra.mxu0 %v7317_v40  ;;  %v7399_v40 = vld [vmem:[%s11163_s1 + $0x860] ss:$16 sps:$4 sm:$0xff]  }
  0x60   :  { %4989 = vmatpush1.bf16.msra.mxu1 %v7320_v41  ;;  %4949 = vmatprep.subr.bf16.mxu0 %v7325_v42  ;;  %v7402_v41 = vld [vmem:[%s11163_s1 + $0xa60] ss:$16 sps:$4 sm:$0xff]   ;;  %v7407_v42 = vld [vmem:[%s11163_s1 + $0x844] ss:$16 sps:$4 sm:$0xff]  }
  0x61   :  { %4990 = vmatprep.subr.bf16.mxu1 %v7328_v43  ;;  %v7410_v43 = vld [vmem:[%s11163_s1 + $0xa44] ss:$16 sps:$4 sm:$0xff]  }
  0x63   :  { %4950 = vmatpush2.bf16.msra.mxu0 %v7323_v44  ;;  %v7405_v44 = vld [vmem:[%s11163_s1 + $0x840] ss:$16 sps:$4 sm:$0xff]  }
  0x64   :  { %4991 = vmatpush2.bf16.msra.mxu1 %v7326_v45  ;;  %4951 = vmatprep.subr.bf16.mxu0 %v7331_v46  ;;  %v7408_v45 = vld [vmem:[%s11163_s1 + $0xa40] ss:$16 sps:$4 sm:$0xff]   ;;  %v7413_v46 = vld [vmem:[%s11163_s1 + $0x824] ss:$16 sps:$4 sm:$0xff]  }
  0x65   :  { %4992 = vmatprep.subr.bf16.mxu1 %v7334_v48  ;;  %v7416_v48 = vld [vmem:[%s11163_s1 + $0xa24] ss:$16 sps:$4 sm:$0xff]  }
  0x67   :  { %4952 = vmatpush2.bf16.msra.mxu0 %v7329_v49  ;;  %v7411_v49 = vld [vmem:[%s11163_s1 + $0x820] ss:$16 sps:$4 sm:$0xff]  }
  0x68   :  { %4993 = vmatpush2.bf16.msra.mxu1 %v7332_v50  ;;  %4953 = vmatprep.subr.bf16.mxu0 %v7337_v52  ;;  %v7414_v50 = vld [vmem:[%s11163_s1 + $0xa20] ss:$16 sps:$4 sm:$0xff]   ;;  %v7419_v52 = vld [vmem:[%s11163_s1 + $0x804] ss:$16 sps:$4 sm:$0xff]  }
  0x69   :  { %4994 = vmatprep.subr.bf16.mxu1 %v7340_v53  ;;  %v7422_v53 = vld [vmem:[%s11163_s1 + $0xa04] ss:$16 sps:$4 sm:$0xff]  }
  0x6b   :  { %4954 = vmatpush2.bf16.msra.mxu0 %v7335_v54  ;;  %v7417_v54 = vld [vmem:[%s11163_s1 + $0x800] ss:$16 sps:$4 sm:$0xff]  }
  0x6c   :  { %4995 = vmatpush2.bf16.msra.mxu1 %v7338_v55  ;;  %4955 = vmatprep.subr.bf16.mxu0 %v7343_v56  ;;  %v7420_v55 = vld [vmem:[%s11163_s1 + $0xa00] ss:$16 sps:$4 sm:$0xff]   ;;  %v7425_v56 = vld [vmem:[%s11163_s1 + $0x9e4] ss:$16 sps:$4 sm:$0xff]  }
  0x6d   :  { %4996 = vmatprep.subr.bf16.mxu1 %v7346_v57  ;;  %v7428_v57 = vld [vmem:[%s11163_s1 + $0xbe4] ss:$16 sps:$4 sm:$0xff]  }
  0x6f   :  { %4956 = vmatpush2.bf16.msra.mxu0 %v7341_v58  ;;  %v7423_v58 = vld [vmem:[%s11163_s1 + $0x9e0] ss:$16 sps:$4 sm:$0xff]  }
  0x70   :  { %4997 = vmatpush2.bf16.msra.mxu1 %v7344_v59  ;;  %4957 = vmatprep.subr.bf16.mxu0 %v7349_v60  ;;  %v7426_v59 = vld [vmem:[%s11163_s1 + $0xbe0] ss:$16 sps:$4 sm:$0xff]   ;;  %v7431_v60 = vld [vmem:[%s11163_s1 + $0x9c4] ss:$16 sps:$4 sm:$0xff]  }
  0x71   :  { %4998 = vmatprep.subr.bf16.mxu1 %v7352_v61  ;;  %v7434_v61 = vld [vmem:[%s11163_s1 + $0xbc4] ss:$16 sps:$4 sm:$0xff]  }
  0x73   :  { %4958 = vmatpush2.bf16.msra.mxu0 %v7347_v62  ;;  %v7429_v62 = vld [vmem:[%s11163_s1 + $0x9c0] ss:$16 sps:$4 sm:$0xff]  }
  0x74   :  { %4999 = vmatpush2.bf16.msra.mxu1 %v7350_v63  ;;  %4959 = vmatprep.subr.bf16.mxu0 %v7355_v0  ;;  %v7432_v63 = vld [vmem:[%s11163_s1 + $0xbc0] ss:$16 sps:$4 sm:$0xff]   ;;  %v7437_v0 = vld [vmem:[%s11163_s1 + $0x9a4] ss:$16 sps:$4 sm:$0xff]  }
  0x75   :  { %5000 = vmatprep.subr.bf16.mxu1 %v7358_v1  ;;  %v7440_v1 = vld [vmem:[%s11163_s1 + $0xba4] ss:$16 sps:$4 sm:$0xff]  }
  0x77   :  { %4960 = vmatpush2.bf16.msra.mxu0 %v7353_v2  ;;  %v7435_v2 = vld [vmem:[%s11163_s1 + $0x9a0] ss:$16 sps:$4 sm:$0xff]  }
  0x78   :  { %5001 = vmatpush2.bf16.msra.mxu1 %v7356_v3  ;;  %4961 = vmatprep.subr.bf16.mxu0 %v7361_v4  ;;  %v7438_v3 = vld [vmem:[%s11163_s1 + $0xba0] ss:$16 sps:$4 sm:$0xff]   ;;  %v7443_v4 = vld [vmem:[%s11163_s1 + $0x984] ss:$16 sps:$4 sm:$0xff]  }
  0x79   :  { %5002 = vmatprep.subr.bf16.mxu1 %v7364_v5  ;;  %v7446_v5 = vld [vmem:[%s11163_s1 + $0xb84] ss:$16 sps:$4 sm:$0xff]  }
  0x7b   :  { %4962 = vmatpush2.bf16.msra.mxu0 %v7359_v8  ;;  %v7441_v8 = vld [vmem:[%s11163_s1 + $0x980] ss:$16 sps:$4 sm:$0xff]  }
  0x7c   :  { %5003 = vmatpush2.bf16.msra.mxu1 %v7362_v9  ;;  %4963 = vmatprep.subr.bf16.mxu0 %v7367_v10  ;;  %v7444_v9 = vld [vmem:[%s11163_s1 + $0xb80] ss:$16 sps:$4 sm:$0xff]   ;;  %v7449_v10 = vld [vmem:[%s11163_s1 + $0x964] ss:$16 sps:$4 sm:$0xff]  }
  0x7d   :  { %5004 = vmatprep.subr.bf16.mxu1 %v7370_v11  ;;  %v7452_v11 = vld [vmem:[%s11163_s1 + $0xb64] ss:$16 sps:$4 sm:$0xff]  }
  0x7f   :  { %4964 = vmatpush2.bf16.msra.mxu0 %v7365_v12  ;;  %v7447_v12 = vld [vmem:[%s11163_s1 + $0x960] ss:$16 sps:$4 sm:$0xff]  }
  0x80   :  { %5005 = vmatpush2.bf16.msra.mxu1 %v7368_v13  ;;  %5015 = vmatprep.subr.bf16.mxu0 %v7377_v14  ;;  %v7450_v13 = vld [vmem:[%s11163_s1 + $0xb60] ss:$16 sps:$4 sm:$0xff]   ;;  %v7455_v14 = vld [vmem:[%s11163_s1 + $0x944] ss:$16 sps:$4 sm:$0xff]  }
  0x81   :  { %5056 = vmatprep.subr.bf16.mxu1 %v7380_v15  ;;  %v7458_v15 = vld [vmem:[%s11163_s1 + $0xb44] ss:$16 sps:$4 sm:$0xff]  }
  0x82   :  { %4966 = vmatmul.mubr.bf16.vlgmr.msra.gmra.mxu0 %v8875_v16 }
  0x83   :  { %5007 = vmatmul.mubr.bf16.vlgmr.msra.gmra.mxu1 %v8879_v17  ;;  %5016 = vmatpush1.bf16.msra.mxu0 %v7375_v18  ;;  %v7453_v18 = vld [vmem:[%s11163_s1 + $0x940] ss:$16 sps:$4 sm:$0xff]  }
  0x84   :  { %5057 = vmatpush1.bf16.msra.mxu1 %v7378_v19  ;;  %5017 = vmatprep.subr.bf16.mxu0 %v7383_v20  ;;  %v7456_v19 = vld [vmem:[%s11163_s1 + $0xb40] ss:$16 sps:$4 sm:$0xff]   ;;  %v7461_v20 = vld [vmem:[%s11163_s1 + $0x924] ss:$16 sps:$4 sm:$0xff]  }
  0x85   :  { %5058 = vmatprep.subr.bf16.mxu1 %v7386_v21  ;;  %5047 = vmatprep.mubr.bf16.mxu0 %v8905_v24  ;;  %v7464_v21 = vld [vmem:[%s11163_s1 + $0xb24] ss:$16 sps:$4 sm:$0xff]  }
  0x86   :  { %5088 = vmatprep.mubr.bf16.mxu1 %v8909_v25 }
  0x87   :  { %5018 = vmatpush1.bf16.msra.mxu0 %v7381_v26  ;;  %v7459_v26 = vld [vmem:[%s11163_s1 + $0x920] ss:$16 sps:$4 sm:$0xff]  }
  0x88   :  { %5059 = vmatpush1.bf16.msra.mxu1 %v7384_v27  ;;  %5019 = vmatprep.subr.bf16.mxu0 %v7389_v28  ;;  %v7462_v27 = vld [vmem:[%s11163_s1 + $0xb20] ss:$16 sps:$4 sm:$0xff]   ;;  %v7467_v28 = vld [vmem:[%s11163_s1 + $0x904] ss:$16 sps:$4 sm:$0xff]  }
  0x89   :  { %5060 = vmatprep.subr.bf16.mxu1 %v7392_v29  ;;  %v7470_v29 = vld [vmem:[%s11163_s1 + $0xb04] ss:$16 sps:$4 sm:$0xff]  }
  0x8b   :  { %5020 = vmatpush1.bf16.msra.mxu0 %v7387_v30  ;;  %v7465_v30 = vld [vmem:[%s11163_s1 + $0x900] ss:$16 sps:$4 sm:$0xff]  }
  0x8c   :  { %5061 = vmatpush1.bf16.msra.mxu1 %v7390_v31  ;;  %5021 = vmatprep.subr.bf16.mxu0 %v7395_v32  ;;  %v7468_v31 = vld [vmem:[%s11163_s1 + $0xb00] ss:$16 sps:$4 sm:$0xff]   ;;  %v7477_v32 = vld [vmem:[%s11163_s1 + $0xce4] ss:$16 sps:$4 sm:$0xff]  }
  0x8d   :  { %5062 = vmatprep.subr.bf16.mxu1 %v7398_v33  ;;  %v7480_v33 = vld [vmem:[%s11163_s1 + $0xee4] ss:$16 sps:$4 sm:$0xff]  }
  0x8f   :  { %5022 = vmatpush1.bf16.msra.mxu0 %v7393_v34  ;;  %v7475_v34 = vld [vmem:[%s11163_s1 + $0xce0] ss:$16 sps:$4 sm:$0xff]  }
  0x90   :  { %5063 = vmatpush1.bf16.msra.mxu1 %v7396_v35  ;;  %5023 = vmatprep.subr.bf16.mxu0 %v7401_v38  ;;  %v9101_v35 = vld [vmem:[%s11164_s0 + $0x30] sm:$0xff]  ;;  %v9105_v38 = vcombine.low %v8896_v22, %v8896_v22 }
  0x91   :  { %5064 = vmatprep.subr.bf16.mxu1 %v7404_v39  ;;  %v9109_v39 = vcombine.low %v8901_v23, %v8901_v23  ;;  %v7483_v22 = vld [vmem:[%s11163_s1 + $0xcc4] ss:$16 sps:$4 sm:$0xff]  }
  0x92   :  { %v7486_v23 = vld [vmem:[%s11163_s1 + $0xec4] ss:$16 sps:$4 sm:$0xff]  }
  0x93   :  { %5024 = vmatpush1.bf16.msra.mxu0 %v7399_v40  ;;  %v9114_v40 = vld [vmem:[%s11164_s0 + $0x38] sm:$0xff] }
  0x94   :  { %5065 = vmatpush1.bf16.msra.mxu1 %v7402_v41  ;;  %5025 = vmatprep.subr.bf16.mxu0 %v7407_v42  ;;  %v7478_v41 = vld [vmem:[%s11163_s1 + $0xee0] ss:$16 sps:$4 sm:$0xff]   ;;  %v9127_v42 = vcombine.high %v9101_v35, %v9101_v35 }
  0x95   :  { %5066 = vmatprep.subr.bf16.mxu1 %v7410_v43  ;;  %v9131_v43 = vcombine.high %v9114_v40, %v9114_v40 }
  0x97   :  { %5026 = vmatpush1.bf16.msra.mxu0 %v7405_v44  ;;  %v7481_v44 = vld [vmem:[%s11163_s1 + $0xcc0] ss:$16 sps:$4 sm:$0xff]  }
  0x98   :  { %5067 = vmatpush1.bf16.msra.mxu1 %v7408_v45  ;;  %5027 = vmatprep.subr.bf16.mxu0 %v7413_v46  ;;  %v7484_v45 = vld [vmem:[%s11163_s1 + $0xec0] ss:$16 sps:$4 sm:$0xff]   ;;  %v7489_v46 = vld [vmem:[%s11163_s1 + $0xca4] ss:$16 sps:$4 sm:$0xff]  }
  0x99   :  { %5068 = vmatprep.subr.bf16.mxu1 %v7416_v48  ;;  %v7492_v48 = vld [vmem:[%s11163_s1 + $0xea4] ss:$16 sps:$4 sm:$0xff]  }
  0x9b   :  { %5028 = vmatpush1.bf16.msra.mxu0 %v7411_v49  ;;  %v7487_v49 = vld [vmem:[%s11163_s1 + $0xca0] ss:$16 sps:$4 sm:$0xff]  }
  0x9c   :  { %5069 = vmatpush1.bf16.msra.mxu1 %v7414_v50  ;;  %5029 = vmatprep.subr.bf16.mxu0 %v7419_v52  ;;  %v7490_v50 = vld [vmem:[%s11163_s1 + $0xea0] ss:$16 sps:$4 sm:$0xff]   ;;  %v7495_v52 = vld [vmem:[%s11163_s1 + $0xc84] ss:$16 sps:$4 sm:$0xff]  }
  0x9d   :  { %5070 = vmatprep.subr.bf16.mxu1 %v7422_v53  ;;  %v7498_v53 = vld [vmem:[%s11163_s1 + $0xe84] ss:$16 sps:$4 sm:$0xff]  }
  0x9f   :  { %5030 = vmatpush1.bf16.msra.mxu0 %v7417_v54  ;;  %v7493_v54 = vld [vmem:[%s11163_s1 + $0xc80] ss:$16 sps:$4 sm:$0xff]  }
  0xa0   :  { %5071 = vmatpush1.bf16.msra.mxu1 %v7420_v55  ;;  %5031 = vmatprep.subr.bf16.mxu0 %v7425_v56  ;;  %v7496_v55 = vld [vmem:[%s11163_s1 + $0xe80] ss:$16 sps:$4 sm:$0xff]   ;;  %v7501_v56 = vld [vmem:[%s11163_s1 + $0xc64] ss:$16 sps:$4 sm:$0xff]  }
  0xa1   :  { %5072 = vmatprep.subr.bf16.mxu1 %v7428_v57  ;;  %v7504_v57 = vld [vmem:[%s11163_s1 + $0xe64] ss:$16 sps:$4 sm:$0xff]  }
  0xa3   :  { %5032 = vmatpush2.bf16.msra.mxu0 %v7423_v58  ;;  %v7499_v58 = vld [vmem:[%s11163_s1 + $0xc60] ss:$16 sps:$4 sm:$0xff]  }
  0xa4   :  { %5073 = vmatpush2.bf16.msra.mxu1 %v7426_v59  ;;  %5033 = vmatprep.subr.bf16.mxu0 %v7431_v60  ;;  %v7502_v59 = vld [vmem:[%s11163_s1 + $0xe60] ss:$16 sps:$4 sm:$0xff]   ;;  %v7507_v60 = vld [vmem:[%s11163_s1 + $0xc44] ss:$16 sps:$4 sm:$0xff]  }
  0xa5   :  { %5074 = vmatprep.subr.bf16.mxu1 %v7434_v61  ;;  %v7510_v61 = vld [vmem:[%s11163_s1 + $0xe44] ss:$16 sps:$4 sm:$0xff]  }
  0xa7   :  { %5034 = vmatpush2.bf16.msra.mxu0 %v7429_v62  ;;  %v7505_v62 = vld [vmem:[%s11163_s1 + $0xc40] ss:$16 sps:$4 sm:$0xff]  }
  0xa8   :  { %5075 = vmatpush2.bf16.msra.mxu1 %v7432_v63  ;;  %5035 = vmatprep.subr.bf16.mxu0 %v7437_v0  ;;  %v7508_v63 = vld [vmem:[%s11163_s1 + $0xe40] ss:$16 sps:$4 sm:$0xff]   ;;  %v7513_v0 = vld [vmem:[%s11163_s1 + $0xc24] ss:$16 sps:$4 sm:$0xff]  }
  0xa9   :  { %5076 = vmatprep.subr.bf16.mxu1 %v7440_v1  ;;  %v7516_v1 = vld [vmem:[%s11163_s1 + $0xe24] ss:$16 sps:$4 sm:$0xff]  }
  0xab   :  { %5036 = vmatpush2.bf16.msra.mxu0 %v7435_v2  ;;  %v7511_v2 = vld [vmem:[%s11163_s1 + $0xc20] ss:$16 sps:$4 sm:$0xff]  }
  0xac   :  { %5077 = vmatpush2.bf16.msra.mxu1 %v7438_v3  ;;  %5037 = vmatprep.subr.bf16.mxu0 %v7443_v4  ;;  %v7514_v3 = vld [vmem:[%s11163_s1 + $0xe20] ss:$16 sps:$4 sm:$0xff]   ;;  %v7519_v4 = vld [vmem:[%s11163_s1 + $0xc04] ss:$16 sps:$4 sm:$0xff]  }
  0xad   :  { %5078 = vmatprep.subr.bf16.mxu1 %v7446_v5  ;;  %v7522_v5 = vld [vmem:[%s11163_s1 + $0xe04] ss:$16 sps:$4 sm:$0xff]  }
  0xaf   :  { %5038 = vmatpush2.bf16.msra.mxu0 %v7441_v8  ;;  %v7517_v8 = vld [vmem:[%s11163_s1 + $0xc00] ss:$16 sps:$4 sm:$0xff]  }
  0xb0   :  { %5079 = vmatpush2.bf16.msra.mxu1 %v7444_v9  ;;  %5039 = vmatprep.subr.bf16.mxu0 %v7449_v10  ;;  %v7520_v9 = vld [vmem:[%s11163_s1 + $0xe00] ss:$16 sps:$4 sm:$0xff]   ;;  %v7525_v10 = vld [vmem:[%s11163_s1 + $0xde4] ss:$16 sps:$4 sm:$0xff]  }
  0xb1   :  { %5080 = vmatprep.subr.bf16.mxu1 %v7452_v11  ;;  %v7528_v11 = vld [vmem:[%s11163_s1 + $0xfe4] ss:$16 sps:$4 sm:$0xff]  }
  0xb3   :  { %5040 = vmatpush2.bf16.msra.mxu0 %v7447_v12  ;;  %v7523_v12 = vld [vmem:[%s11163_s1 + $0xde0] ss:$16 sps:$4 sm:$0xff]  }
  0xb4   :  { %5081 = vmatpush2.bf16.msra.mxu1 %v7450_v13  ;;  %5041 = vmatprep.subr.bf16.mxu0 %v7455_v14  ;;  %v7526_v13 = vld [vmem:[%s11163_s1 + $0xfe0] ss:$16 sps:$4 sm:$0xff]   ;;  %v7531_v14 = vld [vmem:[%s11163_s1 + $0xdc4] ss:$16 sps:$4 sm:$0xff]  }
  0xb5   :  { %5082 = vmatprep.subr.bf16.mxu1 %v7458_v15  ;;  %v7534_v15 = vld [vmem:[%s11163_s1 + $0xfc4] ss:$16 sps:$4 sm:$0xff]  }
  0xb7   :  { %5042 = vmatpush2.bf16.msra.mxu0 %v7453_v18  ;;  %v7529_v18 = vld [vmem:[%s11163_s1 + $0xdc0] ss:$16 sps:$4 sm:$0xff]  }
  0xb8   :  { %5083 = vmatpush2.bf16.msra.mxu1 %v7456_v19  ;;  %5043 = vmatprep.subr.bf16.mxu0 %v7461_v20  ;;  %v7532_v19 = vld [vmem:[%s11163_s1 + $0xfc0] ss:$16 sps:$4 sm:$0xff]   ;;  %v7537_v20 = vld [vmem:[%s11163_s1 + $0xda4] ss:$16 sps:$4 sm:$0xff]  }
  0xb9   :  { %5084 = vmatprep.subr.bf16.mxu1 %v7464_v21  ;;  %v7540_v21 = vld [vmem:[%s11163_s1 + $0xfa4] ss:$16 sps:$4 sm:$0xff]  }
  0xbb   :  { %5044 = vmatpush2.bf16.msra.mxu0 %v7459_v26  ;;  %v7535_v26 = vld [vmem:[%s11163_s1 + $0xda0] ss:$16 sps:$4 sm:$0xff]  }
  0xbc   :  { %5085 = vmatpush2.bf16.msra.mxu1 %v7462_v27  ;;  %5045 = vmatprep.subr.bf16.mxu0 %v7467_v28  ;;  %v7538_v27 = vld [vmem:[%s11163_s1 + $0xfa0] ss:$16 sps:$4 sm:$0xff]   ;;  %v7543_v28 = vld [vmem:[%s11163_s1 + $0xd84] ss:$16 sps:$4 sm:$0xff]  }
  0xbd   :  { %5086 = vmatprep.subr.bf16.mxu1 %v7470_v29  ;;  %v7546_v29 = vld [vmem:[%s11163_s1 + $0xf84] ss:$16 sps:$4 sm:$0xff]  }
  0xbf   :  { %5046 = vmatpush2.bf16.msra.mxu0 %v7465_v30  ;;  %v7541_v30 = vld [vmem:[%s11163_s1 + $0xd80] ss:$16 sps:$4 sm:$0xff]  }
  0xc0   :  { %5087 = vmatpush2.bf16.msra.mxu1 %v7468_v31  ;;  %5097 = vmatprep.subr.bf16.mxu0 %v7477_v32  ;;  %v7544_v31 = vld [vmem:[%s11163_s1 + $0xf80] ss:$16 sps:$4 sm:$0xff]   ;;  %v7549_v32 = vld [vmem:[%s11163_s1 + $0xd64] ss:$16 sps:$4 sm:$0xff]  }
  0xc1   :  { %5138 = vmatprep.subr.bf16.mxu1 %v7480_v33  ;;  %v7552_v33 = vld [vmem:[%s11163_s1 + $0xf64] ss:$16 sps:$4 sm:$0xff]  }
  0xc2   :  { %5048 = vmatmul.mubr.bf16.vlgmr.msra.gmra.mxu0 %v9105_v38 }
  0xc3   :  { %5089 = vmatmul.mubr.bf16.vlgmr.msra.gmra.mxu1 %v9109_v39  ;;  %5098 = vmatpush1.bf16.msra.mxu0 %v7475_v34  ;;  %v7547_v34 = vld [vmem:[%s11163_s1 + $0xd60] ss:$16 sps:$4 sm:$0xff]  }
  0xc4   :  { %5139 = vmatpush1.bf16.msra.mxu1 %v7478_v41  ;;  %5099 = vmatprep.subr.bf16.mxu0 %v7483_v22  ;;  %v7550_v41 = vld [vmem:[%s11163_s1 + $0xf60] ss:$16 sps:$4 sm:$0xff]   ;;  %v7555_v22 = vld [vmem:[%s11163_s1 + $0xd44] ss:$16 sps:$4 sm:$0xff]  }
  0xc5   :  { %5140 = vmatprep.subr.bf16.mxu1 %v7486_v23  ;;  %5129 = vmatprep.mubr.bf16.mxu0 %v9127_v42  ;;  %v7558_v23 = vld [vmem:[%s11163_s1 + $0xf44] ss:$16 sps:$4 sm:$0xff]  }
  0xc6   :  { %5170 = vmatprep.mubr.bf16.mxu1 %v9131_v43 }
  0xc7   :  { %5100 = vmatpush1.bf16.msra.mxu0 %v7481_v44  ;;  %v7553_v44 = vld [vmem:[%s11163_s1 + $0xd40] ss:$16 sps:$4 sm:$0xff]  }
  0xc8   :  { %5141 = vmatpush1.bf16.msra.mxu1 %v7484_v45  ;;  %5101 = vmatprep.subr.bf16.mxu0 %v7489_v46  ;;  %v7556_v45 = vld [vmem:[%s11163_s1 + $0xf40] ss:$16 sps:$4 sm:$0xff]   ;;  %v7561_v46 = vld [vmem:[%s11163_s1 + $0xd24] ss:$16 sps:$4 sm:$0xff]  }
  0xc9   :  { %5142 = vmatprep.subr.bf16.mxu1 %v7492_v48  ;;  %v820_v48 = vlaneseq }
  0xcb   :  { %5102 = vmatpush1.bf16.msra.mxu0 %v7487_v49  ;;  %v7564_v49 = vld [vmem:[%s11163_s1 + $0xf24] ss:$16 sps:$4 sm:$0xff]  }
  0xcc   :  { %5143 = vmatpush1.bf16.msra.mxu1 %v7490_v50  ;;  %5103 = vmatprep.subr.bf16.mxu0 %v7495_v52  ;;  %v7559_v50 = vld [vmem:[%s11163_s1 + $0xd20] ss:$16 sps:$4 sm:$0xff]  }
  0xcd   :  { %5144 = vmatprep.subr.bf16.mxu1 %v7498_v53  ;;  %v7562_v52 = vld [vmem:[%s11163_s1 + $0xf20] ss:$16 sps:$4 sm:$0xff]   ;;  %v7567_v53 = vld [vmem:[%s11163_s1 + $0xd04] ss:$16 sps:$4 sm:$0xff]  }
  0xcf   :  { %5104 = vmatpush1.bf16.msra.mxu0 %v7493_v54  ;;  %v9303_v54 = vshrl.u32 %v820_v48, 7 }
  0xd0   :  { %5145 = vmatpush1.bf16.msra.mxu1 %v7496_v55  ;;  %5105 = vmatprep.subr.bf16.mxu0 %v7501_v56  ;;  %v7570_v55 = vld [vmem:[%s11163_s1 + $0xf04] ss:$16 sps:$4 sm:$0xff]   ;;  %v7565_v56 = vld [vmem:[%s11163_s1 + $0xd00] ss:$16 sps:$4 sm:$0xff]  }
  0xd1   :  { %5146 = vmatprep.subr.bf16.mxu1 %v7504_v57  ;;  %v7568_v57 = vld [vmem:[%s11163_s1 + $0xf00] ss:$16 sps:$4 sm:$0xff]  }
  0xd3   :  { %5106 = vmatpush1.bf16.msra.mxu0 %v7499_v58  ;;  %v818_v58 = vld [vmem:[%s11165_s2] sm:$0xf] }
  0xd4   :  { %5147 = vmatpush1.bf16.msra.mxu1 %v7502_v59  ;;  %5107 = vmatprep.subr.bf16.mxu0 %v7507_v60  ;;  %v822_v59 = vsub.s32 0, %v9303_v54  ;;  %v7577_v60 = vld [vmem:[%s11163_s1 + $0x10e4] ss:$16 sps:$4 sm:$0xff]  }
  0xd5   :  { %5148 = vmatprep.subr.bf16.mxu1 %v7510_v61  ;;  %v7580_v61 = vld [vmem:[%s11163_s1 + $0x12e4] ss:$16 sps:$4 sm:$0xff]  }
  0xd7   :  { %5108 = vmatpush1.bf16.msra.mxu0 %v7505_v62  ;;  %v7575_v62 = vld [vmem:[%s11163_s1 + $0x10e0] ss:$16 sps:$4 sm:$0xff]  }
  0xd8   :  { %5149 = vmatpush1.bf16.msra.mxu1 %v7508_v63  ;;  %5109 = vmatprep.subr.bf16.mxu0 %v7513_v0  ;;  %v826_v63 = vsub.s32 1, %v9303_v54  ;;  %v9330_v0 = vcombine.low %v9101_v35, %v9101_v35  ;;  %v7578_v35 = vld [vmem:[%s11163_s1 + $0x12e0] ss:$16 sps:$4 sm:$0xff]  }
  0xd9   :  { %5150 = vmatprep.subr.bf16.mxu1 %v7516_v1  ;;  %v9334_v1 = vcombine.low %v9114_v40, %v9114_v40  ;;  %v7583_v40 = vld [vmem:[%s11163_s1 + $0x10c4] ss:$16 sps:$4 sm:$0xff]  }
  0xdb   :  { %5110 = vmatpush1.bf16.msra.mxu0 %v7511_v2  ;;  %v9339_v2 = vld [vmem:[%s11164_s0 + $0x40] sm:$0xff] }
  0xdc   :  { %5151 = vmatpush1.bf16.msra.mxu1 %v7514_v3  ;;  %5111 = vmatprep.subr.bf16.mxu0 %v7519_v4  ;;  %v9344_v3 = vld [vmem:[%s11164_s0 + $0x48] sm:$0xff]  ;;  %v823_v4 = vrot.slane %v818_v58, %v822_v59  ;;  %v7611_v59 = vld [vmem:[%s11163_s1 + $0x1020] ss:$16 sps:$4 sm:$0xff]  }
  0xdd   :  { %5152 = vmatprep.subr.bf16.mxu1 %v7522_v5  ;;  %v7586_v5 = vld [vmem:[%s11163_s1 + $0x12c4] ss:$16 sps:$4 sm:$0xff]  }
  0xdf   :  { %5112 = vmatpush1.bf16.msra.mxu0 %v7517_v8  ;;  %v827_v8 = vrot.slane %v818_v58, %v826_v63  ;;  %v7616_v58 = vld [vmem:[%s11163_s1 + $0x1224] ss:$16 sps:$4 sm:$0xff]   ;;  %v7617_v63 = vld [vmem:[%s11163_s1 + $0x1000] ss:$16 sps:$4 sm:$0xff]  }
  0xe0   :  { %5153 = vmatpush1.bf16.msra.mxu1 %v7520_v9  ;;  %5113 = vmatprep.subr.bf16.mxu0 %v7525_v10  ;;  %v9357_v9 = vcombine.high %v9339_v2, %v9339_v2  ;;  %v9361_v10 = vcombine.high %v9344_v3, %v9344_v3 }
  0xe1   :  { %5154 = vmatprep.subr.bf16.mxu1 %v7528_v11 }
  0xe3   :  { %5114 = vmatpush2.bf16.msra.mxu0 %v7523_v12 }
  0xe4   :  { %5155 = vmatpush2.bf16.msra.mxu1 %v7526_v13  ;;  %5115 = vmatprep.subr.bf16.mxu0 %v7531_v14  ;;  %v7581_v13 = vld [vmem:[%s11163_s1 + $0x10c0] ss:$16 sps:$4 sm:$0xff]  }
  0xe5   :  { %5156 = vmatprep.subr.bf16.mxu1 %v7534_v15  ;;  %v7584_v15 = vld [vmem:[%s11163_s1 + $0x12c0] ss:$16 sps:$4 sm:$0xff]  }
  0xe7   :  { %5116 = vmatpush2.bf16.msra.mxu0 %v7529_v18 }
  0xe8   :  { %5157 = vmatpush2.bf16.msra.mxu1 %v7532_v19  ;;  %5117 = vmatprep.subr.bf16.mxu0 %v7537_v20  ;;  %v7589_v20 = vld [vmem:[%s11163_s1 + $0x10a4] ss:$16 sps:$4 sm:$0xff]  }
  0xe9   :  { %5158 = vmatprep.subr.bf16.mxu1 %v7540_v21  ;;  %v7592_v21 = vld [vmem:[%s11163_s1 + $0x12a4] ss:$16 sps:$4 sm:$0xff]  }
  0xeb   :  { %5118 = vmatpush2.bf16.msra.mxu0 %v7535_v26 }
  0xec   :  { %5159 = vmatpush2.bf16.msra.mxu1 %v7538_v27  ;;  %5119 = vmatprep.subr.bf16.mxu0 %v7543_v28 }
  0xed   :  { %5160 = vmatprep.subr.bf16.mxu1 %v7546_v29 }
  0xef   :  { %5120 = vmatpush2.bf16.msra.mxu0 %v7541_v30  ;;  %v7587_v30 = vld [vmem:[%s11163_s1 + $0x10a0] ss:$16 sps:$4 sm:$0xff]  }
  0xf0   :  { %5161 = vmatpush2.bf16.msra.mxu1 %v7544_v31  ;;  %5121 = vmatprep.subr.bf16.mxu0 %v7549_v32  ;;  %v7590_v32 = vld [vmem:[%s11163_s1 + $0x12a0] ss:$16 sps:$4 sm:$0xff]  }
  0xf1   :  { %5162 = vmatprep.subr.bf16.mxu1 %v7552_v33 }
  0xf3   :  { %5122 = vmatpush2.bf16.msra.mxu0 %v7547_v34 }
  0xf4   :  { %5163 = vmatpush2.bf16.msra.mxu1 %v7550_v41  ;;  %5123 = vmatprep.subr.bf16.mxu0 %v7555_v22  ;;  %v7595_v41 = vld [vmem:[%s11163_s1 + $0x1084] ss:$16 sps:$4 sm:$0xff]  }
  0xf5   :  { %5164 = vmatprep.subr.bf16.mxu1 %v7558_v23  ;;  %v7598_v22 = vld [vmem:[%s11163_s1 + $0x1284] ss:$16 sps:$4 sm:$0xff]   ;;  %v7593_v23 = vld [vmem:[%s11163_s1 + $0x1080] ss:$16 sps:$4 sm:$0xff]  }
  0xf7   :  { %5124 = vmatpush2.bf16.msra.mxu0 %v7553_v44  ;;  %v7596_v44 = vld [vmem:[%s11163_s1 + $0x1280] ss:$16 sps:$4 sm:$0xff]  }
  0xf8   :  { %5165 = vmatpush2.bf16.msra.mxu1 %v7556_v45  ;;  %5125 = vmatprep.subr.bf16.mxu0 %v7561_v46  ;;  %v7601_v45 = vld [vmem:[%s11163_s1 + $0x1064] ss:$16 sps:$4 sm:$0xff]  }
  0xf9   :  { %5166 = vmatprep.subr.bf16.mxu1 %v7564_v49  ;;  %v7604_v46 = vld [vmem:[%s11163_s1 + $0x1264] ss:$16 sps:$4 sm:$0xff]   ;;  %v7599_v49 = vld [vmem:[%s11163_s1 + $0x1060] ss:$16 sps:$4 sm:$0xff]  }
  0xfb   :  { %5126 = vmatpush2.bf16.msra.mxu0 %v7559_v50  ;;  %v7602_v50 = vld [vmem:[%s11163_s1 + $0x1260] ss:$16 sps:$4 sm:$0xff]  }
  0xfc   :  { %5167 = vmatpush2.bf16.msra.mxu1 %v7562_v52  ;;  %5127 = vmatprep.subr.bf16.mxu0 %v7567_v53  ;;  %v7607_v52 = vld [vmem:[%s11163_s1 + $0x1044] ss:$16 sps:$4 sm:$0xff]  }
  0xfd   :  { %5168 = vmatprep.subr.bf16.mxu1 %v7570_v55  ;;  %v7610_v53 = vld [vmem:[%s11163_s1 + $0x1244] ss:$16 sps:$4 sm:$0xff]   ;;  %v7605_v55 = vld [vmem:[%s11163_s1 + $0x1040] ss:$16 sps:$4 sm:$0xff]  }
  0xff   :  { %5128 = vmatpush2.bf16.msra.mxu0 %v7565_v56  ;;  %v7608_v56 = vld [vmem:[%s11163_s1 + $0x1240] ss:$16 sps:$4 sm:$0xff]  }
 0x100   :  { %5169 = vmatpush2.bf16.msra.mxu1 %v7568_v57  ;;  %5179 = vmatprep.subr.bf16.mxu0 %v7577_v60  ;;  %v7613_v57 = vld [vmem:[%s11163_s1 + $0x1024] ss:$16 sps:$4 sm:$0xff]   ;;  %v7614_v60 = vld [vmem:[%s11163_s1 + $0x1220] ss:$16 sps:$4 sm:$0xff]  }
 0x101   :  { %5220 = vmatprep.subr.bf16.mxu1 %v7580_v61  ;;  %v7619_v61 = vld [vmem:[%s11163_s1 + $0x1004] ss:$16 sps:$4 sm:$0xff]  }
 0x102   :  { %v4885_v11 = vpop.f32.mrf.mxu0  ;;  %5130 = vmatmul.mubr.bf16.vlgmr.msra.gmra.mxu0 %v9330_v0 }
 0x103   :  { %v4926_v12 = vpop.f32.mrf.mxu1  ;;  %5171 = vmatmul.mubr.bf16.vlgmr.msra.gmra.mxu1 %v9334_v1  ;;  %v4886_v14 = vadd.f32 %v4885_v11, %v823_v4  ;;  %5180 = vmatpush1.bf16.msra.mxu0 %v7575_v62  ;;  %v7622_v62 = vld [vmem:[%s11163_s1 + $0x1204] ss:$16 sps:$4 sm:$0xff]   ;;  %v7620_v4 = vld [vmem:[%s11163_s1 + $0x1200] ss:$16 sps:$4 sm:$0xff]  }
 0x104   :  { %5221 = vmatpush1.bf16.msra.mxu1 %v7578_v35  ;;  %v4887_v18 = vpop.f32.mrf.mxu0  ;;  %5181 = vmatprep.subr.bf16.mxu0 %v7583_v40  ;;  %v7625_v35 = vld [vmem:[%s11163_s1 + $0x11e4] ss:$16 sps:$4 sm:$0xff]  }
 0x105   :  { %v4928_v19 = vpop.f32.mrf.mxu1  ;;  %5222 = vmatprep.subr.bf16.mxu1 %v7586_v5  ;;  %v9377_v26 = vadd.f32 %v4926_v12, %v4886_v14  ;;  %v4888_v27 = vadd.f32 %v4887_v18, %v827_v8  ;;  %5211 = vmatprep.mubr.bf16.mxu0 %v9357_v9  ;;  %v7628_v40 = vld [vmem:[%s11163_s1 + $0x13e4] ss:$16 sps:$4 sm:$0xff]   ;;  %v7623_v5 = vld [vmem:[%s11163_s1 + $0x11e0] ss:$16 sps:$4 sm:$0xff]  }
 0x106   :  { %5252 = vmatprep.mubr.bf16.mxu1 %v9361_v10  ;;  %v4889_v28 = vpop.f32.mrf.mxu0  ;;  %v7626_v8 = vld [vmem:[%s11163_s1 + $0x13e0] ss:$16 sps:$4 sm:$0xff]   ;;  %v7631_v11 = vld [vmem:[%s11163_s1 + $0x11c4] ss:$16 sps:$4 sm:$0xff]  }
 0x107   :  { %v4930_v29 = vpop.f32.mrf.mxu1  ;;  %v9384_v31 = vadd.f32 %v4928_v19, %v4888_v27  ;;  %5182 = vmatpush1.bf16.msra.mxu0 %v7581_v13  ;;  %v7634_v12 = vld [vmem:[%s11163_s1 + $0x13c4] ss:$16 sps:$4 sm:$0xff]   ;;  %v7629_v13 = vld [vmem:[%s11163_s1 + $0x11c0] ss:$16 sps:$4 sm:$0xff]  }
 0x108   :  { %5223 = vmatpush1.bf16.msra.mxu1 %v7584_v15  ;;  %v4890_v33 = vpop.f32.mrf.mxu0  ;;  %5183 = vmatprep.subr.bf16.mxu0 %v7589_v20  ;;  %v7632_v14 = vld [vmem:[%s11163_s1 + $0x13c0] ss:$16 sps:$4 sm:$0xff]   ;;  %v7637_v15 = vld [vmem:[%s11163_s1 + $0x11a4] ss:$16 sps:$4 sm:$0xff]  }
 0x109   :  { %v4931_v34 = vpop.f32.mrf.mxu1  ;;  %5224 = vmatprep.subr.bf16.mxu1 %v7592_v21  ;;  %v7640_v18 = vld [vmem:[%s11163_s1 + $0x13a4] ss:$16 sps:$4 sm:$0xff]   ;;  %v7635_v19 = vld [vmem:[%s11163_s1 + $0x11a0] ss:$16 sps:$4 sm:$0xff]  }
 0x10a   :  { %v7638_v20 = vld [vmem:[%s11163_s1 + $0x13a0] ss:$16 sps:$4 sm:$0xff]   ;;  %v7643_v21 = vld [vmem:[%s11163_s1 + $0x1184] ss:$16 sps:$4 sm:$0xff]  }
 0x10b   :  { %5184 = vmatpush1.bf16.msra.mxu0 %v7587_v30  ;;  %v7646_v27 = vld [vmem:[%s11163_s1 + $0x1384] ss:$16 sps:$4 sm:$0xff]   ;;  %v7641_v28 = vld [vmem:[%s11163_s1 + $0x1180] ss:$16 sps:$4 sm:$0xff]  }
 0x10c   :  { %5225 = vmatpush1.bf16.msra.mxu1 %v7590_v32  ;;  %5185 = vmatprep.subr.bf16.mxu0 %v7595_v41  ;;  %v7644_v29 = vld [vmem:[%s11163_s1 + $0x1380] ss:$16 sps:$4 sm:$0xff]   ;;  %v7649_v30 = vld [vmem:[%s11163_s1 + $0x1164] ss:$16 sps:$4 sm:$0xff]  }
 0x10d   :  { %5226 = vmatprep.subr.bf16.mxu1 %v7598_v22  ;;  %v7652_v32 = vld [vmem:[%s11163_s1 + $0x1364] ss:$16 sps:$4 sm:$0xff]   ;;  %v7647_v33 = vld [vmem:[%s11163_s1 + $0x1160] ss:$16 sps:$4 sm:$0xff]  }
 0x10e   :  { %v7650_v34 = vld [vmem:[%s11163_s1 + $0x1360] ss:$16 sps:$4 sm:$0xff]   ;;  %v7655_v41 = vld [vmem:[%s11163_s1 + $0x1144] ss:$16 sps:$4 sm:$0xff]  }
 0x10f   :  { %5186 = vmatpush1.bf16.msra.mxu0 %v7593_v23  ;;  %v7658_v22 = vld [vmem:[%s11163_s1 + $0x1344] ss:$16 sps:$4 sm:$0xff]   ;;  %v7653_v23 = vld [vmem:[%s11163_s1 + $0x1140] ss:$16 sps:$4 sm:$0xff]  }
 0x110   :  { %5227 = vmatpush1.bf16.msra.mxu1 %v7596_v44  ;;  %5187 = vmatprep.subr.bf16.mxu0 %v7601_v45  ;;  %v7656_v44 = vld [vmem:[%s11163_s1 + $0x1340] ss:$16 sps:$4 sm:$0xff]   ;;  %v7661_v45 = vld [vmem:[%s11163_s1 + $0x1124] ss:$16 sps:$4 sm:$0xff]  }
 0x111   :  { %5228 = vmatprep.subr.bf16.mxu1 %v7604_v46  ;;  %v7664_v46 = vld [vmem:[%s11163_s1 + $0x1324] ss:$16 sps:$4 sm:$0xff]  }
 0x113   :  { %5188 = vmatpush1.bf16.msra.mxu0 %v7599_v49  ;;  %v7659_v49 = vld [vmem:[%s11163_s1 + $0x1120] ss:$16 sps:$4 sm:$0xff]  }
 0x114   :  { %5229 = vmatpush1.bf16.msra.mxu1 %v7602_v50  ;;  %5189 = vmatprep.subr.bf16.mxu0 %v7607_v52  ;;  %v7662_v50 = vld [vmem:[%s11163_s1 + $0x1320] ss:$16 sps:$4 sm:$0xff]   ;;  %v7667_v52 = vld [vmem:[%s11163_s1 + $0x1104] ss:$16 sps:$4 sm:$0xff]  }
 0x115   :  { %5230 = vmatprep.subr.bf16.mxu1 %v7610_v53  ;;  %v7670_v53 = vld [vmem:[%s11163_s1 + $0x1304] ss:$16 sps:$4 sm:$0xff]  }
 0x117   :  { %5190 = vmatpush1.bf16.msra.mxu0 %v7605_v55  ;;  %v7665_v55 = vld [vmem:[%s11163_s1 + $0x1100] ss:$16 sps:$4 sm:$0xff]  }
 0x118   :  { %5231 = vmatpush1.bf16.msra.mxu1 %v7608_v56  ;;  %5191 = vmatprep.subr.bf16.mxu0 %v7613_v57  ;;  %v7668_v56 = vld [vmem:[%s11163_s1 + $0x1300] ss:$16 sps:$4 sm:$0xff]   ;;  %v7677_v57 = vld [vmem:[%s11163_s1 + $0x14e4] ss:$16 sps:$4 sm:$0xff]  }
 0x119   :  { %5232 = vmatprep.subr.bf16.mxu1 %v7616_v58  ;;  %v7680_v58 = vld [vmem:[%s11163_s1 + $0x16e4] ss:$16 sps:$4 sm:$0xff]  }
 0x11b   :  { %5192 = vmatpush1.bf16.msra.mxu0 %v7611_v59  ;;  %v9554_v59 = vld [vmem:[%s11164_s0 + $0x50] sm:$0xff] }
 0x11c   :  { %5233 = vmatpush1.bf16.msra.mxu1 %v7614_v60  ;;  %5193 = vmatprep.subr.bf16.mxu0 %v7619_v61  ;;  %v9559_v60 = vld [vmem:[%s11164_s0 + $0x58] sm:$0xff]  ;;  %v7675_v61 = vld [vmem:[%s11163_s1 + $0x14e0] ss:$16 sps:$4 sm:$0xff]  }
 0x11d   :  { %5234 = vmatprep.subr.bf16.mxu1 %v7622_v62  ;;  %v7678_v62 = vld [vmem:[%s11163_s1 + $0x16e0] ss:$16 sps:$4 sm:$0xff]  }
 0x11f   :  { %5194 = vmatpush1.bf16.msra.mxu0 %v7617_v63  ;;  %v9569_v63 = vcombine.low %v9339_v2, %v9339_v2  ;;  %v7681_v2 = vld [vmem:[%s11163_s1 + $0x14c0] ss:$16 sps:$4 sm:$0xff]  }
 0x120   :  { %5235 = vmatpush1.bf16.msra.mxu1 %v7620_v4  ;;  %5195 = vmatprep.subr.bf16.mxu0 %v7625_v35  ;;  %v9573_v4 = vcombine.low %v9344_v3, %v9344_v3  ;;  %v7683_v35 = vld [vmem:[%s11163_s1 + $0x14c4] ss:$16 sps:$4 sm:$0xff]   ;;  %v7684_v3 = vld [vmem:[%s11163_s1 + $0x16c0] ss:$16 sps:$4 sm:$0xff]  }
 0x121   :  { %5236 = vmatprep.subr.bf16.mxu1 %v7628_v40  ;;  %v7686_v40 = vld [vmem:[%s11163_s1 + $0x16c4] ss:$16 sps:$4 sm:$0xff]  }
 0x123   :  { %5196 = vmatpush2.bf16.msra.mxu0 %v7623_v5  ;;  %v9589_v5 = vcombine.high %v9554_v59, %v9554_v59 }
 0x124   :  { %5237 = vmatpush2.bf16.msra.mxu1 %v7626_v8  ;;  %5197 = vmatprep.subr.bf16.mxu0 %v7631_v11  ;;  %v9593_v8 = vcombine.high %v9559_v60, %v9559_v60 }
 0x125   :  { %5238 = vmatprep.subr.bf16.mxu1 %v7634_v12 }
 0x127   :  { %5198 = vmatpush2.bf16.msra.mxu0 %v7629_v13 }
 0x128   :  { %5239 = vmatpush2.bf16.msra.mxu1 %v7632_v14  ;;  %5199 = vmatprep.subr.bf16.mxu0 %v7637_v15 }
 0x129   :  { %5240 = vmatprep.subr.bf16.mxu1 %v7640_v18  ;;  %v7689_v18 = vld [vmem:[%s11163_s1 + $0x14a4] ss:$16 sps:$4 sm:$0xff]  }
 0x12b   :  { %5200 = vmatpush2.bf16.msra.mxu0 %v7635_v19  ;;  %v7692_v19 = vld [vmem:[%s11163_s1 + $0x16a4] ss:$16 sps:$4 sm:$0xff]  }
 0x12c   :  { %5241 = vmatpush2.bf16.msra.mxu1 %v7638_v20  ;;  %5201 = vmatprep.subr.bf16.mxu0 %v7643_v21 }
 0x12d   :  { %5242 = vmatprep.subr.bf16.mxu1 %v7646_v27  ;;  %v7690_v27 = vld [vmem:[%s11163_s1 + $0x16a0] ss:$16 sps:$4 sm:$0xff]  }
 0x12f   :  { %5202 = vmatpush2.bf16.msra.mxu0 %v7641_v28 }
 0x130   :  { %5243 = vmatpush2.bf16.msra.mxu1 %v7644_v29  ;;  %5203 = vmatprep.subr.bf16.mxu0 %v7649_v30 }
 0x131   :  { %5244 = vmatprep.subr.bf16.mxu1 %v7652_v32 }
 0x133   :  { %5204 = vmatpush2.bf16.msra.mxu0 %v7647_v33  ;;  %v7695_v33 = vld [vmem:[%s11163_s1 + $0x1484] ss:$16 sps:$4 sm:$0xff]  }
 0x134   :  { %5245 = vmatpush2.bf16.msra.mxu1 %v7650_v34  ;;  %5205 = vmatprep.subr.bf16.mxu0 %v7655_v41  ;;  %v7698_v34 = vld [vmem:[%s11163_s1 + $0x1684] ss:$16 sps:$4 sm:$0xff]   ;;  %v7693_v41 = vld [vmem:[%s11163_s1 + $0x1480] ss:$16 sps:$4 sm:$0xff]  }
 0x135   :  { %5246 = vmatprep.subr.bf16.mxu1 %v7658_v22  ;;  %v7696_v22 = vld [vmem:[%s11163_s1 + $0x1680] ss:$16 sps:$4 sm:$0xff]  }
 0x137   :  { %5206 = vmatpush2.bf16.msra.mxu0 %v7653_v23  ;;  %v7701_v23 = vld [vmem:[%s11163_s1 + $0x1464] ss:$16 sps:$4 sm:$0xff]  }
 0x138   :  { %5247 = vmatpush2.bf16.msra.mxu1 %v7656_v44  ;;  %5207 = vmatprep.subr.bf16.mxu0 %v7661_v45  ;;  %v7704_v44 = vld [vmem:[%s11163_s1 + $0x1664] ss:$16 sps:$4 sm:$0xff]   ;;  %v7699_v45 = vld [vmem:[%s11163_s1 + $0x1460] ss:$16 sps:$4 sm:$0xff]  }
 0x139   :  { %5248 = vmatprep.subr.bf16.mxu1 %v7664_v46  ;;  %v7702_v46 = vld [vmem:[%s11163_s1 + $0x1660] ss:$16 sps:$4 sm:$0xff]  }
 0x13b   :  { %5208 = vmatpush2.bf16.msra.mxu0 %v7659_v49  ;;  %v7707_v49 = vld [vmem:[%s11163_s1 + $0x1444] ss:$16 sps:$4 sm:$0xff]  }
 0x13c   :  { %5249 = vmatpush2.bf16.msra.mxu1 %v7662_v50  ;;  %5209 = vmatprep.subr.bf16.mxu0 %v7667_v52  ;;  %v7710_v50 = vld [vmem:[%s11163_s1 + $0x1644] ss:$16 sps:$4 sm:$0xff]   ;;  %v7705_v52 = vld [vmem:[%s11163_s1 + $0x1440] ss:$16 sps:$4 sm:$0xff]  }
 0x13d   :  { %5250 = vmatprep.subr.bf16.mxu1 %v7670_v53  ;;  %v7708_v53 = vld [vmem:[%s11163_s1 + $0x1640] ss:$16 sps:$4 sm:$0xff]  }
 0x13f   :  { %5210 = vmatpush2.bf16.msra.mxu0 %v7665_v55  ;;  %v7713_v55 = vld [vmem:[%s11163_s1 + $0x1424] ss:$16 sps:$4 sm:$0xff]  }
 0x140   :  { %5251 = vmatpush2.bf16.msra.mxu1 %v7668_v56  ;;  %5261 = vmatprep.subr.bf16.mxu0 %v7677_v57  ;;  %v7716_v56 = vld [vmem:[%s11163_s1 + $0x1624] ss:$16 sps:$4 sm:$0xff]   ;;  %v7711_v57 = vld [vmem:[%s11163_s1 + $0x1420] ss:$16 sps:$4 sm:$0xff]  }
 0x141   :  { %5302 = vmatprep.subr.bf16.mxu1 %v7680_v58  ;;  %v7714_v58 = vld [vmem:[%s11163_s1 + $0x1620] ss:$16 sps:$4 sm:$0xff]  }
 0x142   :  { %v4967_v11 = vpop.f32.mrf.mxu0  ;;  %5212 = vmatmul.mubr.bf16.vlgmr.msra.gmra.mxu0 %v9569_v63 }
 0x143   :  { %v5008_v12 = vpop.f32.mrf.mxu1  ;;  %5253 = vmatmul.mubr.bf16.vlgmr.msra.gmra.mxu1 %v9573_v4  ;;  %v4968_v13 = vadd.f32 %v4967_v11, %v9377_v26  ;;  %5262 = vmatpush1.bf16.msra.mxu0 %v7675_v61  ;;  %v7687_v26 = vld [vmem:[%s11163_s1 + $0x14a0] ss:$16 sps:$4 sm:$0xff]   ;;  %v7719_v61 = vld [vmem:[%s11163_s1 + $0x1404] ss:$16 sps:$4 sm:$0xff]  }
 0x144   :  { %5303 = vmatpush1.bf16.msra.mxu1 %v7678_v62  ;;  %v4969_v14 = vpop.f32.mrf.mxu0  ;;  %5263 = vmatprep.subr.bf16.mxu0 %v7683_v35  ;;  %v7722_v62 = vld [vmem:[%s11163_s1 + $0x1604] ss:$16 sps:$4 sm:$0xff]   ;;  %v7717_v35 = vld [vmem:[%s11163_s1 + $0x1400] ss:$16 sps:$4 sm:$0xff]  }
 0x145   :  { %v5010_v15 = vpop.f32.mrf.mxu1  ;;  %5304 = vmatprep.subr.bf16.mxu1 %v7686_v40  ;;  %v9604_v20 = vadd.f32 %v5008_v12, %v4968_v13  ;;  %v4970_v21 = vadd.f32 %v4969_v14, %v9384_v31  ;;  %5293 = vmatprep.mubr.bf16.mxu0 %v9589_v5  ;;  %v7720_v40 = vld [vmem:[%s11163_s1 + $0x1600] ss:$16 sps:$4 sm:$0xff]   ;;  %v7731_v13 = vld [vmem:[%s11163_s1 + $0x15c4] ss:$16 sps:$4 sm:$0xff]  }
 0x146   :  { %5334 = vmatprep.mubr.bf16.mxu1 %v9593_v8  ;;  %v4971_v28 = vpop.f32.mrf.mxu0  ;;  %v7723_v11 = vld [vmem:[%s11163_s1 + $0x15e0] ss:$16 sps:$4 sm:$0xff]   ;;  %v7734_v14 = vld [vmem:[%s11163_s1 + $0x17c4] ss:$16 sps:$4 sm:$0xff]  }
 0x147   :  { %v5012_v29 = vpop.f32.mrf.mxu1  ;;  %v9615_v30 = vadd.f32 %v5010_v15, %v4970_v21  ;;  %5264 = vmatpush1.bf16.msra.mxu0 %v7681_v2  ;;  %v7725_v2 = vld [vmem:[%s11163_s1 + $0x15e4] ss:$16 sps:$4 sm:$0xff]   ;;  %v7726_v12 = vld [vmem:[%s11163_s1 + $0x17e0] ss:$16 sps:$4 sm:$0xff]  }
 0x148   :  { %5305 = vmatpush1.bf16.msra.mxu1 %v7684_v3  ;;  %v4972_v32 = vpop.f32.mrf.mxu0  ;;  %5265 = vmatprep.subr.bf16.mxu0 %v7689_v18  ;;  %v7728_v3 = vld [vmem:[%s11163_s1 + $0x17e4] ss:$16 sps:$4 sm:$0xff]   ;;  %v7729_v15 = vld [vmem:[%s11163_s1 + $0x15c0] ss:$16 sps:$4 sm:$0xff]  }
 0x149   :  { %v5013_v31 = vpop.f32.mrf.mxu1  ;;  %5306 = vmatprep.subr.bf16.mxu1 %v7692_v19  ;;  %v7732_v18 = vld [vmem:[%s11163_s1 + $0x17c0] ss:$16 sps:$4 sm:$0xff]   ;;  %v7737_v19 = vld [vmem:[%s11163_s1 + $0x15a4] ss:$16 sps:$4 sm:$0xff]  }
 0x14a   :  { %v7740_v21 = vld [vmem:[%s11163_s1 + $0x17a4] ss:$16 sps:$4 sm:$0xff]   ;;  %v7741_v32 = vld [vmem:[%s11163_s1 + $0x1580] ss:$16 sps:$4 sm:$0xff]  }
 0x14b   :  { %5266 = vmatpush1.bf16.msra.mxu0 %v7687_v26  ;;  %v7735_v26 = vld [vmem:[%s11163_s1 + $0x15a0] ss:$16 sps:$4 sm:$0xff]   ;;  %v7743_v28 = vld [vmem:[%s11163_s1 + $0x1584] ss:$16 sps:$4 sm:$0xff]  }
 0x14c   :  { %5307 = vmatpush1.bf16.msra.mxu1 %v7690_v27  ;;  %5267 = vmatprep.subr.bf16.mxu0 %v7695_v33  ;;  %v7738_v27 = vld [vmem:[%s11163_s1 + $0x17a0] ss:$16 sps:$4 sm:$0xff]   ;;  %v7746_v29 = vld [vmem:[%s11163_s1 + $0x1784] ss:$16 sps:$4 sm:$0xff]  }
 0x14d   :  { %5308 = vmatprep.subr.bf16.mxu1 %v7698_v34  ;;  %v7744_v31 = vld [vmem:[%s11163_s1 + $0x1780] ss:$16 sps:$4 sm:$0xff]   ;;  %v7749_v33 = vld [vmem:[%s11163_s1 + $0x1564] ss:$16 sps:$4 sm:$0xff]  }
 0x14e   :  { %v7752_v34 = vld [vmem:[%s11163_s1 + $0x1764] ss:$16 sps:$4 sm:$0xff]  }
 0x14f   :  { %5268 = vmatpush1.bf16.msra.mxu0 %v7693_v41  ;;  %v7747_v41 = vld [vmem:[%s11163_s1 + $0x1560] ss:$16 sps:$4 sm:$0xff]  }
 0x150   :  { %5309 = vmatpush1.bf16.msra.mxu1 %v7696_v22  ;;  %5269 = vmatprep.subr.bf16.mxu0 %v7701_v23  ;;  %v7750_v22 = vld [vmem:[%s11163_s1 + $0x1760] ss:$16 sps:$4 sm:$0xff]   ;;  %v7755_v23 = vld [vmem:[%s11163_s1 + $0x1544] ss:$16 sps:$4 sm:$0xff]  }
 0x151   :  { %5310 = vmatprep.subr.bf16.mxu1 %v7704_v44  ;;  %v7758_v44 = vld [vmem:[%s11163_s1 + $0x1744] ss:$16 sps:$4 sm:$0xff]  }
 0x153   :  { %5270 = vmatpush1.bf16.msra.mxu0 %v7699_v45  ;;  %v7753_v45 = vld [vmem:[%s11163_s1 + $0x1540] ss:$16 sps:$4 sm:$0xff]  }
 0x154   :  { %5311 = vmatpush1.bf16.msra.mxu1 %v7702_v46  ;;  %5271 = vmatprep.subr.bf16.mxu0 %v7707_v49  ;;  %v7756_v46 = vld [vmem:[%s11163_s1 + $0x1740] ss:$16 sps:$4 sm:$0xff]   ;;  %v7761_v49 = vld [vmem:[%s11163_s1 + $0x1524] ss:$16 sps:$4 sm:$0xff]  }
 0x155   :  { %5312 = vmatprep.subr.bf16.mxu1 %v7710_v50  ;;  %v7764_v50 = vld [vmem:[%s11163_s1 + $0x1724] ss:$16 sps:$4 sm:$0xff]  }
 0x157   :  { %5272 = vmatpush1.bf16.msra.mxu0 %v7705_v52  ;;  %v7759_v52 = vld [vmem:[%s11163_s1 + $0x1520] ss:$16 sps:$4 sm:$0xff]  }
 0x158   :  { %5313 = vmatpush1.bf16.msra.mxu1 %v7708_v53  ;;  %5273 = vmatprep.subr.bf16.mxu0 %v7713_v55  ;;  %v7762_v53 = vld [vmem:[%s11163_s1 + $0x1720] ss:$16 sps:$4 sm:$0xff]   ;;  %v7767_v55 = vld [vmem:[%s11163_s1 + $0x1504] ss:$16 sps:$4 sm:$0xff]  }
 0x159   :  { %5314 = vmatprep.subr.bf16.mxu1 %v7716_v56  ;;  %v7770_v56 = vld [vmem:[%s11163_s1 + $0x1704] ss:$16 sps:$4 sm:$0xff]  }
 0x15b   :  { %5274 = vmatpush1.bf16.msra.mxu0 %v7711_v57  ;;  %v7765_v57 = vld [vmem:[%s11163_s1 + $0x1500] ss:$16 sps:$4 sm:$0xff]  }
 0x15c   :  { %5315 = vmatpush1.bf16.msra.mxu1 %v7714_v58  ;;  %5275 = vmatprep.subr.bf16.mxu0 %v7719_v61  ;;  %v7768_v58 = vld [vmem:[%s11163_s1 + $0x1700] ss:$16 sps:$4 sm:$0xff]   ;;  %v7777_v61 = vld [vmem:[%s11163_s1 + $0x1864] ss:$16 sps:$4 sm:$0xff]  }
 0x15d   :  { %5316 = vmatprep.subr.bf16.mxu1 %v7722_v62  ;;  %v7780_v62 = vld [vmem:[%s11163_s1 + $0xec] ss:$16 sps:$4 sm:$0xff]  }
 0x15f   :  { %5276 = vmatpush1.bf16.msra.mxu0 %v7717_v35  ;;  %v7775_v35 = vld [vmem:[%s11163_s1 + $0x1860] ss:$16 sps:$4 sm:$0xff]  }
 0x160   :  { %5317 = vmatpush1.bf16.msra.mxu1 %v7720_v40  ;;  %5277 = vmatprep.subr.bf16.mxu0 %v7725_v2  ;;  %v7778_v40 = vld [vmem:[%s11163_s1 + $0xe8] ss:$16 sps:$4 sm:$0xff]   ;;  %v9787_v2 = vcombine.low %v9554_v59, %v9554_v59  ;;  %v7781_v59 = vld [vmem:[%s11163_s1 + $0x1840] ss:$16 sps:$4 sm:$0xff]  }
 0x161   :  { %5318 = vmatprep.subr.bf16.mxu1 %v7728_v3  ;;  %v9791_v3 = vcombine.low %v9559_v60, %v9559_v60  ;;  %v7784_v60 = vld [vmem:[%s11163_s1 + $0xc8] ss:$16 sps:$4 sm:$0xff]  }
 0x163   :  { %5278 = vmatpush2.bf16.msra.mxu0 %v7723_v11  ;;  %v7783_v11 = vld [vmem:[%s11163_s1 + $0x1844] ss:$16 sps:$4 sm:$0xff]  }
 0x164   :  { %5319 = vmatpush2.bf16.msra.mxu1 %v7726_v12  ;;  %5279 = vmatprep.subr.bf16.mxu0 %v7731_v13  ;;  %v7786_v12 = vld [vmem:[%s11163_s1 + $0xcc] ss:$16 sps:$4 sm:$0xff]  }
 0x165   :  { %5320 = vmatprep.subr.bf16.mxu1 %v7734_v14 }
 0x167   :  { %5280 = vmatpush2.bf16.msra.mxu0 %v7729_v15 }
 0x168   :  { %5321 = vmatpush2.bf16.msra.mxu1 %v7732_v18  ;;  %5281 = vmatprep.subr.bf16.mxu0 %v7737_v19 }
 0x169   :  { %5322 = vmatprep.subr.bf16.mxu1 %v7740_v21  ;;  %v7789_v21 = vld [vmem:[%s11163_s1 + $0x1824] ss:$16 sps:$4 sm:$0xff]  }
 0x16b   :  { %5282 = vmatpush2.bf16.msra.mxu0 %v7735_v26  ;;  %v7792_v26 = vld [vmem:[%s11163_s1 + $0xac] ss:$16 sps:$4 sm:$0xff]  }
 0x16c   :  { %5323 = vmatpush2.bf16.msra.mxu1 %v7738_v27  ;;  %5283 = vmatprep.subr.bf16.mxu0 %v7743_v28 }
 0x16d   :  { %5324 = vmatprep.subr.bf16.mxu1 %v7746_v29  ;;  %v7790_v29 = vld [vmem:[%s11163_s1 + $0xa8] ss:$16 sps:$4 sm:$0xff]  }
 0x16f   :  { %5284 = vmatpush2.bf16.msra.mxu0 %v7741_v32  ;;  %v8414_v32 = vmov 0  }
 0x170   :  { %5325 = vmatpush2.bf16.msra.mxu1 %v7744_v31  ;;  %5285 = vmatprep.subr.bf16.mxu0 %v7749_v33 }
 0x171   :  { %5326 = vmatprep.subr.bf16.mxu1 %v7752_v34 }
 0x173   :  { %5286 = vmatpush2.bf16.msra.mxu0 %v7747_v41 }
 0x174   :  { %5327 = vmatpush2.bf16.msra.mxu1 %v7750_v22  ;;  %5287 = vmatprep.subr.bf16.mxu0 %v7755_v23  ;;  %v7795_v22 = vld [vmem:[%s11163_s1 + $0x1804] ss:$16 sps:$4 sm:$0xff]   ;;  %v7798_v23 = vld [vmem:[%s11163_s1 + $0x8c] ss:$16 sps:$4 sm:$0xff]  }
 0x175   :  { %5328 = vmatprep.subr.bf16.mxu1 %v7758_v44  ;;  %v7796_v44 = vld [vmem:[%s11163_s1 + $0x88] ss:$16 sps:$4 sm:$0xff]  }
 0x177   :  { %5288 = vmatpush2.bf16.msra.mxu0 %v7753_v45  ;;  %v7799_v45 = vld [vmem:[%s11164_s0 + $0x60] ss:$0 sps:$4 sm:$0xff]  }
 0x178   :  { %5329 = vmatpush2.bf16.msra.mxu1 %v7756_v46  ;;  %5289 = vmatprep.subr.bf16.mxu0 %v7761_v49  ;;  %v7802_v46 = vld [vmem:[%s11163_s1 + $0x6c] ss:$16 sps:$4 sm:$0xff]  }
 0x179   :  { %5330 = vmatprep.subr.bf16.mxu1 %v7764_v50  ;;  %v7805_v49 = vld [vmem:[%s11163_s1 + $0x2ec] ss:$16 sps:$4 sm:$0xff]   ;;  %v7800_v50 = vld [vmem:[%s11163_s1 + $0x68] ss:$16 sps:$4 sm:$0xff]  }
 0x17b   :  { %5290 = vmatpush2.bf16.msra.mxu0 %v7759_v52  ;;  %v7803_v52 = vld [vmem:[%s11163_s1 + $0x2e8] ss:$16 sps:$4 sm:$0xff]  }
 0x17c   :  { %5331 = vmatpush2.bf16.msra.mxu1 %v7762_v53  ;;  %5291 = vmatprep.subr.bf16.mxu0 %v7767_v55  ;;  %v7808_v53 = vld [vmem:[%s11163_s1 + $0x4c] ss:$16 sps:$4 sm:$0xff]  }
 0x17d   :  { %5332 = vmatprep.subr.bf16.mxu1 %v7770_v56  ;;  %v7811_v55 = vld [vmem:[%s11163_s1 + $0x2cc] ss:$16 sps:$4 sm:$0xff]   ;;  %v7806_v56 = vld [vmem:[%s11163_s1 + $0x48] ss:$16 sps:$4 sm:$0xff]  }
 0x17f   :  { %5292 = vmatpush2.bf16.msra.mxu0 %v7765_v57  ;;  %v7809_v57 = vld [vmem:[%s11163_s1 + $0x2c8] ss:$16 sps:$4 sm:$0xff]  }
 0x180   :  { %5333 = vmatpush2.bf16.msra.mxu1 %v7768_v58  ;;  %5351 = vmatprep.subr.bf16.mxu0 %v7777_v61  ;;  %v7814_v58 = vld [vmem:[%s11163_s1 + $0x2c] ss:$16 sps:$4 sm:$0xff]  }
 0x181   :  { %5384 = vmatprep.subr.bf16.mxu1 %v7780_v62  ;;  %v7817_v61 = vld [vmem:[%s11163_s1 + $0x2ac] ss:$16 sps:$4 sm:$0xff]   ;;  %v7812_v62 = vld [vmem:[%s11163_s1 + $0x28] ss:$16 sps:$4 sm:$0xff]  }
 0x182   :  { %v5049_v13 = vpop.f32.mrf.mxu0  ;;  %5294 = vmatmul.mubr.bf16.vlgmr.msra.gmra.mxu0 %v9787_v2 }
 0x183   :  { %v5090_v14 = vpop.f32.mrf.mxu1  ;;  %5335 = vmatmul.mubr.bf16.vlgmr.msra.gmra.mxu1 %v9791_v3  ;;  %v5050_v15 = vadd.f32 %v5049_v13, %v9604_v20  ;;  %5352 = vmatpush1.bf16.msra.mxu0 %v7775_v35  ;;  %v7787_v20 = vld [vmem:[%s11163_s1 + $0x1820] ss:$16 sps:$4 sm:$0xff]   ;;  %v7815_v35 = vld [vmem:[%s11163_s1 + $0x2a8] ss:$16 sps:$4 sm:$0xff]  }
 0x184   :  { %5385 = vmatpush1.bf16.msra.mxu1 %v7778_v40  ;;  %v5051_v18 = vpop.f32.mrf.mxu0  ;;  %5353 = vmatprep.subr.bf16.mxu0 %v7783_v11  ;;  %v7820_v40 = vld [vmem:[%s11163_s1 + $0xc] ss:$16 sps:$4 sm:$0xff]   ;;  %v7818_v11 = vld [vmem:[%s11163_s1 + $0x8] ss:$16 sps:$4 sm:$0xff]  }
 0x185   :  { %v5092_v19 = vpop.f32.mrf.mxu1  ;;  %5386 = vmatprep.subr.bf16.mxu1 %v7786_v12  ;;  %v9814_v27 = vadd.f32 %v5090_v14, %v5050_v15  ;;  %v5052_v28 = vadd.f32 %v5051_v18, %v9615_v30  ;;  %5375 = vmatprep.mubr.bf16.mxu0 %v8414_v32  ;;  %v7821_v12 = vld [vmem:[%s11163_s1 + $0x288] ss:$16 sps:$4 sm:$0xff]   ;;  %v7832_v15 = vld [vmem:[%s11163_s1 + $0x1cc] ss:$16 sps:$4 sm:$0xff]  }
 0x186   :  { %5416 = vmatprep.mubr.bf16.mxu1 %v8586_v47  ;;  %v5053_v31 = vpop.f32.mrf.mxu0  ;;  %v7793_v47 = vld [vmem:[%s11163_s1 + $0x1800] ss:$16 sps:$4 sm:$0xff]   ;;  %v7824_v13 = vld [vmem:[%s11163_s1 + $0x1e8] ss:$16 sps:$4 sm:$0xff]   ;;  %v7835_v18 = vld [vmem:[%s11163_s1 + $0x24c] ss:$16 sps:$4 sm:$0xff]  }
 0x187   :  { %v5094_v33 = vpop.f32.mrf.mxu1  ;;  %v9825_v34 = vadd.f32 %v5092_v19, %v5052_v28  ;;  %5354 = vmatpush1.bf16.msra.mxu0 %v7781_v59  ;;  %v7826_v59 = vld [vmem:[%s11163_s1 + $0x1ec] ss:$16 sps:$4 sm:$0xff]   ;;  %v7827_v14 = vld [vmem:[%s11163_s1 + $0x268] ss:$16 sps:$4 sm:$0xff]  }
 0x188   :  { %5387 = vmatpush1.bf16.msra.mxu1 %v7784_v60  ;;  %v5054_v30 = vpop.f32.mrf.mxu0  ;;  %5355 = vmatprep.subr.bf16.mxu0 %v7789_v21  ;;  %v7829_v60 = vld [vmem:[%s11163_s1 + $0x26c] ss:$16 sps:$4 sm:$0xff]   ;;  %v7830_v19 = vld [vmem:[%s11163_s1 + $0x1c8] ss:$16 sps:$4 sm:$0xff]  }
 0x189   :  { %v5095_v41 = vpop.f32.mrf.mxu1  ;;  %5388 = vmatprep.subr.bf16.mxu1 %v7792_v26  ;;  %v7833_v21 = vld [vmem:[%s11163_s1 + $0x248] ss:$16 sps:$4 sm:$0xff]   ;;  %v7838_v26 = vld [vmem:[%s11163_s1 + $0x1ac] ss:$16 sps:$4 sm:$0xff]  }
 0x18a   :  { %v7841_v28 = vld [vmem:[%s11163_s1 + $0x22c] ss:$16 sps:$4 sm:$0xff]   ;;  %v7842_v30 = vld [vmem:[%s11163_s1 + $0x188] ss:$16 sps:$4 sm:$0xff]  }
 0x18b   :  { %5356 = vmatpush1.bf16.msra.mxu0 %v7787_v20  ;;  %v7836_v20 = vld [vmem:[%s11163_s1 + $0x1a8] ss:$16 sps:$4 sm:$0xff]   ;;  %v7844_v31 = vld [vmem:[%s11163_s1 + $0x18c] ss:$16 sps:$4 sm:$0xff]  }
 0x18c   :  { %5389 = vmatpush1.bf16.msra.mxu1 %v7790_v29  ;;  %5357 = vmatprep.subr.bf16.mxu0 %v7795_v22  ;;  %v7839_v29 = vld [vmem:[%s11163_s1 + $0x228] ss:$16 sps:$4 sm:$0xff]   ;;  %v7847_v33 = vld [vmem:[%s11163_s1 + $0x20c] ss:$16 sps:$4 sm:$0xff]  }
 0x18d   :  { %5390 = vmatprep.subr.bf16.mxu1 %v7798_v23  ;;  %v7845_v41 = vld [vmem:[%s11163_s1 + $0x208] ss:$16 sps:$4 sm:$0xff]   ;;  %v7850_v22 = vld [vmem:[%s11163_s1 + $0x16c] ss:$16 sps:$4 sm:$0xff]  }
 0x18e   :  { %v7853_v23 = vld [vmem:[%s11163_s1 + $0x3ec] ss:$16 sps:$4 sm:$0xff]  }
 0x18f   :  { %5358 = vmatpush1.bf16.msra.mxu0 %v7793_v47  ;;  %v7848_v47 = vld [vmem:[%s11163_s1 + $0x168] ss:$16 sps:$4 sm:$0xff]  }
 0x190   :  { %5391 = vmatpush1.bf16.msra.mxu1 %v7796_v44  ;;  %5425 = vmatprep.subr.bf16.mxu0 %v7805_v49  ;;  %v7851_v44 = vld [vmem:[%s11163_s1 + $0x3e8] ss:$16 sps:$4 sm:$0xff]  }
 0x191   :  { %5392 = vmatprep.subr.bf16.mxu1 %v7802_v46  ;;  %v7859_v46 = vld [vmem:[%s11163_s1 + $0x3cc] ss:$16 sps:$4 sm:$0xff]   ;;  %v7854_v49 = vld [vmem:[%s11163_s1 + $0x148] ss:$16 sps:$4 sm:$0xff]  }
 0x192   :  { %7095 = vmatmul.mubr.msk.bf16.vlgmr.msra.gmra.mxu0 %vm4847_vm0, %v7799_v45  ;;  %v7856_v45 = vld [vmem:[%s11163_s1 + $0x14c] ss:$16 sps:$4 sm:$0xff]  }
 0x193   :  { %5426 = vmatpush1.bf16.msra.mxu0 %v7803_v52  ;;  %5457 = vmatprep.mubr.bf16.mxu0 %v8597_v51  ;;  %v7823_v51 = vld [vmem:[%s11163_s1 + $0x28c] ss:$16 sps:$4 sm:$0xff]  }
 0x194   :  { %5393 = vmatpush1.bf16.msra.mxu1 %v7800_v50  ;;  %5427 = vmatprep.subr.bf16.mxu0 %v7811_v55  ;;  %v7857_v50 = vld [vmem:[%s11163_s1 + $0x3c8] ss:$16 sps:$4 sm:$0xff]   ;;  %v7862_v52 = vld [vmem:[%s11163_s1 + $0x12c] ss:$16 sps:$4 sm:$0xff]  }
 0x195   :  { %5394 = vmatprep.subr.bf16.mxu1 %v7808_v53  ;;  %v7865_v53 = vld [vmem:[%s11163_s1 + $0x3ac] ss:$16 sps:$4 sm:$0xff]   ;;  %v7860_v55 = vld [vmem:[%s11163_s1 + $0x128] ss:$16 sps:$4 sm:$0xff]  }
 0x197   :  { %5428 = vmatpush1.bf16.msra.mxu0 %v7809_v57  ;;  %v7868_v57 = vld [vmem:[%s11163_s1 + $0x10c] ss:$16 sps:$4 sm:$0xff]  }
 0x198   :  { %5395 = vmatpush1.bf16.msra.mxu1 %v7806_v56  ;;  %5429 = vmatprep.subr.bf16.mxu0 %v7817_v61  ;;  %v7863_v56 = vld [vmem:[%s11163_s1 + $0x3a8] ss:$16 sps:$4 sm:$0xff]  }
 0x199   :  { %5396 = vmatprep.subr.bf16.mxu1 %v7814_v58  ;;  %v7871_v58 = vld [vmem:[%s11163_s1 + $0x38c] ss:$16 sps:$4 sm:$0xff]   ;;  %v7866_v61 = vld [vmem:[%s11163_s1 + $0x108] ss:$16 sps:$4 sm:$0xff]  }
 0x19b   :  { %5430 = vmatpush1.bf16.msra.mxu0 %v7815_v35  ;;  %v7874_v35 = vld [vmem:[%s11163_s1 + $0x36c] ss:$16 sps:$4 sm:$0xff]  }
 0x19c   :  { %5397 = vmatpush1.bf16.msra.mxu1 %v7812_v62  ;;  %5431 = vmatprep.subr.bf16.mxu0 %v7823_v51  ;;  %v7869_v62 = vld [vmem:[%s11163_s1 + $0x388] ss:$16 sps:$4 sm:$0xff]  }
 0x19d   :  { %5398 = vmatprep.subr.bf16.mxu1 %v7820_v40  ;;  %v7877_v40 = vld [vmem:[%s11163_s1 + $0x4ec] ss:$16 sps:$4 sm:$0xff]   ;;  %v7872_v51 = vld [vmem:[%s11163_s1 + $0x368] ss:$16 sps:$4 sm:$0xff]  }
 0x19f   :  { %5432 = vmatpush1.bf16.msra.mxu0 %v7821_v12  ;;  %v7880_v12 = vld [vmem:[%s11163_s1 + $0x34c] ss:$16 sps:$4 sm:$0xff]  }
 0x1a0   :  { %5399 = vmatpush1.bf16.msra.mxu1 %v7818_v11  ;;  %5433 = vmatprep.subr.bf16.mxu0 %v7829_v60  ;;  %v7875_v11 = vld [vmem:[%s11163_s1 + $0x4e8] ss:$16 sps:$4 sm:$0xff]  }
 0x1a1   :  { %5400 = vmatprep.subr.bf16.mxu1 %v7826_v59  ;;  %v7883_v59 = vld [vmem:[%s11163_s1 + $0x4cc] ss:$16 sps:$4 sm:$0xff]   ;;  %v7878_v60 = vld [vmem:[%s11163_s1 + $0x348] ss:$16 sps:$4 sm:$0xff]  }
 0x1a3   :  { %5434 = vmatpush1.bf16.msra.mxu0 %v7827_v14 }
 0x1a4   :  { %5401 = vmatpush2.bf16.msra.mxu1 %v7824_v13  ;;  %5435 = vmatprep.subr.bf16.mxu0 %v7835_v18  ;;  %v7881_v13 = vld [vmem:[%s11163_s1 + $0x4c8] ss:$16 sps:$4 sm:$0xff]  }
 0x1a5   :  { %5402 = vmatprep.subr.bf16.mxu1 %v7832_v15 }
 0x1a7   :  { %5436 = vmatpush1.bf16.msra.mxu0 %v7833_v21 }
 0x1a8   :  { %5403 = vmatpush2.bf16.msra.mxu1 %v7830_v19  ;;  %5437 = vmatprep.subr.bf16.mxu0 %v7841_v28  ;;  %v7889_v28 = vld [vmem:[%s11163_s1 + $0x4ac] ss:$16 sps:$4 sm:$0xff]  }
 0x1a9   :  { %5404 = vmatprep.subr.bf16.mxu1 %v7838_v26  ;;  %v7886_v26 = vld [vmem:[%s11163_s1 + $0x32c] ss:$16 sps:$4 sm:$0xff]  }
 0x1ab   :  { %5438 = vmatpush1.bf16.msra.mxu0 %v7839_v29  ;;  %v7887_v29 = vld [vmem:[%s11163_s1 + $0x4a8] ss:$16 sps:$4 sm:$0xff]  }
 0x1ac   :  { %5405 = vmatpush2.bf16.msra.mxu1 %v7836_v20  ;;  %5439 = vmatprep.subr.bf16.mxu0 %v7847_v33 }
 0x1ad   :  { %5406 = vmatprep.subr.bf16.mxu1 %v7844_v31 }
 0x1af   :  { %5440 = vmatpush1.bf16.msra.mxu0 %v7845_v41 }
 0x1b0   :  { %5407 = vmatpush2.bf16.msra.mxu1 %v7842_v30  ;;  %5441 = vmatprep.subr.bf16.mxu0 %v7853_v23  ;;  %v7895_v23 = vld [vmem:[%s11163_s1 + $0x48c] ss:$16 sps:$4 sm:$0xff]  }
 0x1b1   :  { %5408 = vmatprep.subr.bf16.mxu1 %v7850_v22 }
 0x1b3   :  { %5442 = vmatpush2.bf16.msra.mxu0 %v7851_v44  ;;  %v7898_v44 = vld [vmem:[%s11163_s1 + $0x46c] ss:$16 sps:$4 sm:$0xff]  }
 0x1b4   :  { %5409 = vmatpush2.bf16.msra.mxu1 %v7848_v47  ;;  %5443 = vmatprep.subr.bf16.mxu0 %v7859_v46  ;;  %v7893_v47 = vld [vmem:[%s11163_s1 + $0x488] ss:$16 sps:$4 sm:$0xff]  }
 0x1b5   :  { %5410 = vmatprep.subr.bf16.mxu1 %v7856_v45  ;;  %v7901_v45 = vld [vmem:[%s11163_s1 + $0x6ec] ss:$16 sps:$4 sm:$0xff]   ;;  %v7896_v46 = vld [vmem:[%s11163_s1 + $0x468] ss:$16 sps:$4 sm:$0xff]  }
 0x1b7   :  { %5444 = vmatpush2.bf16.msra.mxu0 %v7857_v50  ;;  %v7904_v50 = vld [vmem:[%s11163_s1 + $0x44c] ss:$16 sps:$4 sm:$0xff]  }
 0x1b8   :  { %5411 = vmatpush2.bf16.msra.mxu1 %v7854_v49  ;;  %5445 = vmatprep.subr.bf16.mxu0 %v7865_v53  ;;  %v7899_v49 = vld [vmem:[%s11163_s1 + $0x6e8] ss:$16 sps:$4 sm:$0xff]  }
 0x1b9   :  { %5412 = vmatprep.subr.bf16.mxu1 %v7862_v52  ;;  %v7907_v52 = vld [vmem:[%s11163_s1 + $0x6cc] ss:$16 sps:$4 sm:$0xff]   ;;  %v7902_v53 = vld [vmem:[%s11163_s1 + $0x448] ss:$16 sps:$4 sm:$0xff]  }
 0x1bb   :  { %5446 = vmatpush2.bf16.msra.mxu0 %v7863_v56  ;;  %v7910_v56 = vld [vmem:[%s11163_s1 + $0x42c] ss:$16 sps:$4 sm:$0xff]  }
 0x1bc   :  { %5413 = vmatpush2.bf16.msra.mxu1 %v7860_v55  ;;  %5447 = vmatprep.subr.bf16.mxu0 %v7871_v58  ;;  %v7905_v55 = vld [vmem:[%s11163_s1 + $0x6c8] ss:$16 sps:$4 sm:$0xff]  }
 0x1bd   :  { %5414 = vmatprep.subr.bf16.mxu1 %v7868_v57  ;;  %v7908_v57 = vld [vmem:[%s11163_s1 + $0x428] ss:$16 sps:$4 sm:$0xff]  }
 0x1be   :  { %v7911_v58 = vld [vmem:[%s11163_s1 + $0x6a8] ss:$16 sps:$4 sm:$0xff]  }
 0x1bf   :  { %5448 = vmatpush2.bf16.msra.mxu0 %v7869_v62  ;;  %v7914_v62 = vld [vmem:[%s11163_s1 + $0x408] ss:$16 sps:$4 sm:$0xff]  }
 0x1c0   :  { %5415 = vmatpush2.bf16.msra.mxu1 %v7866_v61  ;;  %5449 = vmatprep.subr.bf16.mxu0 %v7874_v35  ;;  %v7916_v61 = vld [vmem:[%s11163_s1 + $0x40c] ss:$16 sps:$4 sm:$0xff]   ;;  %v7917_v35 = vld [vmem:[%s11163_s1 + $0x688] ss:$16 sps:$4 sm:$0xff]  }
 0x1c1   :  { %5466 = vmatprep.subr.bf16.mxu1 %v7877_v40  ;;  %v7922_v40 = vld [vmem:[%s11163_s1 + $0x5ec] ss:$16 sps:$4 sm:$0xff]  }
 0x1c2   :  { %v5131_v14 = vpop.f32.mrf.mxu0 }
 0x1c3   :  { %v5172_v15 = vpop.f32.mrf.mxu1  ;;  %5417 = vmatmul.mubr.bf16.vlgmr.msra.gmra.mxu1 %v8655_v6  ;;  %v5132_v18 = vadd.f32 %v5131_v14, %v9814_v27  ;;  %5450 = vmatpush2.bf16.msra.mxu0 %v7872_v51  ;;  %v7884_v27 = vld [vmem:[%s11163_s1 + $0x328] ss:$16 sps:$4 sm:$0xff]   ;;  %v7925_v51 = vld [vmem:[%s11163_s1 + $0x66c] ss:$16 sps:$4 sm:$0xff]  }
 0x1c4   :  { %5467 = vmatpush1.bf16.msra.mxu1 %v7875_v11  ;;  %v5133_v19 = vpop.f32.mrf.mxu0  ;;  %5451 = vmatprep.subr.bf16.mxu0 %v7880_v12  ;;  %v7920_v11 = vld [vmem:[%s11163_s1 + $0x5e8] ss:$16 sps:$4 sm:$0xff]  }
 0x1c5   :  { %v5174_v21 = vpop.f32.mrf.mxu1  ;;  %5468 = vmatprep.subr.bf16.mxu1 %v7883_v59  ;;  %v10020_v20 = vadd.f32 %v5172_v15, %v5132_v18  ;;  %v5134_v6 = vadd.f32 %v5133_v19, %v9825_v34  ;;  %5498 = vmatprep.mubr.bf16.mxu1 %v8751_v36  ;;  %v7892_v34 = vld [vmem:[%s11163_s1 + $0x30c] ss:$16 sps:$4 sm:$0xff]   ;;  %v7890_v36 = vld [vmem:[%s11163_s1 + $0x308] ss:$16 sps:$4 sm:$0xff]  }
 0x1c6   :  { %v5135_v31 = vpop.f32.mrf.mxu0  ;;  %v7923_v12 = vld [vmem:[%s11163_s1 + $0x668] ss:$16 sps:$4 sm:$0xff]   ;;  %v7928_v59 = vld [vmem:[%s11163_s1 + $0x5cc] ss:$16 sps:$4 sm:$0xff]  }
 0x1c7   :  { %v5176_v33 = vpop.f32.mrf.mxu1  ;;  %v10030_v30 = vadd.f32 %v5174_v21, %v5134_v6  ;;  %5452 = vmatpush2.bf16.msra.mxu0 %v7878_v60  ;;  %v7931_v60 = vld [vmem:[%s11163_s1 + $0x64c] ss:$16 sps:$4 sm:$0xff]   ;;  %v7929_v14 = vld [vmem:[%s11163_s1 + $0x648] ss:$16 sps:$4 sm:$0xff]  }
 0x1c8   :  { %5469 = vmatpush1.bf16.msra.mxu1 %v7881_v13  ;;  %v5136_v41 = vpop.f32.mrf.mxu0  ;;  %5453 = vmatprep.subr.bf16.mxu0 %v7886_v26  ;;  %v7926_v13 = vld [vmem:[%s11163_s1 + $0x5c8] ss:$16 sps:$4 sm:$0xff]   ;;  %v7934_v15 = vld [vmem:[%s11163_s1 + $0x5ac] ss:$16 sps:$4 sm:$0xff]  }
 0x1c9   :  { %v5177_v22 = vpop.f32.mrf.mxu1  ;;  %5470 = vmatprep.subr.bf16.mxu1 %v7889_v28  ;;  %v7937_v18 = vld [vmem:[%s11163_s1 + $0x62c] ss:$16 sps:$4 sm:$0xff]   ;;  %v7932_v19 = vld [vmem:[%s11163_s1 + $0x5a8] ss:$16 sps:$4 sm:$0xff]  }
 0x1ca   :  { %v7935_v21 = vld [vmem:[%s11163_s1 + $0x628] ss:$16 sps:$4 sm:$0xff]   ;;  %v7940_v26 = vld [vmem:[%s11163_s1 + $0x58c] ss:$16 sps:$4 sm:$0xff]  }
 0x1cb   :  { %5454 = vmatpush2.bf16.msra.mxu0 %v7884_v27  ;;  %v7943_v28 = vld [vmem:[%s11163_s1 + $0x60c] ss:$16 sps:$4 sm:$0xff]   ;;  %v7938_v6 = vld [vmem:[%s11163_s1 + $0x588] ss:$16 sps:$4 sm:$0xff]  }
 0x1cc   :  { %5471 = vmatpush1.bf16.msra.mxu1 %v7887_v29  ;;  %5455 = vmatprep.subr.bf16.mxu0 %v7892_v34  ;;  %v7941_v27 = vld [vmem:[%s11163_s1 + $0x608] ss:$16 sps:$4 sm:$0xff]   ;;  %v7946_v29 = vld [vmem:[%s11163_s1 + $0x56c] ss:$16 sps:$4 sm:$0xff]  }
 0x1cd   :  { %5472 = vmatprep.subr.bf16.mxu1 %v7895_v23  ;;  %v7949_v31 = vld [vmem:[%s11163_s1 + $0x7ec] ss:$16 sps:$4 sm:$0xff]   ;;  %v7944_v33 = vld [vmem:[%s11163_s1 + $0x568] ss:$16 sps:$4 sm:$0xff]  }
 0x1ce   :  { %v7947_v41 = vld [vmem:[%s11163_s1 + $0x7e8] ss:$16 sps:$4 sm:$0xff]   ;;  %v7952_v22 = vld [vmem:[%s11163_s1 + $0x54c] ss:$16 sps:$4 sm:$0xff]  }
 0x1cf   :  { %5456 = vmatpush2.bf16.msra.mxu0 %v7890_v36  ;;  %v7955_v34 = vld [vmem:[%s11163_s1 + $0x7cc] ss:$16 sps:$4 sm:$0xff]   ;;  %v7950_v23 = vld [vmem:[%s11163_s1 + $0x548] ss:$16 sps:$4 sm:$0xff]  }
 0x1d0   :  { %5473 = vmatpush1.bf16.msra.mxu1 %v7893_v47  ;;  %5507 = vmatprep.subr.bf16.mxu0 %v7901_v45  ;;  %v7953_v36 = vld [vmem:[%s11163_s1 + $0x7c8] ss:$16 sps:$4 sm:$0xff]   ;;  %v7958_v47 = vld [vmem:[%s11163_s1 + $0x52c] ss:$16 sps:$4 sm:$0xff]  }
 0x1d1   :  { %5474 = vmatprep.subr.bf16.mxu1 %v7898_v44  ;;  %v7961_v44 = vld [vmem:[%s11163_s1 + $0x7ac] ss:$16 sps:$4 sm:$0xff]   ;;  %v7956_v45 = vld [vmem:[%s11163_s1 + $0x528] ss:$16 sps:$4 sm:$0xff]  }
 0x1d2   :  { %5458 = vmatmul.mubr.bf16.vlgmr.msra.gmra.mxu0 %v8657_v7  ;;  %v7913_v7 = vld [vmem:[%s11163_s1 + $0x6ac] ss:$16 sps:$4 sm:$0xff]  }
 0x1d3   :  { %5508 = vmatpush1.bf16.msra.mxu0 %v7899_v49  ;;  %5539 = vmatprep.mubr.bf16.mxu0 %v8755_v37  ;;  %v7919_v37 = vld [vmem:[%s11163_s1 + $0x68c] ss:$16 sps:$4 sm:$0xff]  }
 0x1d4   :  { %5475 = vmatpush1.bf16.msra.mxu1 %v7896_v46  ;;  %5509 = vmatprep.subr.bf16.mxu0 %v7907_v52  ;;  %v7959_v46 = vld [vmem:[%s11163_s1 + $0x7a8] ss:$16 sps:$4 sm:$0xff]   ;;  %v7964_v49 = vld [vmem:[%s11163_s1 + $0x50c] ss:$16 sps:$4 sm:$0xff]  }
 0x1d5   :  { %5476 = vmatprep.subr.bf16.mxu1 %v7904_v50  ;;  %v7967_v50 = vld [vmem:[%s11163_s1 + $0x78c] ss:$16 sps:$4 sm:$0xff]   ;;  %v7962_v52 = vld [vmem:[%s11163_s1 + $0x508] ss:$16 sps:$4 sm:$0xff]  }
 0x1d7   :  { %5510 = vmatpush1.bf16.msra.mxu0 %v7905_v55  ;;  %v7970_v55 = vld [vmem:[%s11163_s1 + $0x76c] ss:$16 sps:$4 sm:$0xff]  }
 0x1d8   :  { %5477 = vmatpush1.bf16.msra.mxu1 %v7902_v53  ;;  %5511 = vmatprep.subr.bf16.mxu0 %v7913_v7  ;;  %v7965_v53 = vld [vmem:[%s11163_s1 + $0x788] ss:$16 sps:$4 sm:$0xff]  }
 0x1d9   :  { %5478 = vmatprep.subr.bf16.mxu1 %v7910_v56  ;;  %v7973_v56 = vld [vmem:[%s11163_s1 + $0x8ec] ss:$16 sps:$4 sm:$0xff]   ;;  %v7968_v7 = vld [vmem:[%s11163_s1 + $0x768] ss:$16 sps:$4 sm:$0xff]  }
 0x1db   :  { %5512 = vmatpush1.bf16.msra.mxu0 %v7911_v58  ;;  %v7976_v58 = vld [vmem:[%s11163_s1 + $0x74c] ss:$16 sps:$4 sm:$0xff]  }
 0x1dc   :  { %5479 = vmatpush1.bf16.msra.mxu1 %v7908_v57  ;;  %5513 = vmatprep.subr.bf16.mxu0 %v7919_v37  ;;  %v7971_v57 = vld [vmem:[%s11163_s1 + $0x8e8] ss:$16 sps:$4 sm:$0xff]  }
 0x1dd   :  { %5480 = vmatprep.subr.bf16.mxu1 %v7916_v61  ;;  %v7979_v61 = vld [vmem:[%s11163_s1 + $0x8cc] ss:$16 sps:$4 sm:$0xff]  }
 0x1df   :  { %5514 = vmatpush1.bf16.msra.mxu0 %v7917_v35 }
 0x1e0   :  { %5481 = vmatpush1.bf16.msra.mxu1 %v7914_v62  ;;  %5515 = vmatprep.subr.bf16.mxu0 %v7925_v51  ;;  %v7977_v51 = vld [vmem:[%s11163_s1 + $0x8c8] ss:$16 sps:$4 sm:$0xff]  }
 0x1e1   :  { %5482 = vmatprep.subr.bf16.mxu1 %v7922_v40  ;;  %v7974_v40 = vld [vmem:[%s11163_s1 + $0x748] ss:$16 sps:$4 sm:$0xff]  }
 0x1e3   :  { %5516 = vmatpush1.bf16.msra.mxu0 %v7923_v12 }
 0x1e4   :  { %5483 = vmatpush2.bf16.msra.mxu1 %v7920_v11  ;;  %5517 = vmatprep.subr.bf16.mxu0 %v7931_v60 }
 0x1e5   :  { %5484 = vmatprep.subr.bf16.mxu1 %v7928_v59 }
 0x1e7   :  { %5518 = vmatpush1.bf16.msra.mxu0 %v7929_v14 }
 0x1e8   :  { %5485 = vmatpush2.bf16.msra.mxu1 %v7926_v13  ;;  %5519 = vmatprep.subr.bf16.mxu0 %v7937_v18  ;;  %v7980_v18 = vld [vmem:[%s11163_s1 + $0x728] ss:$16 sps:$4 sm:$0xff]  }
 0x1e9   :  { %5486 = vmatprep.subr.bf16.mxu1 %v7934_v15 }
 0x1eb   :  { %5520 = vmatpush1.bf16.msra.mxu0 %v7935_v21 }
 0x1ec   :  { %5487 = vmatpush2.bf16.msra.mxu1 %v7932_v19  ;;  %5521 = vmatprep.subr.bf16.mxu0 %v7943_v28  ;;  %v7983_v19 = vld [vmem:[%s11163_s1 + $0x8a8] ss:$16 sps:$4 sm:$0xff]  }
 0x1ed   :  { %5488 = vmatprep.subr.bf16.mxu1 %v7940_v26  ;;  %v7986_v28 = vld [vmem:[%s11163_s1 + $0x708] ss:$16 sps:$4 sm:$0xff]  }
 0x1ef   :  { %5522 = vmatpush1.bf16.msra.mxu0 %v7941_v27  ;;  %v7994_v27 = vld [vmem:[%s11163_s1 + $0x86c] ss:$16 sps:$4 sm:$0xff]  }
 0x1f0   :  { %5489 = vmatpush2.bf16.msra.mxu1 %v7938_v6  ;;  %5523 = vmatprep.subr.bf16.mxu0 %v7949_v31  ;;  %v7989_v6 = vld [vmem:[%s11163_s1 + $0x888] ss:$16 sps:$4 sm:$0xff]  }
 0x1f1   :  { %5490 = vmatprep.subr.bf16.mxu1 %v7946_v29  ;;  %v7997_v29 = vld [vmem:[%s11163_s1 + $0xaec] ss:$16 sps:$4 sm:$0xff]   ;;  %v7992_v31 = vld [vmem:[%s11163_s1 + $0x868] ss:$16 sps:$4 sm:$0xff]  }
 0x1f3   :  { %5524 = vmatpush2.bf16.msra.mxu0 %v7947_v41  ;;  %v8000_v41 = vld [vmem:[%s11163_s1 + $0x84c] ss:$16 sps:$4 sm:$0xff]  }
 0x1f4   :  { %5491 = vmatpush2.bf16.msra.mxu1 %v7944_v33  ;;  %5525 = vmatprep.subr.bf16.mxu0 %v7955_v34  ;;  %v7995_v33 = vld [vmem:[%s11163_s1 + $0xae8] ss:$16 sps:$4 sm:$0xff]  }
 0x1f5   :  { %5492 = vmatprep.subr.bf16.mxu1 %v7952_v22  ;;  %v8003_v22 = vld [vmem:[%s11163_s1 + $0xacc] ss:$16 sps:$4 sm:$0xff]   ;;  %v7998_v34 = vld [vmem:[%s11163_s1 + $0x848] ss:$16 sps:$4 sm:$0xff]  }
 0x1f7   :  { %5526 = vmatpush2.bf16.msra.mxu0 %v7953_v36  ;;  %v8006_v36 = vld [vmem:[%s11163_s1 + $0x82c] ss:$16 sps:$4 sm:$0xff]  }
 0x1f8   :  { %5493 = vmatpush2.bf16.msra.mxu1 %v7950_v23  ;;  %5527 = vmatprep.subr.bf16.mxu0 %v7961_v44  ;;  %v8001_v23 = vld [vmem:[%s11163_s1 + $0xac8] ss:$16 sps:$4 sm:$0xff]  }
 0x1f9   :  { %5494 = vmatprep.subr.bf16.mxu1 %v7958_v47  ;;  %v8004_v47 = vld [vmem:[%s11163_s1 + $0x828] ss:$16 sps:$4 sm:$0xff]  }
 0x1fa   :  { %v8007_v44 = vld [vmem:[%s11163_s1 + $0xaa8] ss:$16 sps:$4 sm:$0xff]  }
 0x1fb   :  { %5528 = vmatpush2.bf16.msra.mxu0 %v7959_v46  ;;  %v8010_v46 = vld [vmem:[%s11163_s1 + $0x808] ss:$16 sps:$4 sm:$0xff]  }
 0x1fc   :  { %5495 = vmatpush2.bf16.msra.mxu1 %v7956_v45  ;;  %5529 = vmatprep.subr.bf16.mxu0 %v7967_v50  ;;  %v8012_v45 = vld [vmem:[%s11163_s1 + $0x80c] ss:$16 sps:$4 sm:$0xff]  }
 0x1fd   :  { %5496 = vmatprep.subr.bf16.mxu1 %v7964_v49  ;;  %v8013_v49 = vld [vmem:[%s11163_s1 + $0xa88] ss:$16 sps:$4 sm:$0xff]   ;;  %v8018_v50 = vld [vmem:[%s11163_s1 + $0x9ec] ss:$16 sps:$4 sm:$0xff]  }
 0x1ff   :  { %5530 = vmatpush2.bf16.msra.mxu0 %v7965_v53  ;;  %v8016_v53 = vld [vmem:[%s11163_s1 + $0x9e8] ss:$16 sps:$4 sm:$0xff]  }
 0x200   :  { %5497 = vmatpush2.bf16.msra.mxu1 %v7962_v52  ;;  %5531 = vmatprep.subr.bf16.mxu0 %v7970_v55  ;;  %v8021_v52 = vld [vmem:[%s11163_s1 + $0xa6c] ss:$16 sps:$4 sm:$0xff]   ;;  %v8019_v55 = vld [vmem:[%s11163_s1 + $0xa68] ss:$16 sps:$4 sm:$0xff]  }
 0x201   :  { %5548 = vmatprep.subr.bf16.mxu1 %v7973_v56  ;;  %v8024_v56 = vld [vmem:[%s11163_s1 + $0x9cc] ss:$16 sps:$4 sm:$0xff]  }
 0x202   :  { %v5213_v37 = vpop.f32.mrf.mxu0 }
 0x203   :  { %v5254_v62 = vpop.f32.mrf.mxu1  ;;  %5499 = vmatmul.mubr.bf16.vlgmr.msra.gmra.mxu1 %v8875_v16  ;;  %v5214_v35 = vadd.f32 %v5213_v37, %v10020_v20  ;;  %5532 = vmatpush2.bf16.msra.mxu0 %v7968_v7  ;;  %v7982_v16 = vld [vmem:[%s11163_s1 + $0x72c] ss:$16 sps:$4 sm:$0xff]  }
 0x204   :  { %5549 = vmatpush1.bf16.msra.mxu1 %v7971_v57  ;;  %v5215_v11 = vpop.f32.mrf.mxu0  ;;  %5533 = vmatprep.subr.bf16.mxu0 %v7976_v58  ;;  %v7985_v20 = vld [vmem:[%s11163_s1 + $0x8ac] ss:$16 sps:$4 sm:$0xff]   ;;  %v8022_v57 = vld [vmem:[%s11163_s1 + $0x9c8] ss:$16 sps:$4 sm:$0xff]  }
 0x205   :  { %v5256_v12 = vpop.f32.mrf.mxu1  ;;  %5550 = vmatprep.subr.bf16.mxu1 %v7979_v61  ;;  %v10222_v59 = vadd.f32 %v5254_v62, %v5214_v35  ;;  %v5216_v60 = vadd.f32 %v5215_v11, %v10030_v30  ;;  %5580 = vmatprep.mubr.bf16.mxu1 %v8905_v24  ;;  %v7988_v24 = vld [vmem:[%s11163_s1 + $0x70c] ss:$16 sps:$4 sm:$0xff]   ;;  %v8025_v58 = vld [vmem:[%s11163_s1 + $0xa48] ss:$16 sps:$4 sm:$0xff]  }
 0x206   :  { %v5217_v13 = vpop.f32.mrf.mxu0  ;;  %v7991_v30 = vld [vmem:[%s11163_s1 + $0x88c] ss:$16 sps:$4 sm:$0xff]   ;;  %v8028_v62 = vld [vmem:[%s11163_s1 + $0x9a8] ss:$16 sps:$4 sm:$0xff]  }
 0x207   :  { %v5258_v14 = vpop.f32.mrf.mxu1  ;;  %v10226_v15 = vadd.f32 %v5256_v12, %v5216_v60  ;;  %5534 = vmatpush2.bf16.msra.mxu0 %v7974_v40  ;;  %v8027_v7 = vld [vmem:[%s11163_s1 + $0xa4c] ss:$16 sps:$4 sm:$0xff]   ;;  %v8031_v35 = vld [vmem:[%s11163_s1 + $0xa28] ss:$16 sps:$4 sm:$0xff]  }
 0x208   :  { %5551 = vmatpush1.bf16.msra.mxu1 %v7977_v51  ;;  %v5218_v21 = vpop.f32.mrf.mxu0  ;;  %5535 = vmatprep.subr.bf16.mxu0 %v7982_v16  ;;  %v8030_v61 = vld [vmem:[%s11163_s1 + $0x9ac] ss:$16 sps:$4 sm:$0xff]   ;;  %v8034_v11 = vld [vmem:[%s11163_s1 + $0x988] ss:$16 sps:$4 sm:$0xff]  }
 0x209   :  { %v5259_v26 = vpop.f32.mrf.mxu1  ;;  %5552 = vmatprep.subr.bf16.mxu1 %v7985_v20  ;;  %v8033_v37 = vld [vmem:[%s11163_s1 + $0xa2c] ss:$16 sps:$4 sm:$0xff]   ;;  %v8037_v12 = vld [vmem:[%s11163_s1 + $0xa08] ss:$16 sps:$4 sm:$0xff]  }
 0x20a   :  { %v8036_v40 = vld [vmem:[%s11163_s1 + $0x98c] ss:$16 sps:$4 sm:$0xff]   ;;  %v8040_v60 = vld [vmem:[%s11163_s1 + $0x968] ss:$16 sps:$4 sm:$0xff]  }
 0x20b   :  { %5536 = vmatpush2.bf16.msra.mxu0 %v7980_v18  ;;  %v8039_v51 = vld [vmem:[%s11163_s1 + $0xa0c] ss:$16 sps:$4 sm:$0xff]   ;;  %v8043_v13 = vld [vmem:[%s11163_s1 + $0xbe8] ss:$16 sps:$4 sm:$0xff]  }
 0x20c   :  { %5553 = vmatpush1.bf16.msra.mxu1 %v7983_v19  ;;  %5537 = vmatprep.subr.bf16.mxu0 %v7988_v24  ;;  %v8042_v16 = vld [vmem:[%s11163_s1 + $0x96c] ss:$16 sps:$4 sm:$0xff]   ;;  %v8046_v19 = vld [vmem:[%s11163_s1 + $0x948] ss:$16 sps:$4 sm:$0xff]  }
 0x20d   :  { %5554 = vmatprep.subr.bf16.mxu1 %v7991_v30  ;;  %v8045_v20 = vld [vmem:[%s11163_s1 + $0xbec] ss:$16 sps:$4 sm:$0xff]   ;;  %v8049_v21 = vld [vmem:[%s11163_s1 + $0xbc8] ss:$16 sps:$4 sm:$0xff]  }
 0x20e   :  { %v8048_v14 = vld [vmem:[%s11163_s1 + $0x94c] ss:$16 sps:$4 sm:$0xff]   ;;  %v8052_v30 = vld [vmem:[%s11163_s1 + $0x928] ss:$16 sps:$4 sm:$0xff]  }
 0x20f   :  { %5538 = vmatpush2.bf16.msra.mxu0 %v7986_v28  ;;  %v8051_v18 = vld [vmem:[%s11163_s1 + $0xbcc] ss:$16 sps:$4 sm:$0xff]   ;;  %v8055_v28 = vld [vmem:[%s11163_s1 + $0xba8] ss:$16 sps:$4 sm:$0xff]  }
 0x210   :  { %5555 = vmatpush1.bf16.msra.mxu1 %v7989_v6  ;;  %5589 = vmatprep.subr.bf16.mxu0 %v7997_v29  ;;  %v8054_v26 = vld [vmem:[%s11163_s1 + $0x92c] ss:$16 sps:$4 sm:$0xff]   ;;  %v8058_v29 = vld [vmem:[%s11163_s1 + $0x908] ss:$16 sps:$4 sm:$0xff]  }
 0x211   :  { %5556 = vmatprep.subr.bf16.mxu1 %v7994_v27  ;;  %v8057_v24 = vld [vmem:[%s11163_s1 + $0xbac] ss:$16 sps:$4 sm:$0xff]  }
 0x212   :  { %5540 = vmatmul.mubr.bf16.vlgmr.msra.gmra.mxu0 %v8879_v17  ;;  %v8009_v17 = vld [vmem:[%s11163_s1 + $0xaac] ss:$16 sps:$4 sm:$0xff]  }
 0x213   :  { %5590 = vmatpush1.bf16.msra.mxu0 %v7995_v33  ;;  %5621 = vmatprep.mubr.bf16.mxu0 %v8909_v25  ;;  %v8015_v25 = vld [vmem:[%s11163_s1 + $0xa8c] ss:$16 sps:$4 sm:$0xff]  }
 0x214   :  { %5557 = vmatpush1.bf16.msra.mxu1 %v7992_v31  ;;  %5591 = vmatprep.subr.bf16.mxu0 %v8003_v22  ;;  %v8060_v6 = vld [vmem:[%s11163_s1 + $0x90c] ss:$16 sps:$4 sm:$0xff]   ;;  %v8061_v31 = vld [vmem:[%s11163_s1 + $0xb88] ss:$16 sps:$4 sm:$0xff]  }
 0x215   :  { %5558 = vmatprep.subr.bf16.mxu1 %v8000_v41  ;;  %v8063_v27 = vld [vmem:[%s11163_s1 + $0xb8c] ss:$16 sps:$4 sm:$0xff]   ;;  %v8064_v22 = vld [vmem:[%s11163_s1 + $0xb68] ss:$16 sps:$4 sm:$0xff]  }
 0x216   :  { %v8066_v33 = vld [vmem:[%s11163_s1 + $0xb6c] ss:$16 sps:$4 sm:$0xff]  }
 0x217   :  { %5592 = vmatpush1.bf16.msra.mxu0 %v8001_v23  ;;  %v8069_v41 = vld [vmem:[%s11163_s1 + $0xcec] ss:$16 sps:$4 sm:$0xff]  }
 0x218   :  { %5559 = vmatpush1.bf16.msra.mxu1 %v7998_v34  ;;  %5593 = vmatprep.subr.bf16.mxu0 %v8009_v17  ;;  %v8067_v34 = vld [vmem:[%s11163_s1 + $0xce8] ss:$16 sps:$4 sm:$0xff]   ;;  %v8072_v23 = vld [vmem:[%s11163_s1 + $0xb4c] ss:$16 sps:$4 sm:$0xff]  }
 0x219   :  { %5560 = vmatprep.subr.bf16.mxu1 %v8006_v36  ;;  %v8075_v36 = vld [vmem:[%s11163_s1 + $0xccc] ss:$16 sps:$4 sm:$0xff]  }
 0x21b   :  { %5594 = vmatpush1.bf16.msra.mxu0 %v8007_v44 }
 0x21c   :  { %5561 = vmatpush1.bf16.msra.mxu1 %v8004_v47  ;;  %5595 = vmatprep.subr.bf16.mxu0 %v8015_v25  ;;  %v8073_v25 = vld [vmem:[%s11163_s1 + $0xcc8] ss:$16 sps:$4 sm:$0xff]  }
 0x21d   :  { %5562 = vmatprep.subr.bf16.mxu1 %v8012_v45  ;;  %v8070_v45 = vld [vmem:[%s11163_s1 + $0xb48] ss:$16 sps:$4 sm:$0xff]  }
 0x21f   :  { %5596 = vmatpush1.bf16.msra.mxu0 %v8013_v49 }
 0x220   :  { %5563 = vmatpush1.bf16.msra.mxu1 %v8010_v46  ;;  %5597 = vmatprep.subr.bf16.mxu0 %v8021_v52 }
 0x221   :  { %5564 = vmatprep.subr.bf16.mxu1 %v8018_v50 }
 0x223   :  { %5598 = vmatpush1.bf16.msra.mxu0 %v8019_v55 }
 0x224   :  { %5565 = vmatpush2.bf16.msra.mxu1 %v8016_v53  ;;  %5599 = vmatprep.subr.bf16.mxu0 %v8027_v7  ;;  %v8076_v7 = vld [vmem:[%s11163_s1 + $0xb28] ss:$16 sps:$4 sm:$0xff]  }
 0x225   :  { %5566 = vmatprep.subr.bf16.mxu1 %v8024_v56 }
 0x227   :  { %5600 = vmatpush1.bf16.msra.mxu0 %v8025_v58 }
 0x228   :  { %5567 = vmatpush2.bf16.msra.mxu1 %v8022_v57  ;;  %5601 = vmatprep.subr.bf16.mxu0 %v8033_v37  ;;  %v8079_v57 = vld [vmem:[%s11163_s1 + $0xca8] ss:$16 sps:$4 sm:$0xff]  }
 0x229   :  { %5568 = vmatprep.subr.bf16.mxu1 %v8030_v61  ;;  %v8082_v37 = vld [vmem:[%s11163_s1 + $0xb08] ss:$16 sps:$4 sm:$0xff]  }
 0x22b   :  { %5602 = vmatpush1.bf16.msra.mxu0 %v8031_v35  ;;  %v8090_v35 = vld [vmem:[%s11163_s1 + $0xc6c] ss:$16 sps:$4 sm:$0xff]  }
 0x22c   :  { %5569 = vmatpush2.bf16.msra.mxu1 %v8028_v62  ;;  %5603 = vmatprep.subr.bf16.mxu0 %v8039_v51  ;;  %v8085_v62 = vld [vmem:[%s11163_s1 + $0xc88] ss:$16 sps:$4 sm:$0xff]  }
 0x22d   :  { %5570 = vmatprep.subr.bf16.mxu1 %v8036_v40  ;;  %v8093_v40 = vld [vmem:[%s11163_s1 + $0xeec] ss:$16 sps:$4 sm:$0xff]   ;;  %v8088_v51 = vld [vmem:[%s11163_s1 + $0xc68] ss:$16 sps:$4 sm:$0xff]  }
 0x22f   :  { %5604 = vmatpush1.bf16.msra.mxu0 %v8037_v12  ;;  %v8096_v12 = vld [vmem:[%s11163_s1 + $0xc4c] ss:$16 sps:$4 sm:$0xff]  }
 0x230   :  { %5571 = vmatpush2.bf16.msra.mxu1 %v8034_v11  ;;  %5605 = vmatprep.subr.bf16.mxu0 %v8045_v20  ;;  %v8091_v11 = vld [vmem:[%s11163_s1 + $0xee8] ss:$16 sps:$4 sm:$0xff]  }
 0x231   :  { %5572 = vmatprep.subr.bf16.mxu1 %v8042_v16  ;;  %v8099_v16 = vld [vmem:[%s11163_s1 + $0xecc] ss:$16 sps:$4 sm:$0xff]  }
 0x233   :  { %5606 = vmatpush2.bf16.msra.mxu0 %v8043_v13  ;;  %v8094_v13 = vld [vmem:[%s11163_s1 + $0xc48] ss:$16 sps:$4 sm:$0xff]  }
 0x234   :  { %5573 = vmatpush2.bf16.msra.mxu1 %v8040_v60  ;;  %5607 = vmatprep.subr.bf16.mxu0 %v8051_v18 }
 0x235   :  { %5574 = vmatprep.subr.bf16.mxu1 %v8048_v14  ;;  %v8097_v14 = vld [vmem:[%s11163_s1 + $0xec8] ss:$16 sps:$4 sm:$0xff]  }
 0x237   :  { %5608 = vmatpush2.bf16.msra.mxu0 %v8049_v21 }
 0x238   :  { %5575 = vmatpush2.bf16.msra.mxu1 %v8046_v19  ;;  %5609 = vmatprep.subr.bf16.mxu0 %v8057_v24  ;;  %v8102_v19 = vld [vmem:[%s11163_s1 + $0xc2c] ss:$16 sps:$4 sm:$0xff]   ;;  %v8100_v24 = vld [vmem:[%s11163_s1 + $0xc28] ss:$16 sps:$4 sm:$0xff]  }
 0x239   :  { %5576 = vmatprep.subr.bf16.mxu1 %v8054_v26 }
 0x23b   :  { %5610 = vmatpush2.bf16.msra.mxu0 %v8055_v28 }
 0x23c   :  { %5577 = vmatpush2.bf16.msra.mxu1 %v8052_v30  ;;  %5611 = vmatprep.subr.bf16.mxu0 %v8063_v27  ;;  %v8103_v30 = vld [vmem:[%s11163_s1 + $0xea8] ss:$16 sps:$4 sm:$0xff]  }
 0x23d   :  { %5578 = vmatprep.subr.bf16.mxu1 %v8060_v6  ;;  %v8108_v6 = vld [vmem:[%s11163_s1 + $0xc0c] ss:$16 sps:$4 sm:$0xff]   ;;  %v8106_v27 = vld [vmem:[%s11163_s1 + $0xc08] ss:$16 sps:$4 sm:$0xff]  }
 0x23f   :  { %5612 = vmatpush2.bf16.msra.mxu0 %v8061_v31  ;;  %v8114_v31 = vld [vmem:[%s11163_s1 + $0xdec] ss:$16 sps:$4 sm:$0xff]  }
 0x240   :  { %5579 = vmatpush2.bf16.msra.mxu1 %v8058_v29  ;;  %5613 = vmatprep.subr.bf16.mxu0 %v8066_v33  ;;  %v8109_v29 = vld [vmem:[%s11163_s1 + $0xe88] ss:$16 sps:$4 sm:$0xff]   ;;  %v8117_v33 = vld [vmem:[%s11163_s1 + $0xe6c] ss:$16 sps:$4 sm:$0xff]  }
 0x241   :  { %5630 = vmatprep.subr.bf16.mxu1 %v8069_v41  ;;  %v8112_v41 = vld [vmem:[%s11163_s1 + $0xde8] ss:$16 sps:$4 sm:$0xff]  }
 0x242   :  { %v5295_v17 = vpop.f32.mrf.mxu0 }
 0x243   :  { %v5336_v47 = vpop.f32.mrf.mxu1  ;;  %5581 = vmatmul.mubr.bf16.vlgmr.msra.gmra.mxu1 %v9105_v38  ;;  %v5296_v44 = vadd.f32 %v5295_v17, %v10222_v59  ;;  %5614 = vmatpush2.bf16.msra.mxu0 %v8064_v22  ;;  %v8078_v38 = vld [vmem:[%s11163_s1 + $0xb2c] ss:$16 sps:$4 sm:$0xff]   ;;  %v8115_v22 = vld [vmem:[%s11163_s1 + $0xe68] ss:$16 sps:$4 sm:$0xff]  }
 0x244   :  { %5631 = vmatpush1.bf16.msra.mxu1 %v8067_v34  ;;  %v5297_v46 = vpop.f32.mrf.mxu0  ;;  %5615 = vmatprep.subr.bf16.mxu0 %v8072_v23  ;;  %v8081_v59 = vld [vmem:[%s11163_s1 + $0xcac] ss:$16 sps:$4 sm:$0xff]   ;;  %v8121_v17 = vld [vmem:[%s11163_s1 + $0xe48] ss:$16 sps:$4 sm:$0xff]  }
 0x245   :  { %v5338_v49 = vpop.f32.mrf.mxu1  ;;  %5632 = vmatprep.subr.bf16.mxu1 %v8075_v36  ;;  %v5337_v50 = vadd.f32 %v5336_v47, %v5296_v44  ;;  %v5298_v52 = vadd.f32 %v5297_v46, %v10226_v15  ;;  %5662 = vmatprep.mubr.bf16.mxu1 %v9127_v42  ;;  %v8084_v42 = vld [vmem:[%s11163_s1 + $0xb0c] ss:$16 sps:$4 sm:$0xff]   ;;  %v8118_v36 = vld [vmem:[%s11163_s1 + $0xdc8] ss:$16 sps:$4 sm:$0xff]  }
 0x246   :  { %v5299_v53 = vpop.f32.mrf.mxu0  ;;  %v8087_v15 = vld [vmem:[%s11163_s1 + $0xc8c] ss:$16 sps:$4 sm:$0xff]  }
 0x247   :  { %v5340_v55 = vpop.f32.mrf.mxu1  ;;  %v5339_v56 = vadd.f32 %v5338_v49, %v5298_v52  ;;  %5616 = vmatpush2.bf16.msra.mxu0 %v8070_v45  ;;  %v8120_v34 = vld [vmem:[%s11163_s1 + $0xdcc] ss:$16 sps:$4 sm:$0xff]   ;;  %v8124_v45 = vld [vmem:[%s11163_s1 + $0xda8] ss:$16 sps:$4 sm:$0xff]  }
 0x248   :  { %5633 = vmatpush1.bf16.msra.mxu1 %v8073_v25  ;;  %v5300_v58 = vpop.f32.mrf.mxu0  ;;  %5617 = vmatprep.subr.bf16.mxu0 %v8078_v38  ;;  %v8123_v23 = vld [vmem:[%s11163_s1 + $0xe4c] ss:$16 sps:$4 sm:$0xff]   ;;  %v8127_v25 = vld [vmem:[%s11163_s1 + $0xe28] ss:$16 sps:$4 sm:$0xff]  }
 0x249   :  { %v5341_v61 = vpop.f32.mrf.mxu1  ;;  %5634 = vmatprep.subr.bf16.mxu1 %v8081_v59  ;;  %v8126_v47 = vld [vmem:[%s11163_s1 + $0xdac] ss:$16 sps:$4 sm:$0xff]   ;;  %v8130_v38 = vld [vmem:[%s11163_s1 + $0xd88] ss:$16 sps:$4 sm:$0xff]  }
 0x24a   :  { %v8129_v44 = vld [vmem:[%s11163_s1 + $0xe2c] ss:$16 sps:$4 sm:$0xff]   ;;  %v8133_v59 = vld [vmem:[%s11163_s1 + $0xe08] ss:$16 sps:$4 sm:$0xff]  }
 0x24b   :  { %5618 = vmatpush2.bf16.msra.mxu0 %v8076_v7  ;;  %v8132_v46 = vld [vmem:[%s11163_s1 + $0xd8c] ss:$16 sps:$4 sm:$0xff]   ;;  %v8136_v53 = vld [vmem:[%s11163_s1 + $0xd68] ss:$16 sps:$4 sm:$0xff]  }
 0x24c   :  { %5635 = vmatpush1.bf16.msra.mxu1 %v8079_v57  ;;  %5619 = vmatprep.subr.bf16.mxu0 %v8084_v42  ;;  %v8135_v49 = vld [vmem:[%s11163_s1 + $0xe0c] ss:$16 sps:$4 sm:$0xff]   ;;  %v8139_v55 = vld [vmem:[%s11163_s1 + $0xfe8] ss:$16 sps:$4 sm:$0xff]  }
 0x24d   :  { %5636 = vmatprep.subr.bf16.mxu1 %v8087_v15  ;;  %v8141_v52 = vld [vmem:[%s11163_s1 + $0xfec] ss:$16 sps:$4 sm:$0xff]   ;;  %v8142_v57 = vld [vmem:[%s11163_s1 + $0xd48] ss:$16 sps:$4 sm:$0xff]  }
 0x24e   :  { %v8147_v7 = vld [vmem:[%s11163_s1 + $0xfcc] ss:$16 sps:$4 sm:$0xff]   ;;  %v8145_v58 = vld [vmem:[%s11163_s1 + $0xfc8] ss:$16 sps:$4 sm:$0xff]  }
 0x24f   :  { %5620 = vmatpush2.bf16.msra.mxu0 %v8082_v37  ;;  %v8150_v61 = vld [vmem:[%s11163_s1 + $0xd2c] ss:$16 sps:$4 sm:$0xff]   ;;  %v8148_v15 = vld [vmem:[%s11163_s1 + $0xd28] ss:$16 sps:$4 sm:$0xff]  }
 0x250   :  { %5637 = vmatpush1.bf16.msra.mxu1 %v8085_v62  ;;  %5671 = vmatprep.subr.bf16.mxu0 %v8093_v40  ;;  %v8153_v42 = vld [vmem:[%s11163_s1 + $0xfac] ss:$16 sps:$4 sm:$0xff]   ;;  %v8151_v37 = vld [vmem:[%s11163_s1 + $0xfa8] ss:$16 sps:$4 sm:$0xff]  }
 0x251   :  { %5638 = vmatprep.subr.bf16.mxu1 %v8090_v35  ;;  %v8156_v62 = vld [vmem:[%s11163_s1 + $0xd0c] ss:$16 sps:$4 sm:$0xff]   ;;  %v8154_v40 = vld [vmem:[%s11163_s1 + $0xd08] ss:$16 sps:$4 sm:$0xff]  }
 0x252   :  { %v5377_v20 = vpop.f32.mrf.mxu0  ;;  %5622 = vmatmul.mubr.bf16.vlgmr.msra.gmra.mxu0 %v9109_v39  ;;  %v8105_v39 = vld [vmem:[%s11163_s1 + $0xeac] ss:$16 sps:$4 sm:$0xff]  }
 0x253   :  { %v10463_v60 = vadd.f32 %v5377_v20, %v5337_v50  ;;  %5672 = vmatpush1.bf16.msra.mxu0 %v8091_v11  ;;  %5703 = vmatprep.mubr.bf16.mxu0 %v9131_v43  ;;  %v8111_v43 = vld [vmem:[%s11163_s1 + $0xe8c] ss:$16 sps:$4 sm:$0xff]   ;;  %v8163_v20 = vld [vmem:[%s11163_s1 + $0x10e8] ss:$16 sps:$4 sm:$0xff]  }
 0x254   :  { %5639 = vmatpush1.bf16.msra.mxu1 %v8088_v51  ;;  %v5379_v18 = vpop.f32.mrf.mxu0  ;;  %5673 = vmatprep.subr.bf16.mxu0 %v8099_v16  ;;  %v8138_v50 = vld [vmem:[%s11163_s1 + $0xd6c] ss:$16 sps:$4 sm:$0xff]   ;;  %v8157_v51 = vld [vmem:[%s11163_s1 + $0xf88] ss:$16 sps:$4 sm:$0xff]  }
 0x255   :  { %5640 = vmatprep.subr.bf16.mxu1 %v8096_v12  ;;  %v10477_v21 = vadd.f32 %v5379_v18, %v5339_v56  ;;  %v8144_v56 = vld [vmem:[%s11163_s1 + $0xd4c] ss:$16 sps:$4 sm:$0xff]   ;;  %v8160_v16 = vld [vmem:[%s11163_s1 + $0xf68] ss:$16 sps:$4 sm:$0xff]  }
 0x256   :  { %v5381_v26 = vpop.f32.mrf.mxu0  ;;  %v8159_v35 = vld [vmem:[%s11163_s1 + $0xf8c] ss:$16 sps:$4 sm:$0xff]  }
 0x257   :  { %5674 = vmatpush1.bf16.msra.mxu0 %v8097_v14  ;;  %v8162_v11 = vld [vmem:[%s11163_s1 + $0xf6c] ss:$16 sps:$4 sm:$0xff]  }
 0x258   :  { %5641 = vmatpush1.bf16.msra.mxu1 %v8094_v13  ;;  %v5382_v28 = vpop.f32.mrf.mxu0  ;;  %5675 = vmatprep.subr.bf16.mxu0 %v8105_v39  ;;  %v8165_v12 = vld [vmem:[%s11163_s1 + $0x10ec] ss:$16 sps:$4 sm:$0xff]   ;;  %v8169_v39 = vld [vmem:[%s11163_s1 + $0x10c8] ss:$16 sps:$4 sm:$0xff]  }
 0x259   :  { %5642 = vmatprep.subr.bf16.mxu1 %v8102_v19  ;;  %v8168_v13 = vld [vmem:[%s11163_s1 + $0xf4c] ss:$16 sps:$4 sm:$0xff]   ;;  %v8166_v19 = vld [vmem:[%s11163_s1 + $0xf48] ss:$16 sps:$4 sm:$0xff]  }
 0x25a   :  { %v8171_v14 = vld [vmem:[%s11163_s1 + $0x10cc] ss:$16 sps:$4 sm:$0xff]   ;;  %v8172_v28 = vld [vmem:[%s11163_s1 + $0xf28] ss:$16 sps:$4 sm:$0xff]  }
 0x25b   :  { %5676 = vmatpush1.bf16.msra.mxu0 %v8103_v30 }
 0x25c   :  { %5643 = vmatpush1.bf16.msra.mxu1 %v8100_v24  ;;  %5677 = vmatprep.subr.bf16.mxu0 %v8111_v43  ;;  %v8174_v24 = vld [vmem:[%s11163_s1 + $0xf2c] ss:$16 sps:$4 sm:$0xff]  }
 0x25d   :  { %5644 = vmatprep.subr.bf16.mxu1 %v8108_v6  ;;  %v8175_v6 = vld [vmem:[%s11163_s1 + $0x10a8] ss:$16 sps:$4 sm:$0xff]  }
 0x25f   :  { %5678 = vmatpush1.bf16.msra.mxu0 %v8109_v29  ;;  %v830_v29 = vsub.s32 2, %v9303_v54 }
 0x260   :  { %5645 = vmatpush1.bf16.msra.mxu1 %v8106_v27  ;;  %5679 = vmatprep.subr.bf16.mxu0 %v8117_v33  ;;  %v8180_v27 = vld [vmem:[%s11163_s1 + $0xf0c] ss:$16 sps:$4 sm:$0xff]   ;;  %v8178_v33 = vld [vmem:[%s11163_s1 + $0xf08] ss:$16 sps:$4 sm:$0xff]  }
 0x261   :  { %5646 = vmatprep.subr.bf16.mxu1 %v8114_v31  ;;  %v834_v31 = vsub.s32 3, %v9303_v54  ;;  %v8189_v54 = vld [vmem:[%s11163_s1 + $0x12ec] ss:$16 sps:$4 sm:$0xff]  }
 0x263   :  { %5680 = vmatpush1.bf16.msra.mxu0 %v8115_v22  ;;  %v8186_v22 = vld [vmem:[%s11163_s1 + $0x106c] ss:$16 sps:$4 sm:$0xff]  }
 0x264   :  { %5647 = vmatpush2.bf16.msra.mxu1 %v8112_v41  ;;  %5681 = vmatprep.subr.bf16.mxu0 %v8123_v23  ;;  %v8181_v41 = vld [vmem:[%s11163_s1 + $0x1088] ss:$16 sps:$4 sm:$0xff]  }
 0x265   :  { %5648 = vmatprep.subr.bf16.mxu1 %v8120_v34  ;;  %v8412_v34 = vld [vmem:[%s11165_s2] sm:$0xf] }
 0x266   :  { %v831_v23 = vrot.slane %v8412_v34, %v830_v29  ;;  %v8241_v29 = vld [vmem:[%s11163_s1 + $0x13c8] ss:$16 sps:$4 sm:$0xff]  }
 0x267   :  { %5682 = vmatpush1.bf16.msra.mxu0 %v8121_v17  ;;  %v8184_v17 = vld [vmem:[%s11163_s1 + $0x1068] ss:$16 sps:$4 sm:$0xff]  }
 0x268   :  { %5649 = vmatpush2.bf16.msra.mxu1 %v8118_v36  ;;  %5683 = vmatprep.subr.bf16.mxu0 %v8129_v44  ;;  %v835_v36 = vrot.slane %v8412_v34, %v834_v31  ;;  %v8192_v44 = vld [vmem:[%s11163_s1 + $0x104c] ss:$16 sps:$4 sm:$0xff]  }
 0x269   :  { %5650 = vmatprep.subr.bf16.mxu1 %v8126_v47  ;;  %v8187_v47 = vld [vmem:[%s11163_s1 + $0x12e8] ss:$16 sps:$4 sm:$0xff]   ;;  %v8246_v31 = vld [vmem:[%s11163_s1 + $0x112c] ss:$16 sps:$4 sm:$0xff]  }
 0x26a   :  { %v8255_v34 = vld [vmem:[%s11163_s1 + $0x138c] ss:$16 sps:$4 sm:$0xff]  }
 0x26b   :  { %5684 = vmatpush1.bf16.msra.mxu0 %v8127_v25 }
 0x26c   :  { %5651 = vmatpush2.bf16.msra.mxu1 %v8124_v45  ;;  %5685 = vmatprep.subr.bf16.mxu0 %v8135_v49  ;;  %v8195_v45 = vld [vmem:[%s11163_s1 + $0x12cc] ss:$16 sps:$4 sm:$0xff]   ;;  %v8193_v49 = vld [vmem:[%s11163_s1 + $0x12c8] ss:$16 sps:$4 sm:$0xff]  }
 0x26d   :  { %5652 = vmatprep.subr.bf16.mxu1 %v8132_v46  ;;  %v8190_v46 = vld [vmem:[%s11163_s1 + $0x1048] ss:$16 sps:$4 sm:$0xff]  }
 0x26f   :  { %5686 = vmatpush1.bf16.msra.mxu0 %v8133_v59  ;;  %v8198_v59 = vld [vmem:[%s11163_s1 + $0x102c] ss:$16 sps:$4 sm:$0xff]  }
 0x270   :  { %5653 = vmatpush2.bf16.msra.mxu1 %v8130_v38  ;;  %5687 = vmatprep.subr.bf16.mxu0 %v8141_v52 }
 0x271   :  { %5654 = vmatprep.subr.bf16.mxu1 %v8138_v50 }
 0x273   :  { %5688 = vmatpush2.bf16.msra.mxu0 %v8139_v55  ;;  %v8201_v55 = vld [vmem:[%s11163_s1 + $0x12ac] ss:$16 sps:$4 sm:$0xff]  }
 0x274   :  { %5655 = vmatpush2.bf16.msra.mxu1 %v8136_v53  ;;  %5689 = vmatprep.subr.bf16.mxu0 %v8147_v7  ;;  %v8199_v7 = vld [vmem:[%s11163_s1 + $0x12a8] ss:$16 sps:$4 sm:$0xff]  }
 0x275   :  { %5656 = vmatprep.subr.bf16.mxu1 %v8144_v56 }
 0x277   :  { %5690 = vmatpush2.bf16.msra.mxu0 %v8145_v58 }
 0x278   :  { %5657 = vmatpush2.bf16.msra.mxu1 %v8142_v57  ;;  %5691 = vmatprep.subr.bf16.mxu0 %v8153_v42  ;;  %v8207_v42 = vld [vmem:[%s11163_s1 + $0x128c] ss:$16 sps:$4 sm:$0xff]  }
 0x279   :  { %5658 = vmatprep.subr.bf16.mxu1 %v8150_v61  ;;  %v8204_v61 = vld [vmem:[%s11163_s1 + $0x100c] ss:$16 sps:$4 sm:$0xff]  }
 0x27b   :  { %5692 = vmatpush2.bf16.msra.mxu0 %v8151_v37  ;;  %v8210_v37 = vld [vmem:[%s11163_s1 + $0x11ec] ss:$16 sps:$4 sm:$0xff]  }
 0x27c   :  { %5659 = vmatpush2.bf16.msra.mxu1 %v8148_v15  ;;  %5693 = vmatprep.subr.bf16.mxu0 %v8159_v35  ;;  %v8202_v15 = vld [vmem:[%s11163_s1 + $0x1008] ss:$16 sps:$4 sm:$0xff]  }
 0x27d   :  { %5660 = vmatprep.subr.bf16.mxu1 %v8156_v62  ;;  %v8213_v62 = vld [vmem:[%s11163_s1 + $0x126c] ss:$16 sps:$4 sm:$0xff]   ;;  %v8208_v35 = vld [vmem:[%s11163_s1 + $0x11e8] ss:$16 sps:$4 sm:$0xff]  }
 0x27f   :  { %5694 = vmatpush2.bf16.msra.mxu0 %v8157_v51  ;;  %v8216_v51 = vld [vmem:[%s11163_s1 + $0x11cc] ss:$16 sps:$4 sm:$0xff]  }
 0x280   :  { %5661 = vmatpush2.bf16.msra.mxu1 %v8154_v40  ;;  %5695 = vmatprep.subr.bf16.mxu0 %v8162_v11  ;;  %v8211_v40 = vld [vmem:[%s11163_s1 + $0x1268] ss:$16 sps:$4 sm:$0xff]   ;;  %v8219_v11 = vld [vmem:[%s11163_s1 + $0x124c] ss:$16 sps:$4 sm:$0xff]  }
 0x281   :  { %5712 = vmatprep.subr.bf16.mxu1 %v8165_v12  ;;  %v8214_v12 = vld [vmem:[%s11163_s1 + $0x11c8] ss:$16 sps:$4 sm:$0xff]  }
 0x283   :  { %v5418_v18 = vpop.f32.mrf.mxu1  ;;  %5663 = vmatmul.mubr.bf16.vlgmr.msra.gmra.mxu1 %v9330_v0  ;;  %5696 = vmatpush2.bf16.msra.mxu0 %v8160_v16  ;;  %v8177_v0 = vld [vmem:[%s11163_s1 + $0x10ac] ss:$16 sps:$4 sm:$0xff]   ;;  %v8217_v16 = vld [vmem:[%s11163_s1 + $0x1248] ss:$16 sps:$4 sm:$0xff]  }
 0x284   :  { %5713 = vmatpush1.bf16.msra.mxu1 %v8163_v20  ;;  %5697 = vmatprep.subr.bf16.mxu0 %v8168_v13  ;;  %v5419_v25 = vadd.f32 %v5418_v18, %v831_v23  ;;  %v8222_v20 = vld [vmem:[%s11163_s1 + $0x11ac] ss:$16 sps:$4 sm:$0xff]   ;;  %v8223_v18 = vld [vmem:[%s11163_s1 + $0x1228] ss:$16 sps:$4 sm:$0xff]  }
 0x285   :  { %v5420_v26 = vpop.f32.mrf.mxu1  ;;  %5714 = vmatprep.subr.bf16.mxu1 %v8171_v14  ;;  %5744 = vmatprep.mubr.bf16.mxu1 %v9357_v9  ;;  %v8183_v9 = vld [vmem:[%s11163_s1 + $0x108c] ss:$16 sps:$4 sm:$0xff]   ;;  %v8220_v14 = vld [vmem:[%s11163_s1 + $0x11a8] ss:$16 sps:$4 sm:$0xff]  }
 0x286   :  { %v5421_v50 = vadd.f32 %v5420_v26, %v835_v36  ;;  %v8225_v13 = vld [vmem:[%s11163_s1 + $0x122c] ss:$16 sps:$4 sm:$0xff]   ;;  %v8226_v26 = vld [vmem:[%s11163_s1 + $0x1188] ss:$16 sps:$4 sm:$0xff]  }
 0x287   :  { %v5422_v30 = vpop.f32.mrf.mxu1  ;;  %5698 = vmatpush2.bf16.msra.mxu0 %v8166_v19  ;;  %v8228_v19 = vld [vmem:[%s11163_s1 + $0x118c] ss:$16 sps:$4 sm:$0xff]   ;;  %v8250_v23 = vld [vmem:[%s11163_s1 + $0x1108] ss:$16 sps:$4 sm:$0xff]  }
 0x288   :  { %5715 = vmatpush1.bf16.msra.mxu1 %v8169_v39  ;;  %5699 = vmatprep.subr.bf16.mxu0 %v8174_v24  ;;  %v8231_v39 = vld [vmem:[%s11163_s1 + $0x120c] ss:$16 sps:$4 sm:$0xff]   ;;  %v8229_v24 = vld [vmem:[%s11163_s1 + $0x1208] ss:$16 sps:$4 sm:$0xff]  }
 0x289   :  { %v5423_v43 = vpop.f32.mrf.mxu1  ;;  %5716 = vmatprep.subr.bf16.mxu1 %v8177_v0  ;;  %v8234_v0 = vld [vmem:[%s11163_s1 + $0x116c] ss:$16 sps:$4 sm:$0xff]   ;;  %v8253_v36 = vld [vmem:[%s11163_s1 + $0x1388] ss:$16 sps:$4 sm:$0xff]  }
 0x28a   :  { %v8237_v30 = vld [vmem:[%s11163_s1 + $0x13ec] ss:$16 sps:$4 sm:$0xff]  }
 0x28b   :  { %5700 = vmatpush2.bf16.msra.mxu0 %v8172_v28  ;;  %v8232_v28 = vld [vmem:[%s11163_s1 + $0x1168] ss:$16 sps:$4 sm:$0xff]   ;;  %v8240_v43 = vld [vmem:[%s11163_s1 + $0x114c] ss:$16 sps:$4 sm:$0xff]  }
 0x28c   :  { %5717 = vmatpush1.bf16.msra.mxu1 %v8175_v6  ;;  %5701 = vmatprep.subr.bf16.mxu0 %v8180_v27  ;;  %v8235_v6 = vld [vmem:[%s11163_s1 + $0x13e8] ss:$16 sps:$4 sm:$0xff]   ;;  %v8243_v27 = vld [vmem:[%s11163_s1 + $0x13cc] ss:$16 sps:$4 sm:$0xff]  }
 0x28d   :  { %5718 = vmatprep.subr.bf16.mxu1 %v8183_v9  ;;  %v8238_v9 = vld [vmem:[%s11163_s1 + $0x1148] ss:$16 sps:$4 sm:$0xff]  }
 0x28f   :  { %5702 = vmatpush2.bf16.msra.mxu0 %v8178_v33  ;;  %v8249_v33 = vld [vmem:[%s11163_s1 + $0x13ac] ss:$16 sps:$4 sm:$0xff]  }
 0x290   :  { %5719 = vmatpush1.bf16.msra.mxu1 %v8181_v41  ;;  %5753 = vmatprep.subr.bf16.mxu0 %v8189_v54  ;;  %v8244_v41 = vld [vmem:[%s11163_s1 + $0x1128] ss:$16 sps:$4 sm:$0xff]   ;;  %v8252_v54 = vld [vmem:[%s11163_s1 + $0x110c] ss:$16 sps:$4 sm:$0xff]  }
 0x291   :  { %5720 = vmatprep.subr.bf16.mxu1 %v8186_v22  ;;  %v8247_v22 = vld [vmem:[%s11163_s1 + $0x13a8] ss:$16 sps:$4 sm:$0xff]  }
 0x292   :  { %v5459_v38 = vpop.f32.mrf.mxu0  ;;  %5704 = vmatmul.mubr.bf16.vlgmr.msra.gmra.mxu0 %v9334_v1  ;;  %v8196_v1 = vld [vmem:[%s11163_s1 + $0x1028] ss:$16 sps:$4 sm:$0xff]  }
 0x293   :  { %v10677_v52 = vadd.f32 %v5459_v38, %v5419_v25  ;;  %5754 = vmatpush1.bf16.msra.mxu0 %v8187_v47  ;;  %5785 = vmatprep.mubr.bf16.mxu0 %v9361_v10  ;;  %v8205_v10 = vld [vmem:[%s11163_s1 + $0x1288] ss:$16 sps:$4 sm:$0xff]   ;;  %v8261_v47 = vld [vmem:[%s11163_s1 + $0x14ec] ss:$16 sps:$4 sm:$0xff]  }
 0x294   :  { %5721 = vmatpush1.bf16.msra.mxu1 %v8184_v17  ;;  %v5461_v53 = vpop.f32.mrf.mxu0  ;;  %5755 = vmatprep.subr.bf16.mxu0 %v8195_v45  ;;  %v8258_v17 = vld [vmem:[%s11163_s1 + $0x136c] ss:$16 sps:$4 sm:$0xff]   ;;  %v8259_v45 = vld [vmem:[%s11163_s1 + $0x14e8] ss:$16 sps:$4 sm:$0xff]  }
 0x295   :  { %5722 = vmatprep.subr.bf16.mxu1 %v8192_v44  ;;  %v10682_v56 = vadd.f32 %v5461_v53, %v5421_v50  ;;  %v8256_v44 = vld [vmem:[%s11163_s1 + $0x1368] ss:$16 sps:$4 sm:$0xff]   ;;  %v8264_v25 = vld [vmem:[%s11163_s1 + $0x134c] ss:$16 sps:$4 sm:$0xff]  }
 0x296   :  { %v5463_v57 = vpop.f32.mrf.mxu0  ;;  %v8265_v50 = vld [vmem:[%s11163_s1 + $0x14c8] ss:$16 sps:$4 sm:$0xff]  }
 0x297   :  { %5756 = vmatpush1.bf16.msra.mxu0 %v8193_v49  ;;  %v8271_v57 = vld [vmem:[%s11163_s1 + $0x14a8] ss:$16 sps:$4 sm:$0xff]  }
 0x298   :  { %5723 = vmatpush1.bf16.msra.mxu1 %v8190_v46  ;;  %v5464_v58 = vpop.f32.mrf.mxu0  ;;  %5757 = vmatprep.subr.bf16.mxu0 %v8201_v55  ;;  %v8267_v46 = vld [vmem:[%s11163_s1 + $0x14cc] ss:$16 sps:$4 sm:$0xff]  }
 0x299   :  { %5724 = vmatprep.subr.bf16.mxu1 %v8198_v59  ;;  %v8262_v59 = vld [vmem:[%s11163_s1 + $0x1348] ss:$16 sps:$4 sm:$0xff]   ;;  %v8270_v55 = vld [vmem:[%s11163_s1 + $0x132c] ss:$16 sps:$4 sm:$0xff]  }
 0x29b   :  { %5758 = vmatpush1.bf16.msra.mxu0 %v8199_v7  ;;  %v8268_v7 = vld [vmem:[%s11163_s1 + $0x1328] ss:$16 sps:$4 sm:$0xff]  }
 0x29c   :  { %5725 = vmatpush1.bf16.msra.mxu1 %v8196_v1  ;;  %5759 = vmatprep.subr.bf16.mxu0 %v8207_v42  ;;  %v8277_v42 = vld [vmem:[%s11163_s1 + $0x1488] ss:$16 sps:$4 sm:$0xff]  }
 0x29d   :  { %5726 = vmatprep.subr.bf16.mxu1 %v8204_v61  ;;  %v8274_v61 = vld [vmem:[%s11163_s1 + $0x1308] ss:$16 sps:$4 sm:$0xff]  }
 0x29f   :  { %5760 = vmatpush1.bf16.msra.mxu0 %v8205_v10  ;;  %v8285_v10 = vld [vmem:[%s11163_s1 + $0x16ec] ss:$16 sps:$4 sm:$0xff]  }
 0x2a0   :  { %5727 = vmatpush1.bf16.msra.mxu1 %v8202_v15  ;;  %5761 = vmatprep.subr.bf16.mxu0 %v8213_v62  ;;  %v8282_v15 = vld [vmem:[%s11163_s1 + $0x146c] ss:$16 sps:$4 sm:$0xff]   ;;  %v8283_v62 = vld [vmem:[%s11163_s1 + $0x16e8] ss:$16 sps:$4 sm:$0xff]  }
 0x2a1   :  { %5728 = vmatprep.subr.bf16.mxu1 %v8210_v37  ;;  %v8280_v37 = vld [vmem:[%s11163_s1 + $0x1468] ss:$16 sps:$4 sm:$0xff]  }
 0x2a3   :  { %5762 = vmatpush1.bf16.msra.mxu0 %v8211_v40  ;;  %v8291_v40 = vld [vmem:[%s11163_s1 + $0x16cc] ss:$16 sps:$4 sm:$0xff]  }
 0x2a4   :  { %5729 = vmatpush2.bf16.msra.mxu1 %v8208_v35  ;;  %5763 = vmatprep.subr.bf16.mxu0 %v8219_v11  ;;  %v8288_v35 = vld [vmem:[%s11163_s1 + $0x144c] ss:$16 sps:$4 sm:$0xff]  }
 0x2a5   :  { %5730 = vmatprep.subr.bf16.mxu1 %v8216_v51 }
 0x2a7   :  { %5764 = vmatpush1.bf16.msra.mxu0 %v8217_v16  ;;  %v8289_v16 = vld [vmem:[%s11163_s1 + $0x16c8] ss:$16 sps:$4 sm:$0xff]  }
 0x2a8   :  { %5731 = vmatpush2.bf16.msra.mxu1 %v8214_v12  ;;  %5765 = vmatprep.subr.bf16.mxu0 %v8225_v13  ;;  %v8286_v12 = vld [vmem:[%s11163_s1 + $0x1448] ss:$16 sps:$4 sm:$0xff]   ;;  %v8294_v13 = vld [vmem:[%s11163_s1 + $0x142c] ss:$16 sps:$4 sm:$0xff]  }
 0x2a9   :  { %5732 = vmatprep.subr.bf16.mxu1 %v8222_v20 }
 0x2ab   :  { %5766 = vmatpush1.bf16.msra.mxu0 %v8223_v18 }
 0x2ac   :  { %5733 = vmatpush2.bf16.msra.mxu1 %v8220_v14  ;;  %5767 = vmatprep.subr.bf16.mxu0 %v8231_v39  ;;  %v8295_v39 = vld [vmem:[%s11163_s1 + $0x16a8] ss:$16 sps:$4 sm:$0xff]  }
 0x2ad   :  { %5734 = vmatprep.subr.bf16.mxu1 %v8228_v19  ;;  %v8292_v19 = vld [vmem:[%s11163_s1 + $0x1428] ss:$16 sps:$4 sm:$0xff]  }
 0x2af   :  { %5768 = vmatpush1.bf16.msra.mxu0 %v8229_v24  ;;  %v8300_v24 = vld [vmem:[%s11163_s1 + $0x140c] ss:$16 sps:$4 sm:$0xff]  }
 0x2b0   :  { %5735 = vmatpush2.bf16.msra.mxu1 %v8226_v26  ;;  %5769 = vmatprep.subr.bf16.mxu0 %v8237_v30  ;;  %v8301_v30 = vld [vmem:[%s11163_s1 + $0x1688] ss:$16 sps:$4 sm:$0xff]  }
 0x2b1   :  { %5736 = vmatprep.subr.bf16.mxu1 %v8234_v0  ;;  %v8298_v0 = vld [vmem:[%s11163_s1 + $0x1408] ss:$16 sps:$4 sm:$0xff]  }
 0x2b3   :  { %5770 = vmatpush2.bf16.msra.mxu0 %v8235_v6  ;;  %v8309_v6 = vld [vmem:[%s11163_s1 + $0x166c] ss:$16 sps:$4 sm:$0xff]  }
 0x2b4   :  { %5737 = vmatpush2.bf16.msra.mxu1 %v8232_v28  ;;  %5771 = vmatprep.subr.bf16.mxu0 %v8243_v27  ;;  %v8306_v28 = vld [vmem:[%s11163_s1 + $0x15ec] ss:$16 sps:$4 sm:$0xff]   ;;  %v8307_v27 = vld [vmem:[%s11163_s1 + $0x1668] ss:$16 sps:$4 sm:$0xff]  }
 0x2b5   :  { %5738 = vmatprep.subr.bf16.mxu1 %v8240_v43  ;;  %v8304_v43 = vld [vmem:[%s11163_s1 + $0x15e8] ss:$16 sps:$4 sm:$0xff]  }
 0x2b7   :  { %5772 = vmatpush2.bf16.msra.mxu0 %v8241_v29  ;;  %v8315_v29 = vld [vmem:[%s11163_s1 + $0x164c] ss:$16 sps:$4 sm:$0xff]  }
 0x2b8   :  { %5739 = vmatpush2.bf16.msra.mxu1 %v8238_v9  ;;  %5773 = vmatprep.subr.bf16.mxu0 %v8249_v33  ;;  %v8312_v9 = vld [vmem:[%s11163_s1 + $0x15cc] ss:$16 sps:$4 sm:$0xff]   ;;  %v8313_v33 = vld [vmem:[%s11163_s1 + $0x1648] ss:$16 sps:$4 sm:$0xff]  }
 0x2b9   :  { %5740 = vmatprep.subr.bf16.mxu1 %v8246_v31  ;;  %v8310_v31 = vld [vmem:[%s11163_s1 + $0x15c8] ss:$16 sps:$4 sm:$0xff]  }
 0x2bb   :  { %5774 = vmatpush2.bf16.msra.mxu0 %v8247_v22  ;;  %v8321_v22 = vld [vmem:[%s11163_s1 + $0x162c] ss:$16 sps:$4 sm:$0xff]  }
 0x2bc   :  { %5741 = vmatpush2.bf16.msra.mxu1 %v8244_v41  ;;  %5775 = vmatprep.subr.bf16.mxu0 %v8255_v34  ;;  %v8318_v41 = vld [vmem:[%s11163_s1 + $0x15ac] ss:$16 sps:$4 sm:$0xff]   ;;  %v8319_v34 = vld [vmem:[%s11163_s1 + $0x1628] ss:$16 sps:$4 sm:$0xff]  }
 0x2bd   :  { %5742 = vmatprep.subr.bf16.mxu1 %v8252_v54  ;;  %v8316_v54 = vld [vmem:[%s11163_s1 + $0x15a8] ss:$16 sps:$4 sm:$0xff]  }
 0x2bf   :  { %5776 = vmatpush2.bf16.msra.mxu0 %v8253_v36  ;;  %v8327_v36 = vld [vmem:[%s11163_s1 + $0x160c] ss:$16 sps:$4 sm:$0xff]  }
 0x2c0   :  { %5743 = vmatpush2.bf16.msra.mxu1 %v8250_v23  ;;  %5777 = vmatprep.subr.bf16.mxu0 %v8258_v17  ;;  %v8324_v23 = vld [vmem:[%s11163_s1 + $0x158c] ss:$16 sps:$4 sm:$0xff]   ;;  %v8322_v17 = vld [vmem:[%s11163_s1 + $0x1588] ss:$16 sps:$4 sm:$0xff]  }
 0x2c1   :  { %5794 = vmatprep.subr.bf16.mxu1 %v8261_v47  ;;  %v8325_v47 = vld [vmem:[%s11163_s1 + $0x1608] ss:$16 sps:$4 sm:$0xff]  }
 0x2c3   :  { %v5500_v49 = vpop.f32.mrf.mxu1  ;;  %5745 = vmatmul.mubr.bf16.vlgmr.msra.gmra.mxu1 %v9569_v63  ;;  %5778 = vmatpush2.bf16.msra.mxu0 %v8256_v44  ;;  %v8273_v63 = vld [vmem:[%s11163_s1 + $0x14ac] ss:$16 sps:$4 sm:$0xff]  }
 0x2c4   :  { %v5501_v38 = vadd.f32 %v5500_v49, %v10677_v52  ;;  %5795 = vmatpush1.bf16.msra.mxu1 %v8259_v45  ;;  %5779 = vmatprep.subr.bf16.mxu0 %v8264_v25  ;;  %v8330_v44 = vld [vmem:[%s11163_s1 + $0x156c] ss:$16 sps:$4 sm:$0xff]   ;;  %v8328_v25 = vld [vmem:[%s11163_s1 + $0x1568] ss:$16 sps:$4 sm:$0xff]  }
 0x2c5   :  { %v5502_v53 = vpop.f32.mrf.mxu1  ;;  %5796 = vmatprep.subr.bf16.mxu1 %v8267_v46  ;;  %5826 = vmatprep.mubr.bf16.mxu1 %v9589_v5  ;;  %v8279_v5 = vld [vmem:[%s11163_s1 + $0x148c] ss:$16 sps:$4 sm:$0xff]   ;;  %v8331_v46 = vld [vmem:[%s11163_s1 + $0x17e8] ss:$16 sps:$4 sm:$0xff]  }
 0x2c6   :  { %v5503_v52 = vadd.f32 %v5502_v53, %v10682_v56  ;;  %v8276_v56 = vld [vmem:[%s11163_s1 + $0x130c] ss:$16 sps:$4 sm:$0xff]  }
 0x2c7   :  { %v5504_v1 = vpop.f32.mrf.mxu1  ;;  %5780 = vmatpush2.bf16.msra.mxu0 %v8262_v59  ;;  %v8333_v45 = vld [vmem:[%s11163_s1 + $0x17ec] ss:$16 sps:$4 sm:$0xff]   ;;  %v8334_v59 = vld [vmem:[%s11163_s1 + $0x1548] ss:$16 sps:$4 sm:$0xff]  }
 0x2c8   :  { %5797 = vmatpush1.bf16.msra.mxu1 %v8265_v50  ;;  %5781 = vmatprep.subr.bf16.mxu0 %v8270_v55  ;;  %v8336_v49 = vld [vmem:[%s11163_s1 + $0x154c] ss:$16 sps:$4 sm:$0xff]   ;;  %v8337_v50 = vld [vmem:[%s11163_s1 + $0x17c8] ss:$16 sps:$4 sm:$0xff]  }
 0x2c9   :  { %v5505_v58 = vpop.f32.mrf.mxu1  ;;  %5798 = vmatprep.subr.bf16.mxu1 %v8273_v63  ;;  %v8342_v53 = vld [vmem:[%s11163_s1 + $0x152c] ss:$16 sps:$4 sm:$0xff]   ;;  %v8340_v63 = vld [vmem:[%s11163_s1 + $0x1528] ss:$16 sps:$4 sm:$0xff]  }
 0x2ca   :  { %v8345_v55 = vld [vmem:[%s11163_s1 + $0x17ac] ss:$16 sps:$4 sm:$0xff]   ;;  %v8349_v58 = vld [vmem:[%s11163_s1 + $0x1788] ss:$16 sps:$4 sm:$0xff]  }
 0x2cb   :  { %5782 = vmatpush2.bf16.msra.mxu0 %v8268_v7  ;;  %v8348_v1 = vld [vmem:[%s11163_s1 + $0x150c] ss:$16 sps:$4 sm:$0xff]  }
 0x2cc   :  { %5799 = vmatpush1.bf16.msra.mxu1 %v8271_v57  ;;  %5783 = vmatprep.subr.bf16.mxu0 %v8276_v56  ;;  %v8351_v7 = vld [vmem:[%s11163_s1 + $0x178c] ss:$16 sps:$4 sm:$0xff]   ;;  %v8346_v57 = vld [vmem:[%s11163_s1 + $0x1508] ss:$16 sps:$4 sm:$0xff]  }
 0x2cd   :  { %5800 = vmatprep.subr.bf16.mxu1 %v8279_v5  ;;  %v8354_v56 = vld [vmem:[%s11163_s1 + $0x176c] ss:$16 sps:$4 sm:$0xff]  }
 0x2ce   :  { %v8357_v5 = vld [vmem:[%s11163_s1 + $0x186c] ss:$16 sps:$4 sm:$0xff]  }
 0x2cf   :  { %5784 = vmatpush2.bf16.msra.mxu0 %v8274_v61  ;;  %v8352_v61 = vld [vmem:[%s11163_s1 + $0x1768] ss:$16 sps:$4 sm:$0xff]  }
 0x2d0   :  { %5801 = vmatpush1.bf16.msra.mxu1 %v8277_v42  ;;  %5835 = vmatprep.subr.bf16.mxu0 %v8285_v10  ;;  %v8355_v42 = vld [vmem:[%s11163_s1 + $0x1868] ss:$16 sps:$4 sm:$0xff]   ;;  %v8363_v10 = vld [vmem:[%s11163_s1 + $0x184c] ss:$16 sps:$4 sm:$0xff]  }
 0x2d1   :  { %5802 = vmatprep.subr.bf16.mxu1 %v8282_v15  ;;  %v8360_v15 = vld [vmem:[%s11163_s1 + $0x174c] ss:$16 sps:$4 sm:$0xff]  }
 0x2d2   :  { %v5541_v51 = vpop.f32.mrf.mxu0  ;;  %5786 = vmatmul.mubr.bf16.vlgmr.msra.gmra.mxu0 %v9573_v4  ;;  %v8297_v4 = vld [vmem:[%s11163_s1 + $0x16ac] ss:$16 sps:$4 sm:$0xff]  }
 0x2d3   :  { %v10870_v11 = vadd.f32 %v5541_v51, %v5501_v38  ;;  %5836 = vmatpush1.bf16.msra.mxu0 %v8283_v62  ;;  %5867 = vmatprep.mubr.bf16.mxu0 %v9593_v8  ;;  %v8303_v8 = vld [vmem:[%s11163_s1 + $0x168c] ss:$16 sps:$4 sm:$0xff]  }
 0x2d4   :  { %5803 = vmatpush1.bf16.msra.mxu1 %v8280_v37  ;;  %v5543_v20 = vpop.f32.mrf.mxu0  ;;  %5837 = vmatprep.subr.bf16.mxu0 %v8291_v40  ;;  %v8339_v38 = vld [vmem:[%s11163_s1 + $0x17cc] ss:$16 sps:$4 sm:$0xff]   ;;  %v8361_v40 = vld [vmem:[%s11163_s1 + $0x1848] ss:$16 sps:$4 sm:$0xff]  }
 0x2d5   :  { %5804 = vmatprep.subr.bf16.mxu1 %v8288_v35  ;;  %v10884_v14 = vadd.f32 %v5543_v20, %v5503_v52  ;;  %v8343_v52 = vld [vmem:[%s11163_s1 + $0x17a8] ss:$16 sps:$4 sm:$0xff]  }
 0x2d6   :  { %v5545_v18 = vpop.f32.mrf.mxu0  ;;  %v8358_v35 = vld [vmem:[%s11163_s1 + $0x1748] ss:$16 sps:$4 sm:$0xff]  }
 0x2d7   :  { %5838 = vmatpush1.bf16.msra.mxu0 %v8289_v16  ;;  %v8364_v20 = vld [vmem:[%s11163_s1 + $0x1728] ss:$16 sps:$4 sm:$0xff]  }
 0x2d8   :  { %5805 = vmatpush1.bf16.msra.mxu1 %v8286_v12  ;;  %v5546_v26 = vpop.f32.mrf.mxu0  ;;  %5839 = vmatprep.subr.bf16.mxu0 %v8297_v4  ;;  %v8366_v12 = vld [vmem:[%s11163_s1 + $0x172c] ss:$16 sps:$4 sm:$0xff]   ;;  %v8370_v18 = vld [vmem:[%s11163_s1 + $0x1708] ss:$16 sps:$4 sm:$0xff]  }
 0x2d9   :  { %5806 = vmatprep.subr.bf16.mxu1 %v8294_v13  ;;  %v8367_v13 = vld [vmem:[%s11163_s1 + $0x1828] ss:$16 sps:$4 sm:$0xff]   ;;  %v5918_v26 = vmax.f32 %v10477_v21, 0.0 }
 0x2db   :  { %5840 = vmatpush1.bf16.msra.mxu0 %v8295_v39  ;;  %v8376_v39 = vld [vmem:[%s11166_s3 + $0x78] sm:$0xff]  }
 0x2dc   :  { %5807 = vmatpush1.bf16.msra.mxu1 %v8292_v19  ;;  %5841 = vmatprep.subr.bf16.mxu0 %v8303_v8  ;;  %v8373_v19 = vld [vmem:[%s11163_s1 + $0x1808] ss:$16 sps:$4 sm:$0xff]   ;;  %v8378_v8 = vld [vmem:[%s11166_s3 + $0x70] sm:$0xff]  }
 0x2dd   :  { %5808 = vmatprep.subr.bf16.mxu1 %v8300_v24  ;;  %v8377_v24 = vld [vmem:[%s11166_s3 + $0x38] sm:$0xff]  }
 0x2df   :  { %5842 = vmatpush1.bf16.msra.mxu0 %v8301_v30 }
 0x2e0   :  { %5809 = vmatpush1.bf16.msra.mxu1 %v8298_v0  ;;  %5843 = vmatprep.subr.bf16.mxu0 %v8309_v6  ;;  %v5922_v0 = vpack.c.bf16 %v5918_v26, %v5918_v26  ;;  %v8379_v6 = vld [vmem:[%s11166_s3 + $0x30] sm:$0xff]  }
 0x2e1   :  { %5810 = vmatprep.subr.bf16.mxu1 %v8306_v28  ;;  %v8413_v28 = vld [vmem:[%s11164_s0 + $0x60] ss:$0 sps:$4 sm:$0xff]  }
 0x2e3   :  { %5844 = vmatpush1.bf16.msra.mxu0 %v8307_v27  ;;  %v8380_v27 = vld [vmem:[%s11166_s3 + $0x68] sm:$0xff]  }
 0x2e4   :  { %5811 = vmatpush2.bf16.msra.mxu1 %v8304_v43  ;;  %5845 = vmatprep.subr.bf16.mxu0 %v8315_v29  ;;  %v8381_v29 = vld [vmem:[%s11166_s3 + $0x28] sm:$0xff]  }
 0x2e5   :  { %5812 = vmatprep.subr.bf16.mxu1 %v8312_v9 }
 0x2e7   :  { %5846 = vmatpush1.bf16.msra.mxu0 %v8313_v33  ;;  %v8382_v33 = vld [vmem:[%s11166_s3 + $0x60] sm:$0xff]  }
 0x2e8   :  { %5813 = vmatpush2.bf16.msra.mxu1 %v8310_v31  ;;  %5847 = vmatprep.subr.bf16.mxu0 %v8321_v22  ;;  %v8393_v22 = vld [vmem:[%s11166_s3 + $0xb8] sm:$0xff]  }
 0x2e9   :  { %5814 = vmatprep.subr.bf16.mxu1 %v8318_v41  ;;  %v8392_v41 = vld [vmem:[%s11166_s3 + $0xf8] sm:$0xff]  }
 0x2eb   :  { %5848 = vmatpush1.bf16.msra.mxu0 %v8319_v34  ;;  %v8384_v34 = vld [vmem:[%s11166_s3 + $0x58] sm:$0xff]  }
 0x2ec   :  { %5815 = vmatpush2.bf16.msra.mxu1 %v8316_v54  ;;  %5849 = vmatprep.subr.bf16.mxu0 %v8327_v36  ;;  %v8383_v54 = vld [vmem:[%s11166_s3 + $0x20] sm:$0xff]   ;;  %v8386_v36 = vld [vmem:[%s11166_s3 + $0x50] sm:$0xff]  }
 0x2ed   :  { %5816 = vmatprep.subr.bf16.mxu1 %v8324_v23  ;;  %v8385_v23 = vld [vmem:[%s11166_s3 + $0x18] sm:$0xff]  }
 0x2ef   :  { %5850 = vmatpush1.bf16.msra.mxu0 %v8325_v47  ;;  %v8388_v47 = vld [vmem:[%s11166_s3 + $0x48] sm:$0xff]  }
 0x2f0   :  { %5817 = vmatpush2.bf16.msra.mxu1 %v8322_v17  ;;  %5851 = vmatprep.subr.bf16.mxu0 %v8333_v45  ;;  %v8387_v17 = vld [vmem:[%s11166_s3 + $0x10] sm:$0xff]   ;;  %v8390_v45 = vld [vmem:[%s11166_s3 + $0x40] sm:$0xff]  }
 0x2f1   :  { %5818 = vmatprep.subr.bf16.mxu1 %v8330_v44  ;;  %v8389_v44 = vld [vmem:[%s11166_s3 + $0x8] sm:$0xff]  }
 0x2f3   :  { %5852 = vmatpush2.bf16.msra.mxu0 %v8331_v46  ;;  %v5917_v46 = vmax.f32 %v10463_v60, 0.0  ;;  %v8396_v60 = vld [vmem:[%s11166_s3 + $0xe8] sm:$0xff]  }
 0x2f4   :  { %5819 = vmatpush2.bf16.msra.mxu1 %v8328_v25  ;;  %5853 = vmatprep.subr.bf16.mxu0 %v8339_v38  ;;  %v8391_v25 = vld [vmem:[%s11166_s3] sm:$0xff]   ;;  %v8394_v38 = vld [vmem:[%s11166_s3 + $0xf0] sm:$0xff]  }
 0x2f5   :  { %5820 = vmatprep.subr.bf16.mxu1 %v8336_v49  ;;  %v5921_v49 = vpack.c.bf16 %v5917_v46, %v5917_v46 }
 0x2f7   :  { %5854 = vmatpush2.bf16.msra.mxu0 %v8337_v50 }
 0x2f8   :  { %5821 = vmatpush2.bf16.msra.mxu1 %v8334_v59  ;;  %5855 = vmatprep.subr.bf16.mxu0 %v8345_v55  ;;  %v8395_v59 = vld [vmem:[%s11166_s3 + $0xb0] sm:$0xff]  }
 0x2f9   :  { %5822 = vmatprep.subr.bf16.mxu1 %v8342_v53 }
 0x2fb   :  { %5856 = vmatpush2.bf16.msra.mxu0 %v8343_v52  ;;  %v8397_v52 = vld [vmem:[%s11166_s3 + $0xa8] sm:$0xff]  }
 0x2fc   :  { %5823 = vmatpush2.bf16.msra.mxu1 %v8340_v63  ;;  %5857 = vmatprep.subr.bf16.mxu0 %v8351_v7 }
 0x2fd   :  { %5824 = vmatprep.subr.bf16.mxu1 %v8348_v1 }
 0x2ff   :  { %5858 = vmatpush2.bf16.msra.mxu0 %v8349_v58  ;;  %v8399_v58 = vld [vmem:[%s11166_s3 + $0xa0] sm:$0xff]  }
 0x300   :  { %5825 = vmatpush2.bf16.msra.mxu1 %v8346_v57  ;;  %5859 = vmatprep.subr.bf16.mxu0 %v8354_v56  ;;  %v8398_v57 = vld [vmem:[%s11166_s3 + $0xe0] sm:$0xff]   ;;  %v8400_v56 = vld [vmem:[%s11166_s3 + $0xd8] sm:$0xff]  }
 0x301   :  { %5884 = vmatprep.subr.bf16.mxu1 %v8357_v5  ;;  %v8401_v5 = vld [vmem:[%s11166_s3 + $0x98] sm:$0xff]  }
 0x303   :  { %v5582_v37 = vpop.f32.mrf.mxu1  ;;  %5827 = vmatmul.mubr.bf16.vlgmr.msra.gmra.mxu1 %v9787_v2  ;;  %5860 = vmatpush2.bf16.msra.mxu0 %v8352_v61  ;;  %v8369_v2 = vld [vmem:[%s11163_s1 + $0x182c] ss:$16 sps:$4 sm:$0xff]   ;;  %v8402_v61 = vld [vmem:[%s11166_s3 + $0xd0] sm:$0xff]  }
 0x304   :  { %v5583_v62 = vadd.f32 %v5582_v37, %v10870_v11  ;;  %5885 = vmatpush1.bf16.msra.mxu1 %v8355_v42  ;;  %5861 = vmatprep.subr.bf16.mxu0 %v8360_v15  ;;  %v8403_v42 = vld [vmem:[%s11166_s3 + $0x90] sm:$0xff]  }
 0x305   :  { %v5584_v51 = vpop.f32.mrf.mxu1  ;;  %5886 = vmatprep.subr.bf16.mxu1 %v8363_v10  ;;  %5908 = vmatprep.mubr.bf16.mxu1 %v8414_v32  ;;  %v8375_v32 = vld [vmem:[%s11163_s1 + $0x180c] ss:$16 sps:$4 sm:$0xff]  }
 0x306   :  { %v5585_v11 = vadd.f32 %v5584_v51, %v10884_v14  ;;  %v8372_v14 = vld [vmem:[%s11163_s1 + $0x170c] ss:$16 sps:$4 sm:$0xff]  }
 0x307   :  { %v5586_v16 = vpop.f32.mrf.mxu1  ;;  %5862 = vmatpush2.bf16.msra.mxu0 %v8358_v35 }
 0x308   :  { %5887 = vmatpush1.bf16.msra.mxu1 %v8361_v40  ;;  %5863 = vmatprep.subr.bf16.mxu0 %v8366_v12  ;;  %v8405_v40 = vld [vmem:[%s11166_s3 + $0x88] sm:$0xff]  }
 0x309   :  { %v5587_v4 = vpop.f32.mrf.mxu1  ;;  %5888 = vmatprep.subr.bf16.mxu1 %v8369_v2  ;;  %v8406_v2 = vld [vmem:[%s11166_s3 + $0xc0] sm:$0xff]  }
 0x30b   :  { %5864 = vmatpush2.bf16.msra.mxu0 %v8364_v20 }
 0x30c   :  { %5889 = vmatpush1.bf16.msra.mxu1 %v8367_v13  ;;  %5865 = vmatprep.subr.bf16.mxu0 %v8372_v14 }
 0x30d   :  { %5890 = vmatprep.subr.bf16.mxu1 %v8375_v32 }
 0x30f   :  { %5866 = vmatpush2.bf16.msra.mxu0 %v8370_v18 }
 0x310   :  { %5891 = vmatpush1.bf16.msra.mxu1 %v8373_v19  ;;  %7130 = vmatprep.subr.bf16.mxu0 %v8376_v39 }
 0x311   :  { %7152 = vmatprep.subr.bf16.mxu1 %v8392_v41 }
 0x312   :  { %v5623_v30 = vpop.f32.mrf.mxu0  ;;  %5868 = vmatmul.mubr.bf16.vlgmr.msra.gmra.mxu0 %v9791_v3 }
 0x313   :  { %7096 = vmatmul.mubr.msk.bf16.vlgmr.msra.gmra.mxu1 %vm4847_vm0, %v8413_v28  ;;  %v5624_v21 = vadd.f32 %v5623_v30, %v5583_v62  ;;  %7131 = vmatpush3.bf16.msra.mxu0 %v8377_v24  ;;  %v8404_v62 = vld [vmem:[%s11166_s3 + $0xc8] sm:$0xff]  }
 0x314   :  { %6220 = vmatprep.mubr.bf16.mxu0 %v5922_v0  ;;  %v5625_v43 = vpop.f32.mrf.mxu0  ;;  %7132 = vmatprep.subr.bf16.mxu0 %v8378_v8 }
 0x315   :  { %v5626_v3 = vadd.f32 %v5625_v43, %v5585_v11  ;;  %7153 = vmatpush3.bf16.msra.mxu1 %v8393_v22  ;;  %v8407_v11 = vld [vmem:[%s11166_s3 + $0x80] sm:$0xff]  }
 0x316   :  { %v5627_v9 = vpop.f32.mrf.mxu0  ;;  %7154 = vmatprep.subr.bf16.mxu1 %v8394_v38 }
 0x317   :  { %7133 = vmatpush3.bf16.msra.mxu0 %v8379_v6 }
 0x318   :  { %v5628_v31 = vpop.f32.mrf.mxu0  ;;  %7134 = vmatprep.subr.bf16.mxu0 %v8380_v27 }
 0x319   :  { %7155 = vmatpush3.bf16.msra.mxu1 %v8395_v59 }
 0x31a   :  { %7156 = vmatprep.subr.bf16.mxu1 %v8396_v60 }
 0x31b   :  { %7135 = vmatpush3.bf16.msra.mxu0 %v8381_v29 }
 0x31c   :  { %7136 = vmatprep.subr.bf16.mxu0 %v8382_v33 }
 0x31d   :  { %7157 = vmatpush3.bf16.msra.mxu1 %v8397_v52 }
 0x31e   :  { %7158 = vmatprep.subr.bf16.mxu1 %v8398_v57 }
 0x31f   :  { %7137 = vmatpush3.bf16.msra.mxu0 %v8383_v54 }
 0x320   :  { %7138 = vmatprep.subr.bf16.mxu0 %v8384_v34 }
 0x321   :  { %7159 = vmatpush3.bf16.msra.mxu1 %v8399_v58 }
 0x322   :  { %7160 = vmatprep.subr.bf16.mxu1 %v8400_v56 }
 0x323   :  { %7139 = vmatpush3.bf16.msra.mxu0 %v8385_v23 }
 0x324   :  { %7140 = vmatprep.subr.bf16.mxu0 %v8386_v36 }
 0x325   :  { %7161 = vmatpush3.bf16.msra.mxu1 %v8401_v5 }
 0x326   :  { %7162 = vmatprep.subr.bf16.mxu1 %v8402_v61 }
 0x327   :  { %7141 = vmatpush3.bf16.msra.mxu0 %v8387_v17 }
 0x328   :  { %7142 = vmatprep.subr.bf16.mxu0 %v8388_v47 }
 0x329   :  { %7163 = vmatpush3.bf16.msra.mxu1 %v8403_v42 }
 0x32a   :  { %7164 = vmatprep.subr.bf16.mxu1 %v8404_v62 }
 0x32b   :  { %7143 = vmatpush3.bf16.msra.mxu0 %v8389_v44 }
 0x32c   :  { %7144 = vmatprep.subr.bf16.mxu0 %v8390_v45 }
 0x32d   :  { %7165 = vmatpush3.bf16.msra.mxu1 %v8405_v40 }
 0x32e   :  { %7166 = vmatprep.subr.bf16.mxu1 %v8406_v2 }
 0x32f   :  { %7145 = vmatpush3.bf16.msra.mxu0 %v8391_v25 }
 0x331   :  { %7167 = vmatpush3.bf16.msra.mxu1 %v8407_v11 }
 0x332   :  { %6221 = vmatmul.mubr.bf16.vlgmr.msra.gmra.mxu0 %v5921_v49 }
 0x343   :  { %v5664_v50 = vpop.f32.mrf.mxu1 }
 0x344   :  { %v5665_v53 = vadd.f32 %v5664_v50, %v5624_v21  ;;  %v7097_v50 = vld [vmem:[%s11167_s4] ss:$0 sm:$0xff] }
 0x345   :  { %v5666_v55 = vpop.f32.mrf.mxu1 }
 0x346   :  { %v5667_v63 = vadd.f32 %v5666_v55, %v5626_v3  ;;  %v6269_v55 = vand.u32 127, %v820_v48 }
 0x347   :  { %v5668_v1 = vpop.f32.mrf.mxu1 }
 0x348   :  { %vm6270_vm1 = vcmp.lt.s32.totalorder %v6269_v55, 6 }
 0x349   :  { %v5669_v7 = vpop.f32.mrf.mxu1 }
 0x352   :  { %v5705_v15 = vpop.f32.mrf.mxu0 }
 0x353   :  { %v5706_v10 = vadd.f32 %v5705_v15, %v5665_v53 }
 0x354   :  { %v5707_v37 = vpop.f32.mrf.mxu0 }
 0x355   :  { %v5708_v35 = vadd.f32 %v5707_v37, %v5667_v63 }
 0x356   :  { %v5709_v51 = vpop.f32.mrf.mxu0 }
 0x358   :  { %v5710_v12 = vpop.f32.mrf.mxu0 }
 0x383   :  { %v5746_v16 = vpop.f32.mrf.mxu1 }
 0x384   :  { %v5747_v20 = vadd.f32 %v5746_v16, %v5706_v10 }
 0x385   :  { %v5748_v13 = vpop.f32.mrf.mxu1 }
 0x386   :  { %v5749_v4 = vadd.f32 %v5748_v13, %v5708_v35 }
 0x387   :  { %v5750_v14 = vpop.f32.mrf.mxu1 }
 0x389   :  { %v5751_v32 = vpop.f32.mrf.mxu1 }
 0x392   :  { %v5787_v18 = vpop.f32.mrf.mxu0 }
 0x393   :  { %v5788_v28 = vadd.f32 %v5787_v18, %v5747_v20 }
 0x394   :  { %v5789_v19 = vpop.f32.mrf.mxu0 }
 0x395   :  { %v5790_v21 = vadd.f32 %v5789_v19, %v5749_v4 }
 0x396   :  { %v5791_v39 = vpop.f32.mrf.mxu0 }
 0x398   :  { %v5792_v26 = vpop.f32.mrf.mxu0 }
 0x3c3   :  { %v5828_v24 = vpop.f32.mrf.mxu1 }
 0x3c4   :  { %v5829_v6 = vadd.f32 %v5828_v24, %v5788_v28 }
 0x3c5   :  { %v5830_v8 = vpop.f32.mrf.mxu1 }
 0x3c6   :  { %v5831_v3 = vadd.f32 %v5830_v8, %v5790_v21 }
 0x3c7   :  { %v5832_v0 = vpop.f32.mrf.mxu1 }
 0x3c9   :  { %v5833_v30 = vpop.f32.mrf.mxu1 }
 0x3d2   :  { %v5869_v43 = vpop.f32.mrf.mxu0 }
 0x3d3   :  { %v5910_v27 = vpop.f32.mrf.mxu1  ;;  %v5870_v9 = vadd.f32 %v5869_v43, %v5829_v6 }
 0x3d4   :  { %v5871_v29 = vpop.f32.mrf.mxu0 }
 0x3d5   :  { %v5912_v31 = vpop.f32.mrf.mxu1  ;;  %v5911_v33 = vadd.f32 %v5910_v27, %v5870_v9  ;;  %v5872_v41 = vadd.f32 %v5871_v29, %v5831_v3 }
 0x3d6   :  { %v5873_v22 = vpop.f32.mrf.mxu0 }
 0x3d7   :  { %v5914_v54 = vpop.f32.mrf.mxu1  ;;  %v5913_v34 = vadd.f32 %v5912_v31, %v5872_v41  ;;  %v5919_v23 = vmax.f32 %v5911_v33, 0.0 }
 0x3d8   :  { %v5874_v36 = vpop.f32.mrf.mxu0 }
 0x3d9   :  { %v5915_v17 = vpop.f32.mrf.mxu1  ;;  %v5920_v47 = vmax.f32 %v5913_v34, 0.0  ;;  %v5923_v45 = vpack.c.bf16 %v5919_v23, %v5919_v23 }
 0x3db   :  { %v5924_v44 = vpack.c.bf16 %v5920_v47, %v5920_v47 }
 0x3dd   :  { %6260 = vmatprep.mubr.bf16.mxu1 %v5924_v44 }
 0x3de   :  { %6261 = vmatmul.mubr.bf16.vlgmr.msra.gmra.mxu1 %v5923_v45 }
 0x3f2   :  { %v7146_v25 = vpop.f32.mrf.mxu0 }
 0x3f4   :  { %v7147_v46 = vpop.f32.mrf.mxu0 }
 0x3f5   :  { %v7148_v49 = vadd.f32 %v7147_v46, %v7146_v25 }
 0x3f6   :  { %v7149_v38 = vpop.f32.mrf.mxu0 }
 0x3f7   :  { %v6223_v63 = vadd.f32 %v7148_v49, %v7097_v50 }
 0x3f8   :  { %v7150_v59 = vpop.f32.mrf.mxu0 }
 0x49e   :  { %v7168_v53 = vpop.f32.mrf.mxu1 }
 0x4a0   :  { %v7169_v60 = vpop.f32.mrf.mxu1 }
 0x4a1   :  { %v7170_v52 = vadd.f32 %v7169_v60, %v7168_v53 }
 0x4a2   :  { %v7171_v1 = vpop.f32.mrf.mxu1 }
 0x4a3   :  { %v6263_v7 = vadd.f32 %v7170_v52, %v6223_v63 }
 0x4a4   :  { %v7172_v57 = vpop.f32.mrf.mxu1 }
 0x4a5   :  { %v6271_v58 = vsel %vm6270_vm1, %v6263_v7, -1e+30 }
 0x4a6   :  { %6272 = vmax.xlane.f32.xlu0 %v6271_v58 }
 0x52f   :  { %v6273_v56 = vpop.xlane.xlu0 %6272 }
 0x530   :  { %v6274_v5 = vsub.f32 %v6271_v58, %v6273_v56 }
 0x532   :  { %v6275_v61 = vmul.f32 1.442695, %v6274_v5 }
 0x534   :  { %8408 = vpow2.f32 %v6275_v61 }
 0x541   :  { %v8409_v42 = vpop.eup %8408 }
 0x542   :  { %6277 = vadd.xlane.f32.xlu0 %v8409_v42 }
 0x5cb   :  { %v6278_v15 = vpop.xlane.xlu0 %6277 }
 0x5cc   :  { %8410 = vrcp.f32 %v6278_v15 }
 0x5d9   :  { %v8411_v10 = vpop.eup %8410 }
 0x5da   :  { %v6280_v37 = vmul.f32 %v8411_v10, %v8409_v42 }
 0x5dc   :  { %6281 = vst [vmem:[%s11168_s5] sm:$0xff] %v6280_v37 }

</bundles_post_ra>
